<compile_context>
chip_gen: v5e
topology: v5e:2x2
jax: 0.10.0
libtpu: 0.0.40
codegen_flags: <defaults>
</compile_context>

<pallas_src>
import numpy as np
import jax
import jax.numpy as jnp
from jax.experimental import pallas as pl
from jax.experimental.pallas import tpu as pltpu

# ----------------------- model hyper-parameters (small) -----------------------
E = 32          # embedding_size
L = 4           # n_frequencies -> encoder.n_output_dims = 2 * L = 8
H = 32          # n_neurons
OUT = 1         # RegressionNet.output_dim

# unique_labels -> scale_up parameters (deterministic, in-script)
_UNIQUE_LABELS = np.array([0.0, 2.0, 5.0, 10.0], dtype=np.float32)
MIN_VAL = float(_UNIQUE_LABELS.min())
SCALE = float(_UNIQUE_LABELS.max() - _UNIQUE_LABELS.min())
ACT_LAYER = "Sigmoid"   # one of {"None", "Sigmoid", "Softmax"}

# Frequency-encoding constants (column vectors for the batch-minor layout).
# cos(x) == sin(x + pi/2): one EUP sin emits the whole [sin | cos] feature block.
# Passed to the kernel as inputs (Pallas rejects captured array constants).
_FREQS_COL = (np.concatenate([2.0 ** np.arange(L), 2.0 ** np.arange(L)])
              .astype(np.float32)[:, None] * np.float32(np.pi))        # (2L, 1)
_PHASE_COL = (np.concatenate([np.zeros(L), np.full(L, 0.5 * np.pi)])
              .astype(np.float32)[:, None])                            # (2L, 1)


def _apply_act(x, name, axis):
    if name == "None":
        return x
    if name == "Sigmoid":
        return jax.nn.sigmoid(x)
    if name == "Softmax":
        return jax.nn.softmax(x, axis=axis)
    raise AssertionError(f"act_layer={name} is invalid")


def _round_up(n, m):
    return ((n + m - 1) // m) * m


# --------------------------------- kernel ------------------------------------
def scorenet_kernel(t_ref, embT_ref, freqs_ref, phase_ref,
                    w1fT_ref, w1eT_ref, w2T_ref, w3T_ref, o_ref):
    # Batch-minor: batch fills the 128-lane axis everywhere.
    # t_ref:(1,TB) f32   embT_ref:(E,TB) bf16
    # freqs_ref/phase_ref:(2L,1) f32
    # w1fT_ref:(H,2L) w1eT_ref:(H,E) w2T_ref:(H,H) w3T_ref:(OUT,H)  all bf16
    t = t_ref[...]                                                    # (1, TB) f32

    # Frequency encoding: one EUP sin produces [sin(2^k pi t) | cos(2^k pi t)].
    feat = jnp.sin(freqs_ref[...] * t + phase_ref[...])               # (2L, TB) f32

    # Layer 1: relu( W1f^T @ [sin|cos] + W1e^T @ emb^T )  -- bf16 ops, f32 acc.
    # (Kept as 2 dots; fusing to one K=40 dot needs a mid-tile bf16 sublane
    #  concat -- only worth it once the bundle dump shows MXU-cadence-bound.)
    h = (jnp.dot(w1fT_ref[...], feat.astype(jnp.bfloat16),
                 preferred_element_type=jnp.float32)
         + jnp.dot(w1eT_ref[...], embT_ref[...],
                   preferred_element_type=jnp.float32))               # (H, TB)
    h = jnp.maximum(h, 0.0)

    # Layer 2: relu( W2^T @ h )
    h = jnp.maximum(
        jnp.dot(w2T_ref[...], h.astype(jnp.bfloat16),
                preferred_element_type=jnp.float32), 0.0)             # (H, TB)

    # Output layer: linear (no output activation inside the MLP).
    out = jnp.dot(w3T_ref[...], h.astype(jnp.bfloat16),
                  preferred_element_type=jnp.float32)                 # (OUT, TB)

    # RegressionNet.scale_up + act_layer (f32 elementwise).  Feature axis is 0
    # in the batch-minor layout.  Lane-dense unmasked store.
    out = out * jnp.float32(SCALE) + jnp.float32(MIN_VAL)
    o_ref[...] = _apply_act(out, ACT_LAYER, axis=0)


# --------------------------------- wrapper ------------------------------------
def scorenet_forward(t, embedding, params, *, tb=2048):
    """t: (B,1) or (B,) f32, embedding: (B,E) f32 -> (B,OUT) f32.

    tb: batch rows per grid step (multiple of 128).  Internally the kernel runs
    batch-minor: t as (1,B), embedding as (E,B) bf16, output as (OUT,B).
    Partial final blocks are safe: every op is per-batch-column.
    """
    w1s, w1c, w1e, w2, w3 = params
    b = int(t.shape[0])

    # Lane-dense batch-minor inputs.  (B,1)->(1,B) is a pure reshape.
    t_row = jnp.reshape(t.astype(jnp.float32), (1, b))
    # TODO(synk): produce embeddings pre-transposed (E,B) upstream to avoid this
    # extra HBM pass; the kernel only needs the (E,B) bf16 form.
    embT = jnp.transpose(embedding).astype(jnp.bfloat16)              # (E, B)

    # Weights transposed once, streamed/resident as bf16.
    w1fT = jnp.concatenate([w1s, w1c], axis=0).T.astype(jnp.bfloat16)  # (H, 2L)
    w1eT = w1e.T.astype(jnp.bfloat16)                                  # (H, E)
    w2T = w2.T.astype(jnp.bfloat16)                                    # (H, H)
    w3T = w3.T.astype(jnp.bfloat16)                                    # (OUT, H)

    freqs = jnp.asarray(_FREQS_COL)                                    # (2L, 1)
    phase = jnp.asarray(_PHASE_COL)                                    # (2L, 1)

    assert tb % 128 == 0, "tb must be a multiple of 128 (lane width)"
    tb = min(tb, _round_up(b, 128))          # don't over-tile tiny batches
    grid = (pl.cdiv(b, tb),)

    batch_tile = lambda i: (0, i)            # data: walk the batch (lane) axis
    const = lambda i: (0, 0)                 # weights/constants: VMEM-resident

    out_bm = pl.pallas_call(
        scorenet_kernel,
        out_shape=jax.ShapeDtypeStruct((OUT, b), jnp.float32),
        grid=grid,
        in_specs=[
            pl.BlockSpec((1, tb), batch_tile),        # t (batch-minor)
            pl.BlockSpec((E, tb), batch_tile),        # embedding^T
            pl.BlockSpec((2 * L, 1), const),          # frequencies
            pl.BlockSpec((2 * L, 1), const),          # phases
            pl.BlockSpec((H, 2 * L), const),          # W1^T (sin|cos cols)
            pl.BlockSpec((H, E), const),              # W1^T (embedding cols)
            pl.BlockSpec((H, H), const),              # W2^T
            pl.BlockSpec((OUT, H), const),            # W3^T
        ],
        out_specs=pl.BlockSpec((OUT, tb), batch_tile),
        compiler_params=pltpu.CompilerParams(
            dimension_semantics=("parallel",),        # shard batch across TCs
            vmem_limit_bytes=32 * 1024 * 1024,        # headroom for tb sweeps
        ),
    )(t_row, embT, freqs, phase, w1fT, w1eT, w2T, w3T)

    # (OUT, B) batch-minor -> (B, OUT).  For OUT == 1 this is a free reshape.
    return jnp.transpose(out_bm)


# ------------------------- pure-JAX reference (check) -------------------------
def scorenet_reference(t, embedding, params):
    """Mirrors the kernel's bf16-operand / f32-accumulation numerics."""
    w1s, w1c, w1e, w2, w3 = params
    t = jnp.reshape(t.astype(jnp.float32), (-1, 1))
    # Same constants / same phase-trick as the kernel -> identical f32 features.
    feat = jnp.sin(t * jnp.asarray(_FREQS_COL).T + jnp.asarray(_PHASE_COL).T)  # (B, 2L)
    x = jnp.concatenate([feat.astype(jnp.bfloat16),
                         embedding.astype(jnp.bfloat16)], axis=-1)             # (B, 2L+E)
    w1 = jnp.concatenate([w1s, w1c, w1e], axis=0).astype(jnp.bfloat16)          # (2L+E, H)
    h = jnp.maximum(jnp.dot(x, w1, preferred_element_type=jnp.float32), 0.0)
    h = jnp.maximum(jnp.dot(h.astype(jnp.bfloat16), w2.astype(jnp.bfloat16),
                            preferred_element_type=jnp.float32), 0.0)
    out = jnp.dot(h.astype(jnp.bfloat16), w3.astype(jnp.bfloat16),
                  preferred_element_type=jnp.float32)
    out = out * SCALE + MIN_VAL
    return _apply_act(out, ACT_LAYER, axis=-1)


# ---------------------------------- main --------------------------------------
if __name__ == "__main__":
    key = jax.random.PRNGKey(0)
    k_t, k_e, k1, k2, k3, k4, k5 = jax.random.split(key, 7)

    B = 8192   # production-like batch; default tb=2048 -> grid of 4 (even, 2 TCs)

    # Deterministic synthetic parameters (no checkpoint loading).
    w1s = jax.random.normal(k1, (L, H), dtype=jnp.float32) * 0.1
    w1c = jax.random.normal(k2, (L, H), dtype=jnp.float32) * 0.1
    w1e = jax.random.normal(k3, (E, H), dtype=jnp.float32) * 0.1
    w2 = jax.random.normal(k4, (H, H), dtype=jnp.float32) * 0.1
    w3 = jax.random.normal(k5, (H, OUT), dtype=jnp.float32) * 0.1
    params = (w1s, w1c, w1e, w2, w3)

    # Inputs: t in [0,1) (as tcnn encodings expect), embedding ~ N(0,1).
    t = jax.random.uniform(k_t, (B, 1), dtype=jnp.float32)
    embedding = jax.random.normal(k_e, (B, E), dtype=jnp.float32)

    out = scorenet_forward(t, embedding, params)
    out = jax.block_until_ready(out)

    ref = scorenet_reference(t, embedding, params)
    # Tolerance covers bf16-operand rounding + f32 accumulation-order differences.
    np.testing.assert_allclose(np.asarray(out), np.asarray(ref),
                               rtol=2e-3, atol=2e-3)
    print("KERNEL_OK")
</pallas_src>

<mosaic_0001>
module attributes {stable_mosaic.version = 11 : i64} {
  func.func @scorenet_kernel(%arg0: i32, %arg1: memref<1x2048xf32, #tpu.memory_space<vmem>>, %arg2: memref<32x2048xbf16, #tpu.memory_space<vmem>>, %arg3: memref<8x1xf32, #tpu.memory_space<vmem>>, %arg4: memref<8x1xf32, #tpu.memory_space<vmem>>, %arg5: memref<32x8xbf16, #tpu.memory_space<vmem>>, %arg6: memref<32x32xbf16, #tpu.memory_space<vmem>>, %arg7: memref<32x32xbf16, #tpu.memory_space<vmem>>, %arg8: memref<1x32xbf16, #tpu.memory_space<vmem>>, %arg9: memref<1x2048xf32, #tpu.memory_space<vmem>>) attributes {dimension_semantics = [#tpu.dimension_semantics<parallel>], iteration_bounds = array<i64: 4>, scalar_prefetch = 0 : i64, scratch_operands = 0 : i64, tpu.core_type = #tpu.core_type<tc>, window_params = [{transform_indices = @transform_0, window_bounds = array<i64: 1, 2048>}, {transform_indices = @transform_1, window_bounds = array<i64: 32, 2048>}, {pipeline_mode = #tpu.pipeline_mode<synchronous>, transform_indices = @transform_2, window_bounds = array<i64: 8, 1>}, {pipeline_mode = #tpu.pipeline_mode<synchronous>, transform_indices = @transform_3, window_bounds = array<i64: 8, 1>}, {pipeline_mode = #tpu.pipeline_mode<synchronous>, transform_indices = @transform_4, window_bounds = array<i64: 32, 8>}, {pipeline_mode = #tpu.pipeline_mode<synchronous>, transform_indices = @transform_5, window_bounds = array<i64: 32, 32>}, {pipeline_mode = #tpu.pipeline_mode<synchronous>, transform_indices = @transform_6, window_bounds = array<i64: 32, 32>}, {pipeline_mode = #tpu.pipeline_mode<synchronous>, transform_indices = @transform_7, window_bounds = array<i64: 1, 32>}, {transform_indices = @transform_8, window_bounds = array<i64: 1, 2048>}]} {
    %c0 = arith.constant 0 : index
    %c0_0 = arith.constant 0 : index
    %0 = vector.load %arg1[%c0, %c0_0] : memref<1x2048xf32, #tpu.memory_space<vmem>>, vector<1x2048xf32>
    %c0_1 = arith.constant 0 : index
    %c0_2 = arith.constant 0 : index
    %1 = vector.load %arg3[%c0_1, %c0_2] : memref<8x1xf32, #tpu.memory_space<vmem>>, vector<8x1xf32>
    %2 = vector.broadcast %1 : vector<8x1xf32> to vector<8x2048xf32>
    %3 = vector.broadcast %0 : vector<1x2048xf32> to vector<8x2048xf32>
    %4 = arith.mulf %2, %3 : vector<8x2048xf32>
    %c0_3 = arith.constant 0 : index
    %c0_4 = arith.constant 0 : index
    %5 = vector.load %arg4[%c0_3, %c0_4] : memref<8x1xf32, #tpu.memory_space<vmem>>, vector<8x1xf32>
    %6 = vector.broadcast %5 : vector<8x1xf32> to vector<8x2048xf32>
    %7 = arith.addf %4, %6 : vector<8x2048xf32>
    %8 = math.sin %7 : vector<8x2048xf32>
    %c0_5 = arith.constant 0 : index
    %c0_6 = arith.constant 0 : index
    %9 = vector.load %arg5[%c0_5, %c0_6] : memref<32x8xbf16, #tpu.memory_space<vmem>>, vector<32x8xbf16>
    %10 = arith.truncf %8 : vector<8x2048xf32> to vector<8x2048xbf16>
    %cst = arith.constant dense<0.000000e+00> : vector<32x2048xf32>
    %11 = tpu.matmul %9, %10, %cst {dimension_numbers = #tpu.dot_dimension_numbers<[1], [0], [0], [1], [0, 0, 1, 1], [], []>} : vector<32x8xbf16>, vector<8x2048xbf16>, vector<32x2048xf32> -> vector<32x2048xf32>
    %c0_7 = arith.constant 0 : index
    %c0_8 = arith.constant 0 : index
    %12 = vector.load %arg6[%c0_7, %c0_8] : memref<32x32xbf16, #tpu.memory_space<vmem>>, vector<32x32xbf16>
    %c0_9 = arith.constant 0 : index
    %c0_10 = arith.constant 0 : index
    %13 = vector.load %arg2[%c0_9, %c0_10] : memref<32x2048xbf16, #tpu.memory_space<vmem>>, vector<32x2048xbf16>
    %cst_11 = arith.constant dense<0.000000e+00> : vector<32x2048xf32>
    %14 = tpu.matmul %12, %13, %cst_11 {dimension_numbers = #tpu.dot_dimension_numbers<[1], [0], [0], [1], [0, 0, 1, 1], [], []>} : vector<32x32xbf16>, vector<32x2048xbf16>, vector<32x2048xf32> -> vector<32x2048xf32>
    %15 = arith.addf %11, %14 : vector<32x2048xf32>
    %cst_12 = arith.constant 0.000000e+00 : f32
    %16 = vector.broadcast %cst_12 : f32 to vector<32x2048xf32>
    %17 = arith.maximumf %15, %16 : vector<32x2048xf32>
    %c0_13 = arith.constant 0 : index
    %c0_14 = arith.constant 0 : index
    %18 = vector.load %arg7[%c0_13, %c0_14] : memref<32x32xbf16, #tpu.memory_space<vmem>>, vector<32x32xbf16>
    %19 = arith.truncf %17 : vector<32x2048xf32> to vector<32x2048xbf16>
    %cst_15 = arith.constant dense<0.000000e+00> : vector<32x2048xf32>
    %20 = tpu.matmul %18, %19, %cst_15 {dimension_numbers = #tpu.dot_dimension_numbers<[1], [0], [0], [1], [0, 0, 1, 1], [], []>} : vector<32x32xbf16>, vector<32x2048xbf16>, vector<32x2048xf32> -> vector<32x2048xf32>
    %cst_16 = arith.constant 0.000000e+00 : f32
    %21 = vector.broadcast %cst_16 : f32 to vector<32x2048xf32>
    %22 = arith.maximumf %20, %21 : vector<32x2048xf32>
    %c0_17 = arith.constant 0 : index
    %c0_18 = arith.constant 0 : index
    %23 = vector.load %arg8[%c0_17, %c0_18] : memref<1x32xbf16, #tpu.memory_space<vmem>>, vector<1x32xbf16>
    %24 = arith.truncf %22 : vector<32x2048xf32> to vector<32x2048xbf16>
    %cst_19 = arith.constant dense<0.000000e+00> : vector<1x2048xf32>
    %25 = tpu.matmul %23, %24, %cst_19 {dimension_numbers = #tpu.dot_dimension_numbers<[1], [0], [0], [1], [0, 0, 1, 1], [], []>} : vector<1x32xbf16>, vector<32x2048xbf16>, vector<1x2048xf32> -> vector<1x2048xf32>
    %cst_20 = arith.constant 1.000000e+01 : f32
    %26 = vector.broadcast %cst_20 : f32 to vector<1x2048xf32>
    %27 = arith.mulf %25, %26 : vector<1x2048xf32>
    %cst_21 = arith.constant 0.000000e+00 : f32
    %28 = vector.broadcast %cst_21 : f32 to vector<1x2048xf32>
    %29 = arith.addf %27, %28 : vector<1x2048xf32>
    %30 = arith.negf %29 : vector<1x2048xf32>
    %31 = math.exp %30 : vector<1x2048xf32>
    %cst_22 = arith.constant 1.000000e+00 : f32
    %32 = vector.broadcast %cst_22 : f32 to vector<1x2048xf32>
    %33 = arith.addf %32, %31 : vector<1x2048xf32>
    %34 = arith.divf %32, %33 : vector<1x2048xf32>
    %c0_23 = arith.constant 0 : index
    %c0_24 = arith.constant 0 : index
    %35 = vector.load %arg9[%c0_23, %c0_24] : memref<1x2048xf32, #tpu.memory_space<vmem>>, vector<1x2048xf32>
    tpu.vector_store %arg9[%c0_23, %c0_24], %34 {strides = array<i32>} : memref<1x2048xf32, #tpu.memory_space<vmem>>, vector<1x2048xf32>,
    return
  }
  func.func @transform_0(%arg0: i32) -> (i32, i32) {
    %c0_i32 = arith.constant 0 : i32
    %c0_i32_0 = arith.constant 0 : i32
    return %c0_i32, %arg0 : i32, i32
  }
  func.func @transform_1(%arg0: i32) -> (i32, i32) {
    %c0_i32 = arith.constant 0 : i32
    %c0_i32_0 = arith.constant 0 : i32
    return %c0_i32, %arg0 : i32, i32
  }
  func.func @transform_2(%arg0: i32) -> (i32, i32) {
    %c0_i32 = arith.constant 0 : i32
    %c0_i32_0 = arith.constant 0 : i32
    %c0_i32_1 = arith.constant 0 : i32
    return %c0_i32, %c0_i32_0 : i32, i32
  }
  func.func @transform_3(%arg0: i32) -> (i32, i32) {
    %c0_i32 = arith.constant 0 : i32
    %c0_i32_0 = arith.constant 0 : i32
    %c0_i32_1 = arith.constant 0 : i32
    return %c0_i32, %c0_i32_0 : i32, i32
  }
  func.func @transform_4(%arg0: i32) -> (i32, i32) {
    %c0_i32 = arith.constant 0 : i32
    %c0_i32_0 = arith.constant 0 : i32
    %c0_i32_1 = arith.constant 0 : i32
    return %c0_i32, %c0_i32_0 : i32, i32
  }
  func.func @transform_5(%arg0: i32) -> (i32, i32) {
    %c0_i32 = arith.constant 0 : i32
    %c0_i32_0 = arith.constant 0 : i32
    %c0_i32_1 = arith.constant 0 : i32
    return %c0_i32, %c0_i32_0 : i32, i32
  }
  func.func @transform_6(%arg0: i32) -> (i32, i32) {
    %c0_i32 = arith.constant 0 : i32
    %c0_i32_0 = arith.constant 0 : i32
    %c0_i32_1 = arith.constant 0 : i32
    return %c0_i32, %c0_i32_0 : i32, i32
  }
  func.func @transform_7(%arg0: i32) -> (i32, i32) {
    %c0_i32 = arith.constant 0 : i32
    %c0_i32_0 = arith.constant 0 : i32
    %c0_i32_1 = arith.constant 0 : i32
    return %c0_i32, %c0_i32_0 : i32, i32
  }
  func.func @transform_8(%arg0: i32) -> (i32, i32) {
    %c0_i32 = arith.constant 0 : i32
    %c0_i32_0 = arith.constant 0 : i32
    return %c0_i32, %arg0 : i32, i32
  }
}

</mosaic_0001>

<bundles_post_ra>
// kernel: tpu_custom_call.1
= control target key start
LH: loop header
LB: loop body
LE: loop exit
PB: predicated region body
PF: predicated region fallthrough
CT: control target
= control target key end

     0   :  { %s8784_s0 = inlined_call_operand.hbm [shape: f32[1,8192], index: 0, kind: input, shape index: {}]   ;;  %s8785_s1 = inlined_call_operand.hbm [shape: bf16[32,8192], index: 1, kind: input, shape index: {}]   ;;  %s8786_s2 = inlined_call_operand.vmem [shape: f32[8,1], index: 2, kind: input, shape index: {}]   ;;  %s8787_s3 = inlined_call_operand.vmem [shape: f32[8,1], index: 3, kind: input, shape index: {}]   ;;  %s8788_s4 = inlined_call_operand.vmem [shape: bf16[32,8], index: 4, kind: input, shape index: {}]   ;;  %s8789_s5 = inlined_call_operand.vmem [shape: bf16[32,32], index: 5, kind: input, shape index: {}]   ;;  %s8790_s6 = inlined_call_operand.hbm [shape: bf16[32,32], index: 6, kind: input, shape index: {}]   ;;  %s8791_s7 = inlined_call_operand.vmem [shape: bf16[1,32], index: 7, kind: input, shape index: {}]   ;;  %s8792_s8 = inlined_call_operand.hbm [shape: f32[1,8192], index: 8, kind: output, shape index: {}]  }
   0x1   :  { %8806 = sst [smem:[#allocation41_spill]] %s8790_s6 }
   0x2   :  { %13 = vsyncpa [#allocation3], 0 }
   0x3   :  { %15 = vsyncpa [#allocation3 + $0x1], 0 }
   0x4   :  { %16 = vsyncpa [#allocation6], 0 }
   0x5   :  { %18 = vsyncpa [#allocation6 + $0x1], 0 }
   0x6   :  { %19 = vsyncpa [#allocation4], 0 }
   0x7   :  { %21 = vsyncpa [#allocation4 + $0x1], 0  ;;  %s5840_s27 = smov 0   ;;  %s5842_s28 = smov 0  }
   0x8   :  { %s5844_s29 = smov 0   ;;  %s5846_s30 = smov 0  }
   0x9 LB: > { %8807 = sst [smem:[#allocation13_spill]] %s5769_s27  ;;  %s5864_s12 = sadd.s32 4294967295, %s5781_s30   ;;  %s5781_s30 = sphi %s5846_s30, %s8947_s30   ;;  %s5777_s29 = sphi %s5844_s29, %s8949_s29   ;;  %s5773_s28 = sphi %s5842_s28, %s8951_s28   ;;  %s5769_s27 = sphi %s5840_s27, %s8950_s27  }
   0xa   : > { %8808 = sst [smem:[#allocation14_spill]] %s5777_s29  ;;  %p5089_p0 = scmp.ge.s32.totalorder %s5781_s30, 1 }
   0xb   : > { %s8809_s6 = sld [smem:[#allocation41_spill]]  ;;  %p48_p1 = scmp.eq.s32.totalorder %s5864_s12, 0 }
   0xc   : > { %p236_p2 = scmp.lt.s32.totalorder %s5781_s30, 5  ;;  %s5783_s14 = smov [#allocation7]  }
   0xd   : > { %s261_s15 = sshll.u32 %s5783_s14, 4  ;;  %s8793_s16 = smov 64   ;;  %s262_s15 = int_to_ptr.vmem [resolvable:$true] %s261_s15 }
   0xe   : > { %p5869_p3 = pnand %p5089_p0, %p236_p2  ;;  %s5785_s17 = smov 4  }
   0xf   : > { %s5088_s18 = sadd.s32 4294967294, %s5781_s30   ;;  %s5881_s19 = sadd.s32 1, %s5781_s30  }
  0x10   : > { %p5483_p4 = pneg %p5869_p3  ;;  %8811 = sst [smem:[#allocation15_spill]] %s5881_s19 }
  0x11   : > { %s259_s11 = sshll.u32 %s8809_s6, 4  ;;  %s34_s20 = sadd.s32 1, %s5777_s29  ;;  %s260_s11 = int_to_ptr.hbm [resolvable:$true] %s259_s11 }
  0x12   : > { %p5484_p5 = pnand %p5483_p4, %p48_p1  ;;  %s31_s21 = ssub.s32 %s5781_s30, %s5881_s19 }
  0x13   : > { %p41_p6 = scmp.ne.s32.totalorder %s5777_s29, %s5773_s28  ;;  %p32_p7 = scmp.eq.s32.totalorder %s31_s21, 0 }
  0x14   : > { %5486 = dma.hbm_to_vmem [thread:$0]  (!%p5484_p5), %s260_s11, 256, %s262_s15, [#allocation6], %s8793_s16, %s8793_s16, %s5785_s17  }
  0x15   : > { %p42_p8 = scmp.eq.s32.totalorder %s5781_s30, 0  ;;  %p47_p9 = scmp.ne.s32.totalorder %s5773_s28, %s5769_s27 }
  0x16   : > { %p223_p10 = scmp.eq.s32.totalorder %s5864_s12, 3  ;;  %p229_p0 = scmp.eq.s32.totalorder %s5088_s18, 3 }
  0x17   : > { %s5893_s22 = scalar_select %p32_p7, %s5777_s29, %s34_s20  }
  0x18   : > { %p5895_p11 = por %p42_p8, %p41_p6  ;;  %p5901_p12 = por %p48_p1, %p47_p9 }
  0x19   : > { %8812 = sst [smem:[#allocation16_spill]] %s5893_s22  ;;  %p5905_p13 = por %p223_p10, %p41_p6 }
  0x1a   : > { %p5499_p2 = scmp.lt.s32.totalorder %s5781_s30, 4  ;;  %s5911_s26 = sand.u32 1, %s5777_s29  }
  0x1b   : > { %p5913_p4 = por %p229_p0, %p47_p9  ;;  %s5092_s10 = sshll.u32 %s5911_s26, 4 }
  0x1c   : > { %s5093_s11 = sshll.u32 %s5781_s30, 4  ;;  %s282_s21 = scalar_lea.vmem [#allocation2], %s5092_s10 }
  0x1d   : > { %s8816_s9 = scalar_select %p5913_p4, 1, 0 }
  0x1e   : > { %s286_s17 = scalar_lea.hbm %s8784_s0, %s5093_s11  ;;  %s290_s16 = sshll.u32 %s282_s21, 4  ;;  %s291_s16 = int_to_ptr.vmem [resolvable:$true] %s290_s16 }
  0x1f   : > { %8817 = sst [smem:[#allocation17_spill]] %s8816_s9  ;;  %s288_s20 = sshll.u32 %s286_s17, 4  ;;  %s289_s20 = int_to_ptr.hbm [resolvable:$true] %s288_s20 }
  0x20   : > { %p5924_p5 = pnand %p5499_p2, %p5895_p11  ;;  %s5094_s6 = sshll.u32 %s5911_s26, 8 }
  0x21   : > { %s297_s22 = sand.u32 1, %s5781_s30   ;;  %s301_s29 = scalar_lea.vmem [#allocation5], %s5094_s6 }
  0x22   : > { %s309_s19 = sshll.u32 %s301_s29, 4  ;;  %s279_s9 = scalar_lea.sflag [#allocation3], %s5911_s26  ;;  %s310_s19 = int_to_ptr.vmem [resolvable:$true] %s309_s19 }
  0x23   : > { %s5647_s27 = sshra.s32 %s289_s20, 4  ;;  %p5651_p7 = pneg %p5924_p5  ;;  %s5648_s27 = int_to_ptr.hbm [resolvable:$true] %s5647_s27 }
  0x24   : > { %s5649_s11 = scalar_lea.hbm %s5648_s27, 16  ;;  %s5654_s14 = scalar_lea.hbm %s8784_s0, 64 }
  0x25   : > { %p5650_p6 = scmp.ne.s32.totalorder %s5648_s27, %s5649_s11  ;;  %p5655_p10 = scmp.lt.s32.totalorder %s5648_s27, %s8784_s0 }
  0x26   : > { %p5656_p11 = scmp.lt.s32.totalorder %s5654_s14, %s5649_s11 }
  0x27   : > { %p5652_p8 = pnand %p5651_p7, %p5650_p6 }
  0x28   : > { %p5657_p0 = por %p5656_p11, %p5655_p10 }
  0x29   : > { %p5653_p9 = pneg %p5652_p8 }
  0x2b   : > { %p5658_p2 = pnand %p5657_p0, %p5653_p9 }
  0x2d   : > { %5661 = shalt.err (!%p5658_p2)
}
  0x2e   : > { %5490 = dma.hbm_to_vmem [thread:$0]  (!%p5924_p5), %s289_s20, 256, %s291_s16, %s279_s9  }
  0x2f   : > { %s5434_s6 = sshll.u32 %s5781_s30, 6  ;;  %s298_s10 = scalar_lea.sflag [#allocation6], %s297_s22 }
  0x30   : > { %s306_s21 = scalar_lea.hbm %s8785_s1, %s5434_s6  ;;  %s5684_s16 = scalar_lea.hbm %s8785_s1, 1024 }
  0x31   : > { %s307_s23 = sshll.u32 %s306_s21, 4  ;;  %s308_s23 = int_to_ptr.hbm [resolvable:$true] %s307_s23 }
  0x32   : > { %s5677_s15 = sshra.s32 %s308_s23, 4  ;;  %s5678_s15 = int_to_ptr.hbm [resolvable:$true] %s5677_s15 }
  0x33   : > { %s5679_s27 = scalar_lea.hbm %s5678_s15, 256  ;;  %p5685_p10 = scmp.lt.s32.totalorder %s5678_s15, %s8785_s1 }
  0x34   : > { %p5680_p6 = scmp.ne.s32.totalorder %s5678_s15, %s5679_s27  ;;  %p5686_p11 = scmp.lt.s32.totalorder %s5684_s16, %s5679_s27 }
  0x36   : > { %p5682_p8 = pnand %p5680_p6, %p5651_p7  ;;  %p5687_p0 = por %p5686_p11, %p5685_p10 }
  0x38   : > { %p5683_p9 = pneg %p5682_p8 }
  0x3a   : > { %p5688_p2 = pnand %p5687_p0, %p5683_p9 }
  0x3c   : > { %5691 = shalt.err (!%p5688_p2)
}
  0x3d   : > { %s5786_s22 = smov 4096   ;;  %s5787_s17 = smov 1024  }
  0x3e   : > { %s8819_s6 = smov 64   ;;  %321 = sbr.rel (%p5869_p3) target bundleno = 1374 (0x55e), region = 52 }
  0x3f   : > { %5493 = dma.hbm_to_vmem [thread:$0]  (!%p5924_p5), %s308_s23, 4096, %s310_s19, %s298_s10, %s5786_s22, %s5787_s17, %s8819_s6  }
  0x43   : > { %s5963_s29 = sand.u32 1, %s5773_s28  }
  0x44   : > { %s5098_s26 = sshll.u32 %s5963_s29, 4  ;;  %s324_s21 = scalar_lea.sflag [#allocation3], %s5963_s29 }
  0x45   : > { %s5969_s15 = scalar_lea.vmem [#allocation2], %s5098_s26 }
  0x46   : > { %5752 = dma.done.wait (%p5901_p12), %s324_s21, 256  }
  0x47   : > { %5754 = vsyncadd (%p5901_p12), %s324_s21, 4294967040  ;;  %s333_s13 = sand.u32 1, %s5864_s12   ;;  %s5099_s19 = sshll.u32 %s5963_s29, 8 }
  0x48   : > { %s334_s18 = scalar_lea.sflag [#allocation6], %s333_s13  ;;  %s5977_s23 = scalar_lea.vmem [#allocation5], %s5099_s19 }
  0x49   : > { %5756 = dma.done.wait (%p5901_p12), %s334_s18, 4096  }
  0x4a   : > { %5758 = vsyncadd (%p5901_p12), %s334_s18, 4294963200 }
  0x4b   : > { %5760 = dma.done.wait (%p48_p1), [#allocation6], 256  }
  0x4c   : > { %5762 = vsyncadd (%p48_p1), [#allocation6], 4294967040  ;;  %v5788_v0 = vmov 0   ;;  %v387_v1 = vld [vmem:[%s8786_s2] sm:$0xff]  ;;  %v5232_v2 = vld [vmem:[%s5977_s23 + $0x88] sm:$0xf] }
  0x4d   : > { %5546 = vset.pattern.permute.xlu0 %v5788_v0  ;;  %v5464_v3 = vld [vmem:[%s5977_s23 + $0xc4] sm:$0xf0]  ;;  %v5456_v4 = vld [vmem:[%s5977_s23 + $0x8c] sm:$0xf]  ;;  %v5224_v8 = vld [vmem:[%s5977_s23 + $0x80] sm:$0xf] }
  0x4e   : > { %390 = vperm.xlu0 %5546, %v387_v1   ;;  %v5234_v5 = vld [vmem:[%s5977_s23 + $0xc8] sm:$0xf0]  ;;  %v5233_v6 = vor.u32 %v5464_v3, %v5232_v2  ;;  %v5463_v9 = vld [vmem:[%s5977_s23 + $0xbc] sm:$0xf0]  ;;  %v5455_v10 = vld [vmem:[%s5977_s23 + $0x84] sm:$0xf] }
  0x4f   : > { %v5237_v7 = vor.u32 %v5456_v4, %v5234_v5  ;;  %v5225_v11 = vor.u32 %v5463_v9, %v5224_v8  ;;  %v5226_v12 = vld [vmem:[%s5977_s23 + $0xc0] sm:$0xf0]  ;;  %v5168_v13 = vld [vmem:[%s5977_s23 + $0x8] sm:$0xf]  ;;  %v5440_v17 = vld [vmem:[%s5977_s23 + $0xc] sm:$0xf] }
  0x50   : > { %v5448_v14 = vld [vmem:[%s5977_s23 + $0x44] sm:$0xf0]  ;;  %3222 = vmatpush.bf16.msra.mxu2 %v5233_v6  ;;  %v5229_v15 = vor.u32 %v5455_v10, %v5226_v12  ;;  %v5170_v18 = vld [vmem:[%s5977_s23 + $0x48] sm:$0xf0]  ;;  %v5160_v20 = vld [vmem:[%s5977_s23] sm:$0xf] }
  0x51   : > { %3241 = vmatpush.bf16.msra.mxu3 %v5237_v7  ;;  %v5169_v16 = vor.u32 %v5448_v14, %v5168_v13  ;;  %3184 = vmatpush.bf16.msra.mxu0 %v5225_v11  ;;  %v5173_v19 = vor.u32 %v5440_v17, %v5170_v18  ;;  %v5447_v21 = vld [vmem:[%s5977_s23 + $0x3c] sm:$0xf0]  ;;  %v5439_v22 = vld [vmem:[%s5977_s23 + $0x4] sm:$0xf]  ;;  %vm3171_vm0 = vcmask 261120   ;;  %v6026_v28 = vld [vmem:[%s8789_s5 + $0x8] sm:$0xff] }
  0x52   : > { %v443_v23 = vld [vmem:[%s8787_s3] sm:$0xff]  ;;  %3203 = vmatpush.bf16.msra.mxu1 %v5229_v15  ;;  %v5161_v24 = vor.u32 %v5447_v21, %v5160_v20  ;;  %v5248_v29 = vld [vmem:[%s5977_s23 + $0x98] sm:$0xf]  ;;  %v5458_v31 = vld [vmem:[%s5977_s23 + $0x9c] sm:$0xf]  ;;  %s8628_s11 = scalar_lea.vmem [#allocation8], %s5098_s26 }
  0x53   : > { %v5162_v25 = vld [vmem:[%s5977_s23 + $0x40] sm:$0xf0]  ;;  %v5466_v30 = vld [vmem:[%s5977_s23 + $0xd4] sm:$0xf0]  ;;  %v5250_v33 = vld [vmem:[%s5977_s23 + $0xd8] sm:$0xf0] }
  0x54   : > { %v6013_v26 = vld [vmem:[%s8789_s5] sm:$0xff]  ;;  %v5165_v27 = vor.u32 %v5439_v22, %v5162_v25  ;;  %3223 = vmatpush.bf16.msra.mxu2 %v5169_v16  ;;  %v5249_v32 = vor.u32 %v5466_v30, %v5248_v29  ;;  %v5253_v34 = vor.u32 %v5458_v31, %v5250_v33  ;;  %v5184_v35 = vld [vmem:[%s5977_s23 + $0x18] sm:$0xf]  ;;  %v5442_v37 = vld [vmem:[%s5977_s23 + $0x1c] sm:$0xf]  ;;  %s5431_s26 = sshll.u32 %s5864_s12, 4 }
  0x55   : > { %3242 = vmatpush.bf16.msra.mxu3 %v5173_v19  ;;  %3185 = vmatpush.bf16.msra.mxu0 %v5161_v24  ;;  %v5450_v36 = vld [vmem:[%s5977_s23 + $0x54] sm:$0xf0]  ;;  %v5186_v39 = vld [vmem:[%s5977_s23 + $0x58] sm:$0xf0]  ;;  %v5240_v41 = vld [vmem:[%s5977_s23 + $0x90] sm:$0xf]  ;;  %s4981_s16 = scalar_lea.hbm %s8792_s8, %s5431_s26 }
  0x56   : > { %446 = vperm.xlu0 %5546, %v443_v23   ;;  %3204 = vmatpush.bf16.msra.mxu1 %v5165_v27  ;;  %v5185_v38 = vor.u32 %v5450_v36, %v5184_v35  ;;  %v5189_v40 = vor.u32 %v5442_v37, %v5186_v39  ;;  %v5465_v42 = vld [vmem:[%s5977_s23 + $0xcc] sm:$0xf0]  ;;  %v5457_v43 = vld [vmem:[%s5977_s23 + $0x94] sm:$0xf]  ;;  %v5264_v51 = vld [vmem:[%s5977_s23 + $0xa8] sm:$0xf] }
  0x57   : > { %5290 = vmatmul.msk.bf16.vlgmr.msra.gmra.mxu2 %vm3171_vm0, %v6013_v26  ;;  %v5241_v44 = vor.u32 %v5465_v42, %v5240_v41  ;;  %v5242_v45 = vld [vmem:[%s5977_s23 + $0xd0] sm:$0xf0]  ;;  %v5176_v46 = vld [vmem:[%s5977_s23 + $0x10] sm:$0xf]  ;;  %v5468_v53 = vld [vmem:[%s5977_s23 + $0xe4] sm:$0xf0] }
  0x58   : > { %5292 = vmatmul.msk.bf16.vlgmr.msra.gmra.mxu3 %vm3171_vm0, %v6013_v26  ;;  %5286 = vmatmul.msk.bf16.vlgmr.msra.gmra.mxu0 %vm3171_vm0, %v6013_v26  ;;  %v5449_v47 = vld [vmem:[%s5977_s23 + $0x4c] sm:$0xf0]  ;;  %v5245_v48 = vor.u32 %v5457_v43, %v5242_v45  ;;  %v5441_v49 = vld [vmem:[%s5977_s23 + $0x14] sm:$0xf]  ;;  %v5460_v54 = vld [vmem:[%s5977_s23 + $0xac] sm:$0xf]  ;;  %v5265_v57 = vor.u32 %v5468_v53, %v5264_v51 }
  0x59   : > { %5288 = vmatmul.msk.bf16.vlgmr.msra.gmra.mxu1 %vm3171_vm0, %v6013_v26  ;;  %3298 = vmatpush.bf16.msrb.mxu2 %v5249_v32  ;;  %v5178_v50 = vld [vmem:[%s5977_s23 + $0x50] sm:$0xf0]  ;;  %v5177_v52 = vor.u32 %v5449_v47, %v5176_v46  ;;  %v5266_v55 = vld [vmem:[%s5977_s23 + $0xe8] sm:$0xf0]  ;;  %v5256_v59 = vld [vmem:[%s5977_s23 + $0xa0] sm:$0xf] }
  0x5a   : > { %3317 = vmatpush.bf16.msrb.mxu3 %v5253_v34  ;;  %3260 = vmatpush.bf16.msrb.mxu0 %v5241_v44  ;;  %v5181_v56 = vor.u32 %v5441_v49, %v5178_v50  ;;  %v5269_v58 = vor.u32 %v5460_v54, %v5266_v55  ;;  %v5467_v60 = vld [vmem:[%s5977_s23 + $0xdc] sm:$0xf0]  ;;  %v5459_v61 = vld [vmem:[%s5977_s23 + $0xa4] sm:$0xf]  ;;  %v5200_v1 = vld [vmem:[%s5977_s23 + $0x28] sm:$0xf] }
  0x5b   : > { %3279 = vmatpush.bf16.msrb.mxu1 %v5245_v48  ;;  %v5257_v62 = vor.u32 %v5467_v60, %v5256_v59  ;;  %v5258_v63 = vld [vmem:[%s5977_s23 + $0xe0] sm:$0xf0]  ;;  %v5452_v2 = vld [vmem:[%s5977_s23 + $0x64] sm:$0xf0]  ;;  %v5444_v5 = vld [vmem:[%s5977_s23 + $0x2c] sm:$0xf] }
  0x5c   : > { %v5261_v3 = vor.u32 %v5459_v61, %v5258_v63  ;;  %v5201_v4 = vor.u32 %v5452_v2, %v5200_v1  ;;  %v5202_v6 = vld [vmem:[%s5977_s23 + $0x68] sm:$0xf0]  ;;  %v5192_v7 = vld [vmem:[%s5977_s23 + $0x20] sm:$0xf]  ;;  %v5443_v10 = vld [vmem:[%s5977_s23 + $0x24] sm:$0xf] }
  0x5d   : > { %3299 = vmatpush.bf16.msrb.mxu2 %v5185_v38  ;;  %v5205_v8 = vor.u32 %v5444_v5, %v5202_v6  ;;  %v5451_v9 = vld [vmem:[%s5977_s23 + $0x5c] sm:$0xf0]  ;;  %v5194_v11 = vld [vmem:[%s5977_s23 + $0x60] sm:$0xf0]  ;;  %v5280_v18 = vld [vmem:[%s5977_s23 + $0xb8] sm:$0xf] }
  0x5e   : > { %3318 = vmatpush.bf16.msrb.mxu3 %v5189_v40  ;;  %3261 = vmatpush.bf16.msrb.mxu0 %v5177_v52  ;;  %v5193_v12 = vor.u32 %v5451_v9, %v5192_v7  ;;  %v5197_v13 = vor.u32 %v5443_v10, %v5194_v11  ;;  %v6081_v14 = vld [vmem:[%s5969_s15] sm:$0xff]  ;;  %v5470_v19 = vld [vmem:[%s5977_s23 + $0xf4] sm:$0xf0]  ;;  %v5462_v20 = vld [vmem:[%s5977_s23 + $0xbc] sm:$0xf]  ;;  %s4983_s9 = sshll.u32 %s8628_s11, 4  ;;  %s4984_s9 = int_to_ptr.vmem [resolvable:$true] %s4983_s9 }
  0x5f   : > { %3280 = vmatpush.bf16.msrb.mxu1 %v5181_v56  ;;  %v395_v16 = vperm.slane %v6081_v14, 0  ;;  %v396_v17 = vperm.slane %v6081_v14, 1  ;;  %v5281_v21 = vor.u32 %v5470_v19, %v5280_v18  ;;  %v5282_v22 = vld [vmem:[%s5977_s23 + $0xf8] sm:$0xf0]  ;;  %v5272_v23 = vld [vmem:[%s5977_s23 + $0xb0] sm:$0xf] }
  0x60   : > { %v5469_v24 = vld [vmem:[%s5977_s23 + $0xec] sm:$0xf0]  ;;  %v5285_v25 = vor.u32 %v5462_v20, %v5282_v22  ;;  %v5461_v29 = vld [vmem:[%s5977_s23 + $0xb4] sm:$0xf]  ;;  %v5216_v31 = vld [vmem:[%s5977_s23 + $0x38] sm:$0xf] }
  0x61   : > { %3374 = vmatpush.bf16.msra.mxu2 %v5265_v57  ;;  %v5273_v27 = vor.u32 %v5469_v24, %v5272_v23  ;;  %v5274_v30 = vld [vmem:[%s5977_s23 + $0xf0] sm:$0xf0]  ;;  %v5454_v33 = vld [vmem:[%s5977_s23 + $0x74] sm:$0xf0]  ;;  %v5446_v34 = vld [vmem:[%s5977_s23 + $0x3c] sm:$0xf] }
  0x62   : > { %3393 = vmatpush.bf16.msra.mxu3 %v5269_v58  ;;  %3336 = vmatpush.bf16.msra.mxu0 %v5257_v62  ;;  %v5277_v32 = vor.u32 %v5461_v29, %v5274_v30  ;;  %v5218_v35 = vld [vmem:[%s5977_s23 + $0x78] sm:$0xf0]  ;;  %v5217_v36 = vor.u32 %v5454_v33, %v5216_v31  ;;  %v397_v37 = vperm.slane %v6081_v14, 2  ;;  %v5208_v44 = vld [vmem:[%s5977_s23 + $0x30] sm:$0xf]  ;;  %s4985_s20 = sshll.u32 %s4981_s16, 4  ;;  %s4986_s20 = int_to_ptr.hbm [resolvable:$true] %s4985_s20 }
  0x63   : > { %3355 = vmatpush.bf16.msra.mxu1 %v5261_v3  ;;  %v5221_v38 = vor.u32 %v5446_v34, %v5218_v35  ;;  %v5453_v45 = vld [vmem:[%s5977_s23 + $0x6c] sm:$0xf0]  ;;  %v5445_v46 = vld [vmem:[%s5977_s23 + $0x34] sm:$0xf]  ;;  %v5790_v18 = vmov 2475754826  }
  0x64   : > { %v5209_v48 = vor.u32 %v5453_v45, %v5208_v44  ;;  %v5210_v49 = vld [vmem:[%s5977_s23 + $0x70] sm:$0xf0]  ;;  %v5791_v22 = vmov 2131351028   ;;  %v8801_v30 = vmov 920167782  }
  0x65   : > { %3375 = vmatpush.bf16.msra.mxu2 %v5201_v4  ;;  %v5213_v52 = vor.u32 %v5445_v46, %v5210_v49  ;;  %v8800_v33 = vmov 1326507024   ;;  %s4971_s22 = scalar_lea.sflag [#allocation4], %s5963_s29  ;;  %s5721_s17 = sshra.s32 %s4986_s20, 4  ;;  %s5722_s17 = int_to_ptr.hbm [resolvable:$true] %s5721_s17 }
  0x66   : > { %3394 = vmatpush.bf16.msra.mxu3 %v5205_v8  ;;  %3337 = vmatpush.bf16.msra.mxu0 %v5193_v12  ;;  %s5723_s6 = scalar_lea.hbm %s5722_s17, 16  ;;  %s5727_s19 = scalar_lea.hbm %s8792_s8, 64 }
  0x67   : > { %5291 = vmatmul.msk.bf16.gmra.mxu2 %vm3171_vm0, %v6026_v28  ;;  %3356 = vmatpush.bf16.msra.mxu1 %v5197_v13  ;;  %p5724_p1 = scmp.ne.s32.totalorder %s5722_s17, %s5723_s6  ;;  %p5728_p5 = scmp.lt.s32.totalorder %s5722_s17, %s8792_s8 }
  0x68   : > { %5293 = vmatmul.msk.bf16.gmra.mxu3 %vm3171_vm0, %v6026_v28  ;;  %5287 = vmatmul.msk.bf16.gmra.mxu0 %vm3171_vm0, %v6026_v28  ;;  %p5729_p7 = scmp.lt.s32.totalorder %s5727_s19, %s5723_s6 }
  0x69   : > { %5289 = vmatmul.msk.bf16.gmra.mxu1 %vm3171_vm0, %v6026_v28  ;;  %p5725_p3 = pnand %p5724_p1, %p5905_p13 }
  0x6a   : > { %p5730_p6 = por %p5729_p7, %p5728_p5 }
  0x6b   : > { %p5726_p12 = pneg %p5725_p3 }
  0x6d   : > { %p5731_p8 = pnand %p5730_p6, %p5726_p12 }
  0x77   : > { %5298 = vmatmul.msk.bf16.vlgmr.msrb.gmra.mxu2 %vm3171_vm0, %v6013_v26 }
  0x78   : > { %5300 = vmatmul.msk.bf16.vlgmr.msrb.gmra.mxu3 %vm3171_vm0, %v6013_v26  ;;  %5294 = vmatmul.msk.bf16.vlgmr.msrb.gmra.mxu0 %vm3171_vm0, %v6013_v26 }
  0x79   : > { %5296 = vmatmul.msk.bf16.vlgmr.msrb.gmra.mxu1 %vm3171_vm0, %v6013_v26  ;;  %3450 = vmatpush.bf16.msrb.mxu2 %v5281_v21 }
  0x7a   : > { %3469 = vmatpush.bf16.msrb.mxu3 %v5285_v25  ;;  %3412 = vmatpush.bf16.msrb.mxu0 %v5273_v27  ;;  %v8803_v25 = vmov 2102212464  }
  0x7b   : > { %3431 = vmatpush.bf16.msrb.mxu1 %v5277_v32 }
  0x7d   : > { %3451 = vmatpush.bf16.msrb.mxu2 %v5217_v36 }
  0x7e   : > { %3470 = vmatpush.bf16.msrb.mxu3 %v5221_v38  ;;  %3413 = vmatpush.bf16.msrb.mxu0 %v5209_v48 }
  0x7f   : > { %3432 = vmatpush.bf16.msrb.mxu1 %v5213_v52 }
  0x87   : > { %5299 = vmatmul.msk.bf16.gmra.mxu2 %vm3171_vm0, %v6026_v28 }
  0x88   : > { %5301 = vmatmul.msk.bf16.gmra.mxu3 %vm3171_vm0, %v6026_v28  ;;  %5295 = vmatmul.msk.bf16.gmra.mxu0 %vm3171_vm0, %v6026_v28 }
  0x89   : > { %5297 = vmatmul.msk.bf16.gmra.mxu1 %vm3171_vm0, %v6026_v28 }
  0x97   : > { %5306 = vmatmul.msk.bf16.vlgmr.msra.gmra.mxu2 %vm3171_vm0, %v6013_v26 }
  0x98   : > { %5308 = vmatmul.msk.bf16.vlgmr.msra.gmra.mxu3 %vm3171_vm0, %v6013_v26  ;;  %5302 = vmatmul.msk.bf16.vlgmr.msra.gmra.mxu0 %vm3171_vm0, %v6013_v26 }
  0x99   : > { %5304 = vmatmul.msk.bf16.vlgmr.msra.gmra.mxu1 %vm3171_vm0, %v6013_v26 }
  0xa7   : > { %5307 = vmatmul.msk.bf16.gmra.mxu2 %vm3171_vm0, %v6026_v28 }
  0xa8   : > { %5309 = vmatmul.msk.bf16.gmra.mxu3 %vm3171_vm0, %v6026_v28  ;;  %5303 = vmatmul.msk.bf16.gmra.mxu0 %vm3171_vm0, %v6026_v28 }
  0xa9   : > { %5305 = vmatmul.msk.bf16.gmra.mxu1 %vm3171_vm0, %v6026_v28 }
  0xb7   : > { %5314 = vmatmul.msk.bf16.vlgmr.msrb.gmra.mxu2 %vm3171_vm0, %v6013_v26 }
  0xb8   : > { %5316 = vmatmul.msk.bf16.vlgmr.msrb.gmra.mxu3 %vm3171_vm0, %v6013_v26  ;;  %5310 = vmatmul.msk.bf16.vlgmr.msrb.gmra.mxu0 %vm3171_vm0, %v6013_v26 }
  0xb9   : > { %5312 = vmatmul.msk.bf16.vlgmr.msrb.gmra.mxu1 %vm3171_vm0, %v6013_v26 }
  0xc0   : > { %v6083_v15 = vpop.permute.xlu0 %390 }
  0xc1   : > { %v427_v39 = vmul.f32 %v395_v16, %v6083_v15  ;;  %v428_v40 = vmul.f32 %v396_v17, %v6083_v15  ;;  %v429_v47 = vmul.f32 %v397_v37, %v6083_v15  ;;  %v5789_v16 = vmov 683565275  }
  0xc7   : > { %5315 = vmatmul.msk.bf16.gmra.mxu2 %vm3171_vm0, %v6026_v28 }
  0xc8   : > { %v6106_v41 = vpop.permute.xlu0 %446  ;;  %5317 = vmatmul.msk.bf16.gmra.mxu3 %vm3171_vm0, %v6026_v28  ;;  %5311 = vmatmul.msk.bf16.gmra.mxu0 %vm3171_vm0, %v6026_v28 }
  0xc9   : > { %v6111_v42 = vadd.f32 %v6106_v41, %v427_v39  ;;  %v6114_v43 = vadd.f32 %v6106_v41, %v428_v40  ;;  %v6127_v54 = vadd.f32 %v6106_v41, %v429_v47  ;;  %5313 = vmatmul.msk.bf16.gmra.mxu1 %vm3171_vm0, %v6026_v28 }
  0xcb   : > { %v465_v50 = vand.u32 2147483647, %v6111_v42  ;;  %v468_v51 = vand.u32 2139095040, %v6111_v42  ;;  %v620_v53 = vand.u32 2147483647, %v6114_v43  ;;  %v623_v57 = vand.u32 2139095040, %v6114_v43 }
  0xcc   : > { %v778_v62 = vand.u32 2139095040, %v6127_v54  ;;  %v775_v8 = vand.u32 2147483647, %v6127_v54 }
  0xcd   : > { %v469_v55 = vshrl.u32 %v468_v51, 23  ;;  %v472_v56 = vand.u32 8388607, %v465_v50  ;;  %v627_v58 = vand.u32 8388607, %v620_v53  ;;  %v624_v61 = vshrl.u32 %v623_v57, 23 }
  0xce   : > { %v779_v5 = vshrl.u32 %v778_v62, 23 }
  0xcf   : > { %v5102_v59 = vadd.s32 4294967169, %v469_v55  ;;  %v473_v60 = vor.u32 8388608, %v472_v56  ;;  %v5105_v1 = vadd.s32 4294967169, %v624_v61  ;;  %v628_v2 = vor.u32 8388608, %v627_v58 }
  0xd0   : > { %v5108_v12 = vadd.s32 4294967169, %v779_v5 }
  0xd1   : > { %v475_v63 = vadd.s32 1, %v5102_v59  ;;  %v6139_v3 = vshll.u32 %v473_v60, 8  ;;  %v630_v4 = vadd.s32 1, %v5105_v1  ;;  %v6145_v11 = vshll.u32 %v628_v2, 8 }
  0xd2   : > { %v6172_v47 = vadd.s32 1, %v5108_v12 }
  0xd3   : > { %vm476_vm1 = vcmp.gt.s32.totalorder %v475_v63, 0  ;;  %vm631_vm2 = vcmp.gt.s32.totalorder %v630_v4, 0  ;;  %v6143_v10 = vand.u32 65535, %v6139_v3  ;;  %v515_v38 = vshrl.u32 %v6139_v3, 16 }
  0xd4   : > { %v477_v6 = vsel %vm476_vm1, %v475_v63, 0  ;;  %v632_v20 = vsel %vm631_vm2, %v630_v4, 0  ;;  %vm786_vm1 = vcmp.gt.s32.totalorder %v6172_v47, 0 }
  0xd5   : > { %v479_v7 = vand.u32 31, %v477_v6  ;;  %v6147_v13 = vshrl.u32 %v477_v6, 5  ;;  %v6165_v44 = vand.u32 31, %v632_v20  ;;  %v6188_v60 = vshrl.u32 %v632_v20, 5 }
  0xd7   : > { %v480_v9 = vsub.s32 32, %v479_v7  ;;  %v482_v17 = vshll.u32 %v5789_v16, %v479_v7  ;;  %v485_v19 = vshll.u32 %v5790_v18, %v479_v7  ;;  %v488_v24 = vshll.u32 %v5791_v22, %v479_v7 }
  0xd8   : > { %v491_v29 = vshll.u32 %v8803_v25, %v479_v7  ;;  %v494_v32 = vshll.u32 %v8801_v30, %v479_v7  ;;  %vm497_vm3 = vcmp.lt.s32.totalorder %v6147_v13, 1  ;;  %vm500_vm4 = vcmp.lt.s32.totalorder %v6147_v13, 4 }
  0xd9   : > { %v483_v21 = vshrl.u32 %v5790_v18, %v480_v9  ;;  %v486_v23 = vshrl.u32 %v5791_v22, %v480_v9  ;;  %v489_v27 = vshrl.u32 %v8803_v25, %v480_v9  ;;  %v492_v31 = vshrl.u32 %v8801_v30, %v480_v9 }
  0xda   : > { %v495_v34 = vshrl.u32 %v8800_v33, %v480_v9  ;;  %vm499_vm5 = vcmp.lt.s32.totalorder %v6147_v13, 3  ;;  %v6176_v51 = vsub.s32 32, %v6165_v44  ;;  %vm498_vm6 = vcmp.lt.s32.totalorder %v6147_v13, 2 }
  0xdb   : > { %v484_v35 = vor.u32 %v483_v21, %v482_v17  ;;  %v487_v36 = vor.u32 %v486_v23, %v485_v19  ;;  %v490_v37 = vor.u32 %v489_v27, %v488_v24  ;;  %v493_v39 = vor.u32 %v492_v31, %v491_v29 }
  0xdc   : > { %v496_v40 = vor.u32 %v495_v34, %v494_v32  ;;  %v481_v57 = vshrl.u32 %v5789_v16, %v480_v9  ;;  %v637_v5 = vshll.u32 %v5789_v16, %v6165_v44  ;;  %v638_v6 = vshrl.u32 %v5790_v18, %v6176_v51 }
  0xdd   : > { %v505_v45 = vsel %vm497_vm3, %v484_v35, %v487_v36  ;;  %v509_v46 = vsel %vm497_vm3, %v487_v36, %v490_v37  ;;  %v506_v48 = vsel %vm500_vm4, %v493_v39, 920167782  ;;  %v502_v52 = vsel %vm500_vm4, %v490_v37, 2102212464 }
  0xde   : > { %v510_v49 = vsel %vm500_vm4, %v496_v40, 1326507024  ;;  %v507_v55 = vsel %vm499_vm5, %v490_v37, %v506_v48  ;;  %v501_v2 = vsel %vm497_vm3, %v481_v57, %v484_v35  ;;  %v503_v4 = vsel %vm499_vm5, %v487_v36, %v502_v52 }
  0xdf   : > { %v511_v56 = vsel %vm499_vm5, %v493_v39, %v510_v49  ;;  %v508_v58 = vsel %vm498_vm6, %v505_v45, %v507_v55  ;;  %v640_v12 = vshll.u32 %v5790_v18, %v6165_v44  ;;  %v641_v17 = vshrl.u32 %v5791_v22, %v6176_v51 }
  0xe0   : > { %v512_v59 = vsel %vm498_vm6, %v509_v46, %v511_v56  ;;  %v538_v63 = vand.u32 65535, %v508_v58  ;;  %v539_v1 = vshrl.u32 %v508_v58, 16  ;;  %v643_v23 = vshll.u32 %v5791_v22, %v6165_v44 }
  0xe1   : > { %v516_v61 = vand.u32 65535, %v512_v59  ;;  %v517_v62 = vshrl.u32 %v512_v59, 16  ;;  %v644_v48 = vshrl.u32 %v8803_v25, %v6176_v51  ;;  %v6218_v49 = vor.u32 %v638_v6, %v637_v5 }
  0xe2   : > { %v541_v20 = vmul.u32 %v539_v1, %v6143_v10  ;;  %v542_v21 = vmul.u32 %v538_v63, %v515_v38  ;;  %v540_v29 = vmul.u32 %v538_v63, %v6143_v10  ;;  %v543_v31 = vmul.u32 %v539_v1, %v515_v38 }
  0xe3   : > { %v519_v7 = vmul.u32 %v517_v62, %v6143_v10  ;;  %v520_v9 = vmul.u32 %v516_v61, %v515_v38  ;;  %v518_v19 = vmul.u32 %v516_v61, %v6143_v10  ;;  %v521_v24 = vmul.u32 %v517_v62, %v515_v38 }
  0xe4   : > { %v544_v36 = vshll.u32 %v541_v20, 16  ;;  %v545_v39 = vshrl.u32 %v541_v20, 16  ;;  %v546_v40 = vshll.u32 %v542_v21, 16  ;;  %v6223_v56 = vor.u32 %v641_v17, %v640_v12 }
  0xe5   : > { %v522_v27 = vshll.u32 %v519_v7, 16  ;;  %v523_v32 = vshrl.u32 %v519_v7, 16  ;;  %v524_v34 = vshll.u32 %v520_v9, 16  ;;  %v525_v35 = vshrl.u32 %v520_v9, 16 }
  0xe6   : > { %vm548_vm8 = vc.u32 %v540_v29, %v544_v36  ;;  %v550_v46 = vadd.s32 %v544_v36, %v540_v29  ;;  %v646_v59 = vshll.u32 %v8803_v25, %v6165_v44  ;;  %v647_v61 = vshrl.u32 %v8801_v30, %v6176_v51 }
  0xe7   : > { %vm526_vm7 = vc.u32 %v518_v19, %v522_v27  ;;  %v528_v37 = vadd.s32 %v522_v27, %v518_v19  ;;  %v549_v38 = vsel %vm548_vm8, 1, %v5788_v0  ;;  %v645_v63 = vor.u32 %v644_v48, %v643_v23 }
  0xe8   : > { %v527_v45 = vsel %vm526_vm7, 1, %v5788_v0  ;;  %v551_v55 = vadd.s32 %v549_v38, %v543_v31  ;;  %vm552_vm10 = vc.u32 %v550_v46, %v546_v40  ;;  %v649_v1 = vshll.u32 %v8801_v30, %v6165_v44 }
  0xe9   : > { %v529_v10 = vadd.s32 %v527_v45, %v521_v24  ;;  %vm530_vm9 = vc.u32 %v528_v37, %v524_v34  ;;  %v553_v58 = vsel %vm552_vm10, 1, %v5788_v0  ;;  %v650_v5 = vshrl.u32 %v8800_v33, %v6176_v51 }
  0xea   : > { %v531_v52 = vsel %vm530_vm9, 1, %v5788_v0  ;;  %v555_v62 = vadd.s32 %v553_v58, %v551_v55  ;;  %v547_v7 = vshrl.u32 %v542_v21, 16  ;;  %v6234_v9 = vadd.s32 %v550_v46, %v546_v40 }
  0xeb   : > { %v533_v57 = vadd.s32 %v531_v52, %v529_v10  ;;  %v648_v12 = vor.u32 %v647_v61, %v646_v59  ;;  %v651_v19 = vor.u32 %v650_v5, %v649_v1  ;;  %vm652_vm11 = vcmp.lt.s32.totalorder %v6188_v60, 1 }
  0xec   : > { %v556_v17 = vadd.s32 %v555_v62, %v545_v39  ;;  %vm655_vm12 = vcmp.lt.s32.totalorder %v6188_v60, 4  ;;  %vm654_vm13 = vcmp.lt.s32.totalorder %v6188_v60, 3  ;;  %v660_v44 = vsel %vm652_vm11, %v6218_v49, %v6223_v56 }
  0xed   : > { %v534_v6 = vadd.s32 %v533_v57, %v523_v32  ;;  %v661_v21 = vsel %vm655_vm12, %v648_v12, 920167782  ;;  %v504_v23 = vsel %vm498_vm6, %v501_v2, %v503_v4  ;;  %vm653_vm14 = vcmp.lt.s32.totalorder %v6188_v60, 2 }
  0xee   : > { %v557_v24 = vadd.s32 %v556_v17, %v547_v7  ;;  %v662_v27 = vsel %vm654_vm13, %v645_v63, %v661_v21  ;;  %v664_v13 = vsel %vm652_vm11, %v6223_v56, %v645_v63  ;;  %v669_v2 = vand.u32 65535, %v6145_v11 }
  0xef   : > { %v6238_v20 = vadd.s32 %v534_v6, %v525_v35  ;;  %v663_v29 = vsel %vm653_vm14, %v660_v44, %v662_v27  ;;  %v665_v31 = vsel %vm655_vm12, %v651_v19, 1326507024  ;;  %v558_v35 = vmul.u32 %v6139_v3, %v504_v23 }
  0xf0   : > { %v561_v4 = vadd.s32 1, %v557_v24  ;;  %v693_v32 = vand.u32 65535, %v663_v29  ;;  %v694_v34 = vshrl.u32 %v663_v29, 16  ;;  %v666_v36 = vsel %vm654_vm13, %v648_v12, %v665_v31 }
  0xf1   : > { %vm560_vm15 = vc.u32 %v6238_v20, %v6234_v9  ;;  %v670_v37 = vshrl.u32 %v6145_v11, 16  ;;  %v667_v40 = vsel %vm653_vm14, %v664_v13, %v666_v36  ;;  %v6275_v3 = vand.u32 8388607, %v775_v8 }
  0xf2   : > { %v562_v39 = vsel %vm560_vm15, %v561_v4, %v557_v24  ;;  %v696_v45 = vmul.u32 %v694_v34, %v669_v2  ;;  %v671_v46 = vand.u32 65535, %v667_v40  ;;  %v672_v48 = vshrl.u32 %v667_v40, 16 }
  0xf3   : > { %v563_v26 = vadd.s32 %v562_v39, %v558_v35  ;;  %v695_v10 = vmul.u32 %v693_v32, %v669_v2  ;;  %v697_v38 = vmul.u32 %v693_v32, %v670_v37  ;;  %v787_v59 = vsel %vm786_vm1, %v6172_v47, 0 }
  0xf4   : > { %v699_v52 = vshll.u32 %v696_v45, 16  ;;  %v674_v57 = vmul.u32 %v672_v48, %v669_v2  ;;  %v675_v58 = vmul.u32 %v671_v46, %v670_v37  ;;  %v636_v61 = vshrl.u32 %v5789_v16, %v6176_v51 }
  0xf5   : > { %v564_v55 = vadd.s32 536870912, %v563_v26  ;;  %v657_v62 = vsel %vm655_vm12, %v645_v63, 2102212464  ;;  %v698_v1 = vmul.u32 %v694_v34, %v670_v37  ;;  %v673_v6 = vmul.u32 %v671_v46, %v669_v2 }
  0xf6   : > { %vm703_vm2 = vc.u32 %v695_v10, %v699_v52  ;;  %v676_v7 = vmul.u32 %v672_v48, %v670_v37  ;;  %v677_v12 = vshll.u32 %v674_v57, 16  ;;  %v701_v47 = vshll.u32 %v697_v38, 16 }
  0xf7   : > { %v6284_v5 = vshrl.u32 %v564_v55, 30  ;;  %v704_v17 = vsel %vm703_vm2, 1, %v5788_v0  ;;  %v705_v51 = vadd.s32 %v699_v52, %v695_v10  ;;  %v789_v19 = vand.u32 31, %v787_v59 }
  0xf8   : > { %v679_v44 = vshll.u32 %v675_v58, 16  ;;  %vm681_vm3 = vc.u32 %v673_v6, %v677_v12  ;;  %v683_v21 = vadd.s32 %v677_v12, %v673_v6  ;;  %v656_v23 = vsel %vm652_vm11, %v636_v61, %v6218_v49 }
  0xf9   : > { %v566_v63 = vshll.u32 %v6284_v5, 30  ;;  %v682_v24 = vsel %vm681_vm3, 1, %v5788_v0  ;;  %v706_v27 = vadd.s32 %v704_v17, %v698_v1  ;;  %vm707_vm4 = vc.u32 %v705_v51, %v701_v47 }
  0xfa   : > { %v658_v13 = vsel %vm654_vm13, %v6223_v56, %v657_v62  ;;  %v684_v2 = vadd.s32 %v682_v24, %v676_v7  ;;  %vm685_vm5 = vc.u32 %v683_v21, %v679_v44  ;;  %v708_v31 = vsel %vm707_vm4, 1, %v5788_v0 }
  0xfb   : > { %v6294_v29 = vsub.s32 %v563_v26, %v566_v63  ;;  %v686_v4 = vsel %vm685_vm5, 1, %v5788_v0  ;;  %v6301_v32 = vsub.s32 32, %v789_v19  ;;  %v678_v34 = vshrl.u32 %v674_v57, 16 }
  0xfc   : > { %v688_v35 = vadd.s32 %v686_v4, %v684_v2  ;;  %v659_v36 = vsel %vm653_vm14, %v656_v23, %v658_v13  ;;  %v700_v37 = vshrl.u32 %v696_v45, 16  ;;  %v710_v39 = vadd.s32 %v708_v31, %v706_v27 }
  0xfd   : > { %vm568_vm6 = vcmp.lt.s32.totalorder %v6294_v29, 0  ;;  %v569_v49 = vsub.s32 0, %v6294_v29  ;;  %v783_v56 = vor.u32 8388608, %v6275_v3  ;;  %vm467_vm7 = vcmp.lt.s32.totalorder %v6111_v42, 0 }
  0xfe   : > { %v559_v40 = vadd.s32 %v6234_v9, %v6238_v20  ;;  %v680_v46 = vshrl.u32 %v675_v58, 16  ;;  %v689_v48 = vadd.s32 %v688_v35, %v678_v34  ;;  %v702_v45 = vshrl.u32 %v697_v38, 16 }
  0xff   : > { %v570_v26 = vsel %vm568_vm6, %v569_v49, %v6294_v29  ;;  %v711_v10 = vadd.s32 %v710_v39, %v700_v37  ;;  %v793_v52 = vshrl.u32 %v5790_v18, %v6301_v32  ;;  %v6320_v55 = vadd.s32 %v705_v51, %v701_v47 }
 0x100   : > { %v571_v60 = vclz %v570_v26  ;;  %v6318_v3 = vadd.s32 %v689_v48, %v680_v46  ;;  %v713_v57 = vmul.u32 %v6145_v11, %v659_v36  ;;  %v6323_v9 = vshrl.u32 %v787_v59, 5 }
 0x101   : > { %v712_v58 = vadd.s32 %v711_v10, %v702_v45  ;;  %v792_v61 = vshll.u32 %v5789_v16, %v789_v19  ;;  %v796_v28 = vshrl.u32 %v5791_v22, %v6301_v32  ;;  %v589_v38 = vsub.s32 4, %v6284_v5 }
 0x102   : > { %v5103_v20 = vadd.s32 4294967294, %v571_v60  ;;  %vm715_vm8 = vc.u32 %v6318_v3, %v6320_v55  ;;  %v795_v62 = vshll.u32 %v5790_v18, %v789_v19  ;;  %v799_v1 = vshrl.u32 %v8803_v25, %v6301_v32 }
 0x103   : > { %v716_v11 = vadd.s32 1, %v712_v58  ;;  %v6334_v59 = vor.u32 %v793_v52, %v792_v61  ;;  %v802_v6 = vshrl.u32 %v8801_v30, %v6301_v32  ;;  %v798_v12 = vshll.u32 %v5791_v22, %v789_v19 }
 0x104   : > { %vm5104_vm9 = vcmp.lt.s32.totalorder %v5103_v20, 0  ;;  %v801_v47 = vshll.u32 %v8803_v25, %v789_v19  ;;  %v805_v17 = vshrl.u32 %v8800_v33, %v6301_v32  ;;  %v6342_v21 = vor.u32 %v796_v28, %v795_v62 }
 0x105   : > { %v574_v7 = vsel %vm5104_vm9, 0, %v5103_v20  ;;  %v717_v44 = vsel %vm715_vm8, %v716_v11, %v712_v58  ;;  %v800_v24 = vor.u32 %v799_v1, %v798_v12  ;;  %v804_v13 = vshll.u32 %v8801_v30, %v789_v19 }
 0x106   : > { %v575_v51 = vsub.s32 32, %v574_v7  ;;  %v579_v63 = vsub.s32 4294967266, %v574_v7  ;;  %v718_v23 = vadd.s32 %v717_v44, %v713_v57  ;;  %v803_v27 = vor.u32 %v802_v6, %v801_v47 }
 0x107   : > { %v576_v2 = vshll.u32 %v6294_v29, %v574_v7  ;;  %v590_v49 = vsel %vm467_vm7, %v589_v38, %v6284_v5  ;;  %v806_v35 = vor.u32 %v805_v17, %v804_v13  ;;  %vm807_vm10 = vcmp.lt.s32.totalorder %v6323_v9, 1 }
 0x108   : > { %v577_v4 = vshrl.u32 %v559_v40, %v575_v51  ;;  %v580_v31 = vadd.s32 127, %v579_v63  ;;  %v719_v34 = vadd.s32 536870912, %v718_v23  ;;  %vm810_vm11 = vcmp.lt.s32.totalorder %v6323_v9, 4 }
 0x109   : > { %vm809_vm12 = vcmp.lt.s32.totalorder %v6323_v9, 3  ;;  %v816_v19 = vsel %vm810_vm11, %v803_v27, 920167782  ;;  %vm6356_vm13 = vcmp.le.f32.partialorder %v465_v50, 0.7853982  ;;  %v815_v39 = vsel %vm807_vm10, %v6334_v59, %v6342_v21 }
 0x10a   : > { %v578_v36 = vor.u32 %v577_v4, %v576_v2  ;;  %v581_v37 = vshll.u32 %v580_v31, 23  ;;  %v6360_v5 = vshrl.u32 %v719_v34, 30  ;;  %v817_v40 = vsel %vm809_vm12, %v800_v24, %v816_v19 }
 0x10b   : > { %v592_v46 = vsel %vm6356_vm13, 0, %v590_v49  ;;  %v819_v50 = vsel %vm807_vm10, %v6342_v21, %v800_v24  ;;  %v6373_v48 = vshll.u32 %v783_v56, 8  ;;  %vm808_vm14 = vcmp.lt.s32.totalorder %v6323_v9, 2 }
 0x10c   : > { %v582_v26 = vor.u32 4788187, %v581_v37  ;;  %v721_v60 = vshll.u32 %v6360_v5, 30  ;;  %v820_v45 = vsel %vm810_vm11, %v806_v35, 1326507024  ;;  %v585_v52 = vcvt.s32.f32 %v578_v36 }
 0x10d   : > { %v6381_v57 = vsel %vm808_vm14, %v815_v39, %v817_v40  ;;  %v821_v20 = vsel %vm809_vm12, %v803_v27, %v820_v45  ;;  %v609_v58 = vadd.s32 3, %v592_v46  ;;  %v824_v38 = vand.u32 65535, %v6373_v48 }
 0x10e   : > { %v583_v10 = vand.u32 2147483647, %v582_v26  ;;  %v6385_v61 = vsub.s32 %v718_v23, %v721_v60  ;;  %v822_v56 = vsel %vm808_vm14, %v819_v50, %v821_v20  ;;  %v825_v6 = vshrl.u32 %v6373_v48, 16 }
 0x10f   : > { %v826_v62 = vand.u32 65535, %v822_v56  ;;  %v827_v1 = vshrl.u32 %v822_v56, 16  ;;  %v849_v7 = vshrl.u32 %v6381_v57, 16  ;;  %v791_v47 = vshrl.u32 %v5789_v16, %v6301_v32 }
 0x110   : > { %v586_v28 = vmul.f32 %v585_v52, %v583_v10  ;;  %vm723_vm15 = vcmp.lt.s32.totalorder %v6385_v61, 0  ;;  %v724_v11 = vsub.s32 0, %v6385_v61  ;;  %v6396_v51 = vand.u32 3, %v609_v58 }
 0x111   : > { %v829_v17 = vmul.u32 %v827_v1, %v824_v38  ;;  %v6399_v44 = vmul.u32 %v826_v62, %v825_v6  ;;  %v848_v23 = vand.u32 65535, %v6381_v57  ;;  %v714_v13 = vadd.s32 %v6320_v55, %v6318_v3 }
 0x112   : > { %v587_v12 = vxor.u32 2147483648, %v586_v28  ;;  %v725_v63 = vsel %vm723_vm15, %v724_v11, %v6385_v61  ;;  %v811_v31 = vsel %vm807_vm10, %v791_v47, %v6334_v59  ;;  %v828_v49 = vmul.u32 %v826_v62, %v824_v38 }
 0x113   : > { %v726_v2 = vclz %v725_v63  ;;  %v832_v4 = vshll.u32 %v829_v17, 16  ;;  %v6414_v34 = vmul.u32 %v849_v7, %v824_v38  ;;  %v812_v3 = vsel %vm810_vm11, %v800_v24, 2102212464 }
 0x114   : > { %v588_v27 = vsel %vm467_vm7, %v587_v12, %v586_v28  ;;  %v831_v55 = vmul.u32 %v827_v1, %v825_v6  ;;  %v834_v37 = vshll.u32 %v6399_v44, 16  ;;  %v6421_v29 = vmul.u32 %v848_v23, %v825_v6 }
 0x115   : > { %v6409_v32 = vsel %vm6356_vm13, %v6111_v42, %v588_v27  ;;  %v5106_v36 = vadd.s32 4294967294, %v726_v2  ;;  %vm836_vm1 = vc.u32 %v828_v49, %v832_v4  ;;  %v838_v19 = vadd.s32 %v832_v4, %v828_v49 }
 0x116   : > { %v593_v35 = vmul.f32 %v6409_v32, %v6409_v32  ;;  %v837_v59 = vsel %vm836_vm1, 1, %v5788_v0  ;;  %v854_v50 = vshll.u32 %v6414_v34, 16  ;;  %v813_v10 = vsel %vm809_vm12, %v6342_v21, %v812_v3 }
 0x117   : > { %vm5107_vm2 = vcmp.lt.s32.totalorder %v5106_v36, 0  ;;  %v839_v46 = vadd.s32 %v837_v59, %v831_v55  ;;  %vm840_vm3 = vc.u32 %v838_v19, %v834_v37  ;;  %vm622_vm4 = vcmp.lt.s32.totalorder %v6114_v43, 0 }
 0x118   : > { %v594_v39 = vmul.f32 -0.001358992, %v593_v35  ;;  %v601_v40 = vmul.f32 -0.00019511016, %v593_v35  ;;  %v729_v26 = vsel %vm5107_vm2, 0, %v5106_v36  ;;  %v841_v20 = vsel %vm840_vm3, 1, %v5788_v0 }
 0x119   : > { %v730_v24 = vsub.s32 32, %v729_v26  ;;  %v731_v52 = vshll.u32 %v6385_v61, %v729_v26  ;;  %v734_v57 = vsub.s32 4294967266, %v729_v26  ;;  %v850_v58 = vmul.u32 %v848_v23, %v824_v38 }
 0x11a   : > { %v595_v60 = vadd.f32 0.041655596, %v594_v39  ;;  %v602_v45 = vadd.f32 0.008332121, %v601_v40  ;;  %v843_v1 = vadd.s32 %v841_v20, %v839_v46  ;;  %v856_v12 = vshll.u32 %v6421_v29, 16 }
 0x11b   : > { %v732_v62 = vshrl.u32 %v714_v13, %v730_v24  ;;  %v735_v11 = vadd.s32 127, %v734_v57  ;;  %vm858_vm5 = vc.u32 %v850_v58, %v854_v50  ;;  %v860_v47 = vadd.s32 %v854_v50, %v850_v58 }
 0x11c   : > { %v596_v56 = vmul.f32 %v595_v60, %v593_v35  ;;  %v603_v28 = vmul.f32 %v602_v45, %v593_v35  ;;  %vm6434_vm6 = vcmp.le.f32.partialorder %v620_v53, 0.7853982  ;;  %v833_v61 = vshrl.u32 %v829_v17, 16 }
 0x11d   : > { %v853_v2 = vmul.u32 %v849_v7, %v825_v6  ;;  %vm612_vm7 = vcmp.eq.s32.totalorder %v6396_v51, 0  ;;  %v733_v38 = vor.u32 %v732_v62, %v731_v52  ;;  %v736_v23 = vshll.u32 %v735_v11, 23 }
 0x11e   : > { %v597_v63 = vadd.f32 -0.4999988, %v596_v56  ;;  %v604_v27 = vadd.f32 -0.16666654, %v603_v28  ;;  %v859_v13 = vsel %vm858_vm5, 1, %v5788_v0  ;;  %vm862_vm8 = vc.u32 %v860_v47, %v856_v12 }
 0x11f   : > { %vm611_vm9 = vcmp.lt.s32.totalorder %v6396_v51, 2  ;;  %v744_v36 = vsub.s32 4, %v6360_v5  ;;  %v844_v3 = vadd.s32 %v843_v1, %v833_v61  ;;  %vm608_vm10 = vweird.f32 %v6111_v42 }
 0x120   : > { %v598_v4 = vmul.f32 %v597_v63, %v593_v35  ;;  %v605_v49 = vmul.f32 %v604_v27, %v593_v35  ;;  %v737_v53 = vor.u32 4788187, %v736_v23  ;;  %v814_v6 = vsel %vm808_vm14, %v811_v31, %v813_v10 }
 0x121   : > { %v861_v7 = vadd.s32 %v859_v13, %v853_v2  ;;  %v863_v17 = vsel %vm862_vm8, 1, %v5788_v0  ;;  %v835_v19 = vshrl.u32 %v6399_v44, 16  ;;  %v855_v35 = vshrl.u32 %v6414_v34, 16 }
 0x122   : > { %v599_v55 = vadd.f32 1.0, %v598_v4  ;;  %v606_v37 = vadd.f32 1.0, %v605_v49  ;;  %v738_v39 = vand.u32 2147483647, %v737_v53  ;;  %v740_v40 = vcvt.s32.f32 %v733_v38 }
 0x123   : > { %v865_v59 = vadd.s32 %v863_v17, %v861_v7  ;;  %v398_v26 = vperm.slane %v6081_v14, 3  ;;  %v745_v9 = vsel %vm622_vm4, %v744_v36, %v6360_v5  ;;  %v6453_v31 = vadd.s32 %v844_v3, %v835_v19 }
 0x124   : > { %v607_v46 = vmul.f32 %v606_v37, %v6409_v32  ;;  %v616_v50 = vxor.u32 2147483648, %v599_v55  ;;  %v741_v60 = vmul.f32 %v740_v40, %v738_v39  ;;  %v857_v45 = vshrl.u32 %v6421_v29, 16 }
 0x125   : > { %v866_v44 = vadd.s32 %v865_v59, %v855_v35  ;;  %v430_v34 = vmul.f32 %v398_v26, %v6083_v15  ;;  %vm615_vm11 = vcmp.eq.s32.totalorder %v6396_v51, 2  ;;  %vm8805_vm12 = vcmask 1043456  }
 0x126   : > { %v613_v24 = vxor.u32 2147483648, %v607_v46  ;;  %v6458_v10 = vadd.s32 %v860_v47, %v856_v12  ;;  %v742_v32 = vxor.u32 2147483648, %v741_v60  ;;  %v747_v52 = vsel %vm6434_vm6, 0, %v745_v9 }
 0x127   : > { %v867_v57 = vadd.s32 %v866_v44, %v857_v45  ;;  %v6463_v5 = vadd.f32 %v6106_v41, %v430_v34  ;;  %v617_v20 = vsel %vm615_vm11, %v616_v50, %v607_v46  ;;  %v868_v58 = vmul.u32 %v6373_v48, %v814_v6 }
 0x128   : > { %v614_v29 = vsel %vm612_vm7, %v599_v55, %v613_v24  ;;  %vm870_vm13 = vc.u32 %v6453_v31, %v6458_v10  ;;  %v743_v28 = vsel %vm622_vm4, %v742_v32, %v741_v60  ;;  %v399_v47 = vperm.slane %v6081_v14, 4 }
 0x129   : > { %v618_v56 = vsel %vm611_vm9, %v614_v29, %v617_v20  ;;  %v871_v62 = vadd.s32 1, %v867_v57  ;;  %v930_v1 = vand.u32 2147483647, %v6463_v5  ;;  %v746_v12 = vsel %vm6434_vm6, %v6114_v43, %v743_v28 }
 0x12a   : > { %v619_v11 = vsel %vm608_vm10, nan, %v618_v56  ;;  %v933_v48 = vand.u32 2139095040, %v6463_v5  ;;  %v748_v51 = vmul.f32 %v746_v12, %v746_v12  ;;  %v764_v61 = vadd.s32 3, %v747_v52 }
 0x12b   : > { %v2949_v63 = vpack.c.bf16 %v619_v11, %v619_v11  ;;  %v872_v27 = vsel %vm870_vm13, %v871_v62, %v867_v57  ;;  %v937_v23 = vand.u32 8388607, %v930_v1  ;;  %v431_v36 = vmul.f32 %v399_v47, %v6083_v15 }
 0x12c   : > { %v873_v2 = vadd.s32 %v872_v27, %v868_v58  ;;  %v934_v38 = vshrl.u32 %v933_v48, 23  ;;  %v749_v13 = vmul.f32 -0.001358992, %v748_v51  ;;  %v756_v4 = vmul.f32 -0.00019511016, %v748_v51 }
 0x12d   : > { %v3501_v42 = vsel %vm8805_vm12, %v2949_v63, 0  ;;  %v765_v53 = vand.u32 3, %v764_v61  ;;  %v6487_v17 = vadd.f32 %v6106_v41, %v431_v36  ;;  %v938_v19 = vor.u32 8388608, %v937_v23 }
 0x12e   : > { %3555 = vmatpush.bf16.msra.mxu0 %v3501_v42  ;;  %v874_v21 = vadd.s32 536870912, %v873_v2  ;;  %v5111_v49 = vadd.s32 4294967169, %v934_v38  ;;  %v750_v3 = vadd.f32 0.041655596, %v749_v13  ;;  %v757_v14 = vadd.f32 0.008332121, %v756_v4 }
 0x12f   : > { %vm777_vm15 = vcmp.lt.s32.totalorder %v6127_v54, 0  ;;  %vm767_vm1 = vcmp.eq.s32.totalorder %v765_v53, 0  ;;  %v1088_v50 = vand.u32 2139095040, %v6487_v17  ;;  %vm766_vm2 = vcmp.lt.s32.totalorder %v765_v53, 2 }
 0x130   : > { %v875_v6 = vshrl.u32 %v874_v21, 30  ;;  %v940_v7 = vadd.s32 1, %v5111_v49  ;;  %v751_v55 = vmul.f32 %v750_v3, %v748_v51  ;;  %v758_v37 = vmul.f32 %v757_v14, %v748_v51 }
 0x131   : > { %v6493_v45 = vshll.u32 %v938_v19, 8  ;;  %v1085_v44 = vand.u32 2147483647, %v6487_v17  ;;  %vm763_vm3 = vweird.f32 %v6114_v43  ;;  %vm770_vm5 = vcmp.eq.s32.totalorder %v765_v53, 2 }
 0x132   : > { %v876_v35 = vshll.u32 %v875_v6, 30  ;;  %vm941_vm14 = vcmp.gt.s32.totalorder %v940_v7, 0  ;;  %v752_v39 = vadd.f32 -0.4999988, %v751_v55  ;;  %v759_v40 = vadd.f32 -0.16666654, %v758_v37 }
 0x133   : > { %v942_v59 = vsel %vm941_vm14, %v940_v7, 0  ;;  %v899_v24 = vsub.s32 4, %v875_v6  ;;  %v869_v29 = vadd.s32 %v6458_v10, %v6453_v31  ;;  %v6504_v28 = vshrl.u32 %v1088_v50, 23 }
 0x134   : > { %v6490_v26 = vsub.s32 %v873_v2, %v876_v35  ;;  %v944_v46 = vand.u32 31, %v942_v59  ;;  %v753_v9 = vmul.f32 %v752_v39, %v748_v51  ;;  %v760_v60 = vmul.f32 %v759_v40, %v748_v51 }
 0x135   : > { %vm6508_vm6 = vcmp.le.f32.partialorder %v775_v8, 0.7853982  ;;  %v900_v31 = vsel %vm777_vm15, %v899_v24, %v875_v6  ;;  %v6517_v51 = vand.u32 65535, %v6493_v45  ;;  %v6523_v61 = vshrl.u32 %v942_v59, 5 }
 0x136   : > { %vm878_vm4 = vcmp.lt.s32.totalorder %v6490_v26, 0  ;;  %v879_v34 = vsub.s32 0, %v6490_v26  ;;  %v945_v32 = vsub.s32 32, %v944_v46  ;;  %v754_v52 = vadd.f32 1.0, %v753_v9 }
 0x137   : > { %v761_v57 = vadd.f32 1.0, %v760_v60  ;;  %v947_v58 = vshll.u32 %v5789_v16, %v944_v46  ;;  %v950_v10 = vshll.u32 %v5790_v18, %v944_v46  ;;  %v956_v21 = vshll.u32 %v8803_v25, %v944_v46 }
 0x138   : > { %v880_v20 = vsel %vm878_vm4, %v879_v34, %v6490_v26  ;;  %v948_v56 = vshrl.u32 %v5790_v18, %v945_v32  ;;  %v771_v11 = vxor.u32 2147483648, %v754_v52  ;;  %v951_v63 = vshrl.u32 %v5791_v22, %v945_v32 }
 0x139   : > { %v762_v62 = vmul.f32 %v761_v57, %v746_v12  ;;  %v881_v47 = vclz %v880_v20  ;;  %v6521_v12 = vand.u32 8388607, %v1085_v44  ;;  %v954_v42 = vshrl.u32 %v8803_v25, %v945_v32 }
 0x13a   : > { %v949_v2 = vor.u32 %v948_v56, %v947_v58  ;;  %v952_v23 = vor.u32 %v951_v63, %v950_v10  ;;  %v957_v13 = vshrl.u32 %v8801_v30, %v945_v32  ;;  %v960_v49 = vshrl.u32 %v8800_v33, %v945_v32 }
 0x13b   : > { %v768_v27 = vxor.u32 2147483648, %v762_v62  ;;  %v5109_v8 = vadd.s32 4294967294, %v881_v47  ;;  %v772_v38 = vsel %vm770_vm5, %v771_v11, %v762_v62  ;;  %v953_v14 = vshll.u32 %v5791_v22, %v944_v46 }
 0x13c   : > { %v959_v6 = vshll.u32 %v8801_v30, %v944_v46  ;;  %v958_v19 = vor.u32 %v957_v13, %v956_v21  ;;  %v980_v59 = vshrl.u32 %v6493_v45, 16  ;;  %vm962_vm8 = vcmp.lt.s32.totalorder %v6523_v61, 1 }
 0x13d   : > { %v769_v4 = vsel %vm767_vm1, %v754_v52, %v768_v27  ;;  %vm5110_vm7 = vcmp.lt.s32.totalorder %v5109_v8, 0  ;;  %v955_v39 = vor.u32 %v954_v42, %v953_v14  ;;  %v902_v43 = vsel %vm6508_vm6, 0, %v900_v31 }
 0x13e   : > { %v773_v36 = vsel %vm766_vm2, %v769_v4, %v772_v38  ;;  %v884_v3 = vsel %vm5110_vm7, 0, %v5109_v8  ;;  %v961_v40 = vor.u32 %v960_v49, %v959_v6  ;;  %vm965_vm9 = vcmp.lt.s32.totalorder %v6523_v61, 4 }
 0x13f   : > { %v774_v7 = vsel %vm763_vm3, nan, %v773_v36  ;;  %v885_v55 = vsub.s32 32, %v884_v3  ;;  %v889_v37 = vsub.s32 4294967266, %v884_v3  ;;  %v886_v50 = vshll.u32 %v6490_v26, %v884_v3 }
 0x140   : > { %v2950_v35 = vpack.c.bf16 %v774_v7, %v774_v7  ;;  %v970_v46 = vsel %vm962_vm8, %v949_v2, %v952_v23  ;;  %vm964_vm10 = vcmp.lt.s32.totalorder %v6523_v61, 3  ;;  %v971_v26 = vsel %vm965_vm9, %v958_v19, 920167782 }
 0x141   : > { %v887_v53 = vshrl.u32 %v869_v29, %v885_v55  ;;  %v890_v9 = vadd.s32 127, %v889_v37  ;;  %vm963_vm11 = vcmp.lt.s32.totalorder %v6523_v61, 2  ;;  %v972_v52 = vsel %vm964_vm10, %v955_v39, %v971_v26 }
 0x142   : > { %v3504_v60 = vsel %vm8805_vm12, %v2950_v35, 0  ;;  %v974_v57 = vsel %vm962_vm8, %v952_v23, %v955_v39  ;;  %v975_v29 = vsel %vm965_vm9, %v961_v40, 1326507024  ;;  %v946_v58 = vshrl.u32 %v5789_v16, %v945_v32 }
 0x143   : > { %3574 = vmatpush.bf16.msra.mxu1 %v3504_v60  ;;  %v888_v34 = vor.u32 %v887_v53, %v886_v50  ;;  %v891_v24 = vshll.u32 %v890_v9, 23  ;;  %v973_v56 = vsel %vm963_vm11, %v970_v46, %v972_v52  ;;  %v976_v62 = vsel %vm964_vm10, %v958_v19, %v975_v29 }
 0x144   : > { %v967_v11 = vsel %vm965_vm9, %v955_v39, 2102212464  ;;  %v977_v47 = vsel %vm963_vm11, %v974_v57, %v976_v62  ;;  %v1003_v63 = vand.u32 65535, %v973_v56  ;;  %v1004_v31 = vshrl.u32 %v973_v56, 16 }
 0x145   : > { %v892_v20 = vor.u32 4788187, %v891_v24  ;;  %v895_v27 = vcvt.s32.f32 %v888_v34  ;;  %v981_v8 = vand.u32 65535, %v977_v47  ;;  %v982_v38 = vshrl.u32 %v977_v47, 16 }
 0x146   : > { %v919_v42 = vadd.s32 3, %v902_v43  ;;  %v1006_v13 = vmul.u32 %v1004_v31, %v6517_v51  ;;  %v1007_v32 = vmul.u32 %v1003_v63, %v980_v59  ;;  %v5114_v4 = vadd.s32 4294967169, %v6504_v28 }
 0x147   : > { %v893_v10 = vand.u32 2147483647, %v892_v20  ;;  %v966_v49 = vsel %vm962_vm8, %v946_v58, %v949_v2  ;;  %v984_v36 = vmul.u32 %v982_v38, %v6517_v51  ;;  %v985_v3 = vmul.u32 %v981_v8, %v980_v59 }
 0x148   : > { %v968_v14 = vsel %vm964_vm10, %v952_v23, %v967_v11  ;;  %v1005_v6 = vmul.u32 %v1003_v63, %v6517_v51  ;;  %v1008_v7 = vmul.u32 %v1004_v31, %v980_v59  ;;  %v1009_v55 = vshll.u32 %v1006_v13, 16 }
 0x149   : > { %v896_v21 = vmul.f32 %v895_v27, %v893_v10  ;;  %v983_v19 = vmul.u32 %v981_v8, %v6517_v51  ;;  %v986_v35 = vmul.u32 %v982_v38, %v980_v59  ;;  %v987_v39 = vshll.u32 %v984_v36, 16 }
 0x14a   : > { %v989_v28 = vshll.u32 %v985_v3, 16  ;;  %v1011_v40 = vshll.u32 %v1007_v32, 16  ;;  %vm1013_vm13 = vc.u32 %v1005_v6, %v1009_v55  ;;  %v1015_v50 = vadd.s32 %v1009_v55, %v1005_v6 }
 0x14b   : > { %v897_v37 = vxor.u32 2147483648, %v896_v21  ;;  %vm991_vm14 = vc.u32 %v983_v19, %v987_v39  ;;  %v993_v53 = vadd.s32 %v987_v39, %v983_v19  ;;  %v1014_v23 = vsel %vm1013_vm13, 1, %v5788_v0 }
 0x14c   : > { %v992_v60 = vsel %vm991_vm14, 1, %v5788_v0  ;;  %v1016_v51 = vadd.s32 %v1014_v23, %v1008_v7  ;;  %vm1017_vm1 = vc.u32 %v1015_v50, %v1011_v40  ;;  %v1010_v24 = vshrl.u32 %v1006_v13, 16 }
 0x14d   : > { %v898_v2 = vsel %vm777_vm15, %v897_v37, %v896_v21  ;;  %v994_v43 = vadd.s32 %v992_v60, %v986_v35  ;;  %vm995_vm2 = vc.u32 %v993_v53, %v989_v28  ;;  %v1018_v46 = vsel %vm1017_vm1, 1, %v5788_v0 }
 0x14e   : > { %v901_v9 = vsel %vm6508_vm6, %v6127_v54, %v898_v2  ;;  %v996_v34 = vsel %vm995_vm2, 1, %v5788_v0  ;;  %v1020_v26 = vadd.s32 %v1018_v46, %v1016_v51  ;;  %v1095_v52 = vadd.s32 1, %v5114_v4 }
 0x14f   : > { %v903_v59 = vmul.f32 %v901_v9, %v901_v9  ;;  %v988_v20 = vshrl.u32 %v984_v36, 16  ;;  %v998_v58 = vadd.s32 %v996_v34, %v994_v43  ;;  %v990_v48 = vshrl.u32 %v985_v3, 16 }
 0x150   : > { %v1012_v56 = vshrl.u32 %v1007_v32, 16  ;;  %v1021_v62 = vadd.s32 %v1020_v26, %v1010_v24  ;;  %vm1096_vm15 = vcmp.gt.s32.totalorder %v1095_v52, 0  ;;  %v920_v10 = vand.u32 3, %v919_v42 }
 0x151   : > { %v904_v57 = vmul.f32 -0.001358992, %v903_v59  ;;  %v911_v29 = vmul.f32 -0.00019511016, %v903_v59  ;;  %v999_v63 = vadd.s32 %v998_v58, %v988_v20  ;;  %v1097_v31 = vsel %vm1096_vm15, %v1095_v52, 0 }
 0x152   : > { %v969_v27 = vsel %vm963_vm11, %v966_v49, %v968_v14  ;;  %v1022_v8 = vadd.s32 %v1021_v62, %v1012_v56  ;;  %v1099_v38 = vand.u32 31, %v1097_v31  ;;  %v6580_v36 = vadd.s32 %v1015_v50, %v1011_v40 }
 0x153   : > { %v905_v11 = vadd.f32 0.041655596, %v904_v57  ;;  %v912_v47 = vadd.f32 0.008332121, %v911_v29  ;;  %v6578_v21 = vadd.s32 %v999_v63, %v990_v48  ;;  %v1023_v55 = vmul.u32 %v6493_v45, %v969_v27  ;;  %v6625_v27 = vld [vmem:[%s5969_s15] sm:$0xff] }
 0x154   : > { %v1026_v3 = vadd.s32 1, %v1022_v8  ;;  %v6582_v32 = vsub.s32 32, %v1099_v38  ;;  %v1093_v42 = vor.u32 8388608, %v6521_v12  ;;  %vm921_vm4 = vcmp.lt.s32.totalorder %v920_v10, 2 }
 0x155   : > { %v906_v13 = vmul.f32 %v905_v11, %v903_v59  ;;  %v913_v4 = vmul.f32 %v912_v47, %v903_v59  ;;  %vm1025_vm3 = vc.u32 %v6578_v21, %v6580_v36  ;;  %v6592_v39 = vshrl.u32 %v1097_v31, 5 }
 0x156   : > { %v1027_v61 = vsel %vm1025_vm3, %v1026_v3, %v1022_v8  ;;  %v1103_v49 = vshrl.u32 %v5790_v18, %v6582_v32  ;;  %v1106_v14 = vshrl.u32 %v5791_v22, %v6582_v32  ;;  %v1102_v45 = vshll.u32 %v5789_v16, %v1099_v38 }
 0x157   : > { %v907_v6 = vadd.f32 -0.4999988, %v906_v13  ;;  %v914_v7 = vadd.f32 -0.16666654, %v913_v4  ;;  %v1028_v35 = vadd.s32 %v1027_v61, %v1023_v55  ;;  %v1105_v28 = vshll.u32 %v5790_v18, %v1099_v38 }
 0x158   : > { %v1109_v40 = vshrl.u32 %v8803_v25, %v6582_v32  ;;  %v1111_v12 = vshll.u32 %v8803_v25, %v1099_v38  ;;  %v1112_v23 = vshrl.u32 %v8801_v30, %v6582_v32  ;;  %v1104_v60 = vor.u32 %v1103_v49, %v1102_v45 }
 0x159   : > { %v908_v37 = vmul.f32 %v907_v6, %v903_v59  ;;  %v915_v19 = vmul.f32 %v914_v7, %v903_v59  ;;  %v1029_v53 = vadd.s32 536870912, %v1028_v35  ;;  %v6601_v51 = vor.u32 %v1106_v14, %v1105_v28 }
 0x15a   : > { %v1108_v59 = vshll.u32 %v5791_v22, %v1099_v38  ;;  %v1115_v43 = vshrl.u32 %v8800_v33, %v6582_v32  ;;  %v1113_v26 = vor.u32 %v1112_v23, %v1111_v12  ;;  %vm922_vm5 = vcmp.eq.s32.totalorder %v920_v10, 0 }
 0x15b   : > { %v909_v50 = vadd.f32 1.0, %v908_v37  ;;  %v916_v2 = vadd.f32 1.0, %v915_v19  ;;  %v6606_v24 = vshrl.u32 %v1029_v53, 30  ;;  %vm925_vm6 = vcmp.eq.s32.totalorder %v920_v10, 2 }
 0x15c   : > { %v1110_v52 = vor.u32 %v1109_v40, %v1108_v59  ;;  %v1114_v57 = vshll.u32 %v8801_v30, %v1099_v38  ;;  %vm1120_vm7 = vcmp.lt.s32.totalorder %v6592_v39, 4  ;;  %v6611_v58 = vshll.u32 %v1093_v42, 8 }
 0x15d   : > { %v917_v46 = vmul.f32 %v916_v2, %v901_v9  ;;  %v926_v34 = vxor.u32 2147483648, %v909_v50  ;;  %v1031_v20 = vshll.u32 %v6606_v24, 30  ;;  %vm1117_vm8 = vcmp.lt.s32.totalorder %v6592_v39, 1 }
 0x15e   : > { %v1116_v48 = vor.u32 %v1115_v43, %v1114_v57  ;;  %vm1119_vm9 = vcmp.lt.s32.totalorder %v6592_v39, 3  ;;  %v1126_v9 = vsel %vm1120_vm7, %v1113_v26, 920167782  ;;  %v1125_v47 = vsel %vm1117_vm8, %v1104_v60, %v6601_v51 }
 0x15f   : > { %v923_v29 = vxor.u32 2147483648, %v917_v46  ;;  %v927_v62 = vsel %vm925_vm6, %v926_v34, %v917_v46  ;;  %v1032_v11 = vsub.s32 %v1028_v35, %v1031_v20  ;;  %vm918_vm10 = vweird.f32 %v6127_v54 }
 0x160   : > { %v1127_v31 = vsel %vm1119_vm9, %v1110_v52, %v1126_v9  ;;  %v400_v8 = vperm.slane %v6625_v27, 5  ;;  %vm1118_vm13 = vcmp.lt.s32.totalorder %v6592_v39, 2  ;;  %v1129_v54 = vsel %vm1117_vm8, %v6601_v51, %v1110_v52 }
 0x161   : > { %v924_v56 = vsel %vm922_vm5, %v909_v50, %v923_v29  ;;  %vm1033_vm11 = vcmp.lt.s32.totalorder %v1032_v11, 0  ;;  %v1034_v13 = vsub.s32 0, %v1032_v11  ;;  %v1128_v3 = vsel %vm1118_vm13, %v1125_v47, %v1127_v31 }
 0x162   : > { %v928_v63 = vsel %vm921_vm4, %v924_v56, %v927_v62  ;;  %v1130_v10 = vsel %vm1120_vm7, %v1116_v48, 1326507024  ;;  %v1134_v55 = vand.u32 65535, %v6611_v58  ;;  %v1159_v14 = vshrl.u32 %v1128_v3, 16 }
 0x163   : > { %v929_v38 = vsel %vm918_vm10, nan, %v928_v63  ;;  %v1035_v6 = vsel %vm1033_vm11, %v1034_v13, %v1032_v11  ;;  %v1131_v7 = vsel %vm1119_vm9, %v1113_v26, %v1130_v10  ;;  %v1101_v37 = vshrl.u32 %v5789_v16, %v6582_v32 }
 0x164   : > { %v2951_v4 = vpack.c.bf16 %v929_v38, %v929_v38  ;;  %v1036_v42 = vclz %v1035_v6  ;;  %v1132_v49 = vsel %vm1118_vm13, %v1129_v54, %v1131_v7  ;;  %v1135_v19 = vshrl.u32 %v6611_v58, 16 }
 0x165   : > { %v1136_v35 = vand.u32 65535, %v1132_v49  ;;  %v1158_v45 = vand.u32 65535, %v1128_v3  ;;  %v1137_v40 = vshrl.u32 %v1132_v49, 16  ;;  %v1161_v12 = vmul.u32 %v1159_v14, %v1134_v55 }
 0x166   : > { %v3507_v61 = vsel %vm8805_vm12, %v2951_v4, 0  ;;  %v5112_v28 = vadd.s32 4294967294, %v1036_v42  ;;  %v432_v50 = vmul.f32 %v400_v8, %v6083_v15  ;;  %v1024_v2 = vadd.s32 %v6580_v36, %v6578_v21 }
 0x167   : > { %3593 = vmatpush.bf16.msra.mxu2 %v3507_v61  ;;  %v1054_v53 = vsub.s32 4, %v6606_v24  ;;  %v1121_v23 = vsel %vm1117_vm8, %v1101_v37, %v1104_v60  ;;  %v1140_v59 = vmul.u32 %v1136_v35, %v1135_v19  ;;  %v1122_v32 = vsel %vm1120_vm7, %v1110_v52, 2102212464 }
 0x168   : > { %vm5113_vm14 = vcmp.lt.s32.totalorder %v5112_v28, 0  ;;  %v1139_v43 = vmul.u32 %v1137_v40, %v1134_v55  ;;  %v1164_v46 = vshll.u32 %v1161_v12, 16  ;;  %v1138_v26 = vmul.u32 %v1136_v35, %v1134_v55 }
 0x169   : > { %v1039_v34 = vsel %vm5113_vm14, 0, %v5112_v28  ;;  %v1160_v57 = vmul.u32 %v1158_v45, %v1134_v55  ;;  %v1162_v29 = vmul.u32 %v1158_v45, %v1135_v19  ;;  %v1163_v21 = vmul.u32 %v1159_v14, %v1135_v19 }
 0x16a   : > { %v1040_v20 = vsub.s32 32, %v1039_v34  ;;  %v1044_v48 = vsub.s32 4294967266, %v1039_v34  ;;  %v1142_v9 = vshll.u32 %v1139_v43, 16  ;;  %vm932_vm1 = vcmp.lt.s32.totalorder %v6463_v5, 0 }
 0x16b   : > { %v1041_v36 = vshll.u32 %v1032_v11, %v1039_v34  ;;  %v1141_v56 = vmul.u32 %v1137_v40, %v1135_v19  ;;  %v1144_v60 = vshll.u32 %v1140_v59, 16  ;;  %vm1168_vm2 = vc.u32 %v1160_v57, %v1164_v46 }
 0x16c   : > { %v1042_v62 = vshrl.u32 %v1024_v2, %v1040_v20  ;;  %v1045_v47 = vadd.s32 127, %v1044_v48  ;;  %vm1146_vm15 = vc.u32 %v1138_v26, %v1142_v9  ;;  %v1148_v52 = vadd.s32 %v1142_v9, %v1138_v26 }
 0x16d   : > { %v1147_v63 = vsel %vm1146_vm15, 1, %v5788_v0  ;;  %v1166_v31 = vshll.u32 %v1162_v29, 16  ;;  %v1169_v8 = vsel %vm1168_vm2, 1, %v5788_v0  ;;  %v1170_v38 = vadd.s32 %v1164_v46, %v1160_v57 }
 0x16e   : > { %v1043_v13 = vor.u32 %v1042_v62, %v1041_v36  ;;  %v1046_v4 = vshll.u32 %v1045_v47, 23  ;;  %v1149_v3 = vadd.s32 %v1147_v63, %v1141_v56  ;;  %vm1150_vm3 = vc.u32 %v1148_v52, %v1144_v60 }
 0x16f   : > { %v1123_v11 = vsel %vm1119_vm9, %v6601_v51, %v1122_v32  ;;  %v1151_v54 = vsel %vm1150_vm3, 1, %v5788_v0  ;;  %v1171_v10 = vadd.s32 %v1169_v8, %v1163_v21  ;;  %vm1172_vm4 = vc.u32 %v1170_v38, %v1166_v31 }
 0x170   : > { %v1047_v6 = vor.u32 4788187, %v1046_v4  ;;  %v1143_v7 = vshrl.u32 %v1139_v43, 16  ;;  %v1153_v55 = vadd.s32 %v1151_v54, %v1149_v3  ;;  %v1173_v61 = vsel %vm1172_vm4, 1, %v5788_v0 }
 0x171   : > { %v1145_v42 = vshrl.u32 %v1140_v59, 16  ;;  %v1165_v49 = vshrl.u32 %v1161_v12, 16  ;;  %v1175_v14 = vadd.s32 %v1173_v61, %v1171_v10  ;;  %v6662_v37 = vadd.f32 %v6106_v41, %v432_v50 }
 0x172   : > { %v1048_v19 = vand.u32 2147483647, %v1047_v6  ;;  %v1050_v35 = vcvt.s32.f32 %v1043_v13  ;;  %v1154_v45 = vadd.s32 %v1153_v55, %v1143_v7  ;;  %v401_v51 = vperm.slane %v6625_v27, 6 }
 0x173   : > { %v1167_v28 = vshrl.u32 %v1162_v29, 16  ;;  %v1176_v40 = vadd.s32 %v1175_v14, %v1165_v49  ;;  %v1240_v2 = vand.u32 2147483647, %v6662_v37  ;;  %v1243_v32 = vand.u32 2139095040, %v6662_v37 }
 0x174   : > { %v1051_v43 = vmul.f32 %v1050_v35, %v1048_v19  ;;  %v1055_v12 = vsel %vm932_vm1, %v1054_v53, %v6606_v24  ;;  %v1155_v59 = vadd.s32 %v1154_v45, %v1145_v42  ;;  %v1174_v46 = vadd.s32 %v1170_v38, %v1166_v31 }
 0x175   : > { %v1124_v50 = vsel %vm1118_vm13, %v1121_v23, %v1123_v11  ;;  %v1177_v34 = vadd.s32 %v1176_v40, %v1167_v28  ;;  %v1244_v26 = vshrl.u32 %v1243_v32, 23  ;;  %v1247_v57 = vand.u32 8388607, %v1240_v2 }
 0x176   : > { %vm931_vm5 = vcmp.le.f32.partialorder %v930_v1, 0.7853982  ;;  %v1052_v29 = vxor.u32 2147483648, %v1051_v43  ;;  %vm1180_vm6 = vc.u32 %v1155_v59, %v1174_v46  ;;  %v433_v20 = vmul.f32 %v401_v51, %v6083_v15 }
 0x177   : > { %v1057_v48 = vsel %vm931_vm5, 0, %v1055_v12  ;;  %v1181_v9 = vadd.s32 1, %v1177_v34  ;;  %v5117_v24 = vadd.s32 4294967169, %v1244_v26  ;;  %v1178_v39 = vmul.u32 %v6611_v58, %v1124_v50 }
 0x178   : > { %v1053_v53 = vsel %vm932_vm1, %v1052_v29, %v1051_v43  ;;  %v6681_v23 = vadd.f32 %v6106_v41, %v433_v20  ;;  %v1248_v56 = vor.u32 8388608, %v1247_v57  ;;  %v1074_v62 = vadd.s32 3, %v1057_v48 }
 0x179   : > { %v1056_v21 = vsel %vm931_vm5, %v6463_v5, %v1053_v53  ;;  %v1182_v36 = vsel %vm1180_vm6, %v1181_v9, %v1177_v34  ;;  %v1250_v1 = vadd.s32 1, %v5117_v24  ;;  %vm1087_vm8 = vcmp.lt.s32.totalorder %v6487_v17, 0 }
 0x17a   : > { %v1058_v60 = vmul.f32 %v1056_v21, %v1056_v21  ;;  %v1183_v47 = vadd.s32 %v1182_v36, %v1178_v39  ;;  %v6684_v13 = vshll.u32 %v1248_v56, 8  ;;  %v1398_v58 = vand.u32 2139095040, %v6681_v23 }
 0x17b   : > { %vm1251_vm7 = vcmp.gt.s32.totalorder %v1250_v1, 0  ;;  %v6687_v11 = vand.u32 3, %v1074_v62  ;;  %v6692_v55 = vadd.s32 %v1174_v46, %v1155_v59  ;;  %v1395_v14 = vand.u32 2147483647, %v6681_v23 }
 0x17c   : > { %v1059_v52 = vmul.f32 -0.001358992, %v1058_v60  ;;  %v1066_v63 = vmul.f32 -0.00019511016, %v1058_v60  ;;  %v1184_v31 = vadd.s32 536870912, %v1183_v47  ;;  %v1252_v8 = vsel %vm1251_vm7, %v1250_v1, 0 }
 0x17d   : > { %v1254_v38 = vand.u32 31, %v1252_v8  ;;  %v6695_v42 = vand.u32 65535, %v6684_v13  ;;  %v6698_v49 = vshrl.u32 %v6684_v13, 16  ;;  %v1399_v19 = vshrl.u32 %v1398_v58, 23 }
 0x17e   : > { %v1060_v4 = vadd.f32 0.041655596, %v1059_v52  ;;  %v1067_v3 = vadd.f32 0.008332121, %v1066_v63  ;;  %v1185_v54 = vshrl.u32 %v1184_v31, 30  ;;  %vm1080_vm9 = vcmp.eq.s32.totalorder %v6687_v11, 2 }
 0x17f   : > { %v6689_v10 = vsub.s32 32, %v1254_v38  ;;  %v6704_v28 = vshrl.u32 %v1252_v8, 5  ;;  %vm1077_vm10 = vcmp.eq.s32.totalorder %v6687_v11, 0  ;;  %v1257_v40 = vshll.u32 %v5789_v16, %v1254_v38 }
 0x180   : > { %v1061_v6 = vmul.f32 %v1060_v4, %v1058_v60  ;;  %v1068_v7 = vmul.f32 %v1067_v3, %v1058_v60  ;;  %v1186_v61 = vshll.u32 %v1185_v54, 30  ;;  %v1260_v43 = vshll.u32 %v5790_v18, %v1254_v38 }
 0x181   : > { %v1258_v32 = vshrl.u32 %v5790_v18, %v6689_v10  ;;  %v1261_v12 = vshrl.u32 %v5791_v22, %v6689_v10  ;;  %vm1076_vm11 = vcmp.lt.s32.totalorder %v6687_v11, 2  ;;  %vm1073_vm14 = vweird.f32 %v6463_v5 }
 0x182   : > { %v1062_v35 = vadd.f32 -0.4999988, %v1061_v6  ;;  %v1069_v45 = vadd.f32 -0.16666654, %v1068_v7  ;;  %v6702_v51 = vsub.s32 %v1183_v47, %v1186_v61  ;;  %v1209_v34 = vsub.s32 4, %v1185_v54 }
 0x183   : > { %v1264_v26 = vshrl.u32 %v8803_v25, %v6689_v10  ;;  %v1266_v57 = vshll.u32 %v8803_v25, %v1254_v38  ;;  %v1267_v29 = vshrl.u32 %v8801_v30, %v6689_v10  ;;  %v1270_v24 = vshrl.u32 %v8800_v33, %v6689_v10 }
 0x184   : > { %v1063_v59 = vmul.f32 %v1062_v35, %v1058_v60  ;;  %v1070_v46 = vmul.f32 %v1069_v45, %v1058_v60  ;;  %vm1188_vm13 = vcmp.lt.s32.totalorder %v6702_v51, 0  ;;  %v1189_v50 = vsub.s32 0, %v6702_v51 }
 0x185   : > { %v1259_v39 = vor.u32 %v1258_v32, %v1257_v40  ;;  %v1262_v36 = vor.u32 %v1261_v12, %v1260_v43  ;;  %v1263_v56 = vshll.u32 %v5791_v22, %v1254_v38  ;;  %v1268_v62 = vor.u32 %v1267_v29, %v1266_v57 }
 0x186   : > { %v1064_v20 = vadd.f32 1.0, %v1063_v59  ;;  %v1071_v48 = vadd.f32 1.0, %v1070_v46  ;;  %v1190_v9 = vsel %vm1188_vm13, %v1189_v50, %v6702_v51  ;;  %v1269_v47 = vshll.u32 %v8801_v30, %v1254_v38 }
 0x187   : > { %v1191_v53 = vclz %v1190_v9  ;;  %v6729_v63 = vsel %vm1087_vm8, %v1209_v34, %v1185_v54  ;;  %v6731_v31 = vadd.s32 4294967169, %v1399_v19  ;;  %v6735_v8 = vand.u32 8388607, %v1395_v14 }
 0x188   : > { %v1072_v1 = vmul.f32 %v1071_v48, %v1056_v21  ;;  %v1081_v60 = vxor.u32 2147483648, %v1064_v20  ;;  %vm6739_vm1 = vcmp.le.f32.partialorder %v1085_v44, 0.7853982  ;;  %v1265_v4 = vor.u32 %v1264_v26, %v1263_v56 }
 0x189   : > { %v5115_v52 = vadd.s32 4294967294, %v1191_v53  ;;  %v1271_v38 = vor.u32 %v1270_v24, %v1269_v47  ;;  %vm1272_vm2 = vcmp.lt.s32.totalorder %v6704_v28, 1  ;;  %vm1273_vm3 = vcmp.lt.s32.totalorder %v6704_v28, 2 }
 0x18a   : > { %v1078_v58 = vxor.u32 2147483648, %v1072_v1  ;;  %v1082_v3 = vsel %vm1080_vm9, %v1081_v60, %v1072_v1  ;;  %vm1275_vm4 = vcmp.lt.s32.totalorder %v6704_v28, 4  ;;  %v1280_v44 = vsel %vm1272_vm2, %v1259_v39, %v1262_v36 }
 0x18b   : > { %vm5116_vm15 = vcmp.lt.s32.totalorder %v5115_v52, 0  ;;  %v1281_v7 = vsel %vm1275_vm4, %v1268_v62, 920167782  ;;  %vm1274_vm5 = vcmp.lt.s32.totalorder %v6704_v28, 3  ;;  %v1284_v43 = vsel %vm1272_vm2, %v1262_v36, %v1265_v4 }
 0x18c   : > { %v1079_v54 = vsel %vm1077_vm10, %v1064_v20, %v1078_v58  ;;  %v1194_v6 = vsel %vm5116_vm15, 0, %v5115_v52  ;;  %v1282_v32 = vsel %vm1274_vm5, %v1265_v4, %v1281_v7  ;;  %v1277_v50 = vsel %vm1275_vm4, %v1265_v4, 2102212464 }
 0x18d   : > { %v1083_v61 = vsel %vm1076_vm11, %v1079_v54, %v1082_v3  ;;  %v1195_v19 = vsub.s32 32, %v1194_v6  ;;  %v1199_v35 = vsub.s32 4294967266, %v1194_v6  ;;  %v1196_v40 = vshll.u32 %v6702_v51, %v1194_v6 }
 0x18e   : > { %v1084_v45 = vsel %vm1073_vm14, nan, %v1083_v61  ;;  %v1283_v46 = vsel %vm1273_vm3, %v1280_v44, %v1282_v32  ;;  %v1285_v5 = vsel %vm1275_vm4, %v1271_v38, 1326507024  ;;  %v1212_v56 = vsel %vm6739_vm1, 0, %v6729_v63 }
 0x18f   : > { %v2952_v12 = vpack.c.bf16 %v1084_v45, %v1084_v45  ;;  %v1197_v59 = vshrl.u32 %v6692_v55, %v1195_v19  ;;  %v1200_v11 = vadd.s32 127, %v1199_v35  ;;  %v1313_v51 = vand.u32 65535, %v1283_v46 }
 0x190   : > { %v1314_v34 = vshrl.u32 %v1283_v46, 16  ;;  %v1286_v20 = vsel %vm1274_vm5, %v1268_v62, %v1285_v5  ;;  %v1256_v55 = vshrl.u32 %v5789_v16, %v6689_v10  ;;  %v1278_v10 = vsel %vm1274_vm5, %v1262_v36, %v1277_v50 }
 0x191   : > { %v3510_v26 = vsel %vm8805_vm12, %v2952_v12, 0  ;;  %v1198_v57 = vor.u32 %v1197_v59, %v1196_v40  ;;  %v1201_v29 = vshll.u32 %v1200_v11, 23  ;;  %v1287_v48 = vsel %vm1273_vm3, %v1284_v43, %v1286_v20 }
 0x192   : > { %3612 = vmatpush.bf16.msra.mxu3 %v3510_v26  ;;  %v1316_v9 = vmul.u32 %v1314_v34, %v6695_v42  ;;  %v1317_v24 = vmul.u32 %v1313_v51, %v6698_v49  ;;  %v1291_v1 = vand.u32 65535, %v1287_v48  ;;  %v1292_v60 = vshrl.u32 %v1287_v48, 16 }
 0x193   : > { %v1202_v53 = vor.u32 4788187, %v1201_v29  ;;  %v1276_v62 = vsel %vm1272_vm2, %v1256_v55, %v1259_v39  ;;  %v1315_v47 = vmul.u32 %v1313_v51, %v6695_v42  ;;  %v1205_v4 = vcvt.s32.f32 %v1198_v57 }
 0x194   : > { %v1319_v52 = vshll.u32 %v1316_v9, 16  ;;  %v1294_v38 = vmul.u32 %v1292_v60, %v6695_v42  ;;  %v1295_v3 = vmul.u32 %v1291_v1, %v6698_v49  ;;  %v1318_v54 = vmul.u32 %v1314_v34, %v6698_v49 }
 0x195   : > { %v1203_v58 = vand.u32 2147483647, %v1202_v53  ;;  %v1321_v63 = vshll.u32 %v1317_v24, 16  ;;  %v1293_v39 = vmul.u32 %v1291_v1, %v6695_v42  ;;  %v1320_v61 = vshrl.u32 %v1316_v9, 16 }
 0x196   : > { %vm1323_vm6 = vc.u32 %v1315_v47, %v1319_v52  ;;  %v1325_v6 = vadd.s32 %v1319_v52, %v1315_v47  ;;  %v1297_v7 = vshll.u32 %v1294_v38, 16  ;;  %v1296_v36 = vmul.u32 %v1292_v60, %v6698_v49 }
 0x197   : > { %v1206_v44 = vmul.f32 %v1205_v4, %v1203_v58  ;;  %v1299_v19 = vshll.u32 %v1295_v3, 16  ;;  %v1324_v35 = vsel %vm1323_vm6, 1, %v5788_v0  ;;  %v1322_v12 = vshrl.u32 %v1317_v24, 16 }
 0x198   : > { %vm1327_vm7 = vc.u32 %v1325_v6, %v1321_v63  ;;  %vm1301_vm9 = vc.u32 %v1293_v39, %v1297_v7  ;;  %v1303_v40 = vadd.s32 %v1297_v7, %v1293_v39  ;;  %v1326_v32 = vadd.s32 %v1324_v35, %v1318_v54 }
 0x199   : > { %v1207_v45 = vxor.u32 2147483648, %v1206_v44  ;;  %v1302_v43 = vsel %vm1301_vm9, 1, %v5788_v0  ;;  %v1328_v59 = vsel %vm1327_vm7, 1, %v5788_v0  ;;  %v1405_v11 = vadd.s32 1, %v6731_v31 }
 0x19a   : > { %v1304_v46 = vadd.s32 %v1302_v43, %v1296_v36  ;;  %vm1305_vm10 = vc.u32 %v1303_v40, %v1299_v19  ;;  %v1330_v49 = vadd.s32 %v1328_v59, %v1326_v32  ;;  %v1298_v5 = vshrl.u32 %v1294_v38, 16 }
 0x19b   : > { %v1208_v42 = vsel %vm1087_vm8, %v1207_v45, %v1206_v44  ;;  %v1306_v51 = vsel %vm1305_vm10, 1, %v5788_v0  ;;  %vm1406_vm11 = vcmp.gt.s32.totalorder %v1405_v11, 0  ;;  %v1279_v31 = vsel %vm1273_vm3, %v1276_v62, %v1278_v10 }
 0x19c   : > { %v1211_v50 = vsel %vm6739_vm1, %v6487_v17, %v1208_v42  ;;  %v1308_v26 = vadd.s32 %v1306_v51, %v1304_v46  ;;  %v1331_v57 = vadd.s32 %v1330_v49, %v1320_v61  ;;  %v1407_v29 = vsel %vm1406_vm11, %v1405_v11, 0 }
 0x19d   : > { %v1213_v34 = vmul.f32 %v1211_v50, %v1211_v50  ;;  %v1300_v20 = vshrl.u32 %v1295_v3, 16  ;;  %v1409_v55 = vand.u32 31, %v1407_v29  ;;  %v1229_v1 = vadd.s32 3, %v1212_v56 }
 0x19e   : > { %v1309_v24 = vadd.s32 %v1308_v26, %v1298_v5  ;;  %v1332_v53 = vadd.s32 %v1331_v57, %v1322_v12  ;;  %v6805_v21 = vadd.s32 %v1325_v6, %v1321_v63  ;;  %v1403_v60 = vor.u32 8388608, %v6735_v8 }
 0x19f   : > { %v1214_v48 = vmul.f32 -0.001358992, %v1213_v34  ;;  %v1221_v9 = vmul.f32 -0.00019511016, %v1213_v34  ;;  %v6808_v47 = vsub.s32 32, %v1409_v55  ;;  %v1333_v28 = vmul.u32 %v6684_v13, %v1279_v31 }
 0x1a0   : > { %v6810_v4 = vadd.s32 %v1309_v24, %v1300_v20  ;;  %v1336_v38 = vadd.s32 1, %v1332_v53  ;;  %v6813_v62 = vshrl.u32 %v1407_v29, 5  ;;  %v1412_v10 = vshll.u32 %v5789_v16, %v1409_v55 }
 0x1a1   : > { %v1215_v52 = vadd.f32 0.041655596, %v1214_v48  ;;  %v1222_v58 = vadd.f32 0.008332121, %v1221_v9  ;;  %v1413_v56 = vshrl.u32 %v5790_v18, %v6808_v47  ;;  %v1416_v8 = vshrl.u32 %v5791_v22, %v6808_v47 }
 0x1a2   : > { %vm1335_vm8 = vc.u32 %v6810_v4, %v6805_v21  ;;  %v1415_v6 = vshll.u32 %v5790_v18, %v1409_v55  ;;  %v1418_v13 = vshll.u32 %v5791_v22, %v1409_v55  ;;  %v1419_v44 = vshrl.u32 %v8803_v25, %v6808_v47 }
 0x1a3   : > { %v1216_v3 = vmul.f32 %v1215_v52, %v1213_v34  ;;  %v1223_v54 = vmul.f32 %v1222_v58, %v1213_v34  ;;  %v1337_v63 = vsel %vm1335_vm8, %v1336_v38, %v1332_v53  ;;  %v1414_v36 = vor.u32 %v1413_v56, %v1412_v10 }
 0x1a4   : > { %v1338_v61 = vadd.s32 %v1337_v63, %v1333_v28  ;;  %v1421_v19 = vshll.u32 %v8803_v25, %v1409_v55  ;;  %v1422_v35 = vshrl.u32 %v8801_v30, %v6808_v47  ;;  %v1424_v45 = vshll.u32 %v8801_v30, %v1409_v55 }
 0x1a5   : > { %v1217_v39 = vadd.f32 -0.4999988, %v1216_v3  ;;  %v1224_v7 = vadd.f32 -0.16666654, %v1223_v54  ;;  %v1425_v40 = vshrl.u32 %v8800_v33, %v6808_v47  ;;  %v6832_v59 = vor.u32 %v1416_v8, %v1415_v6 }
 0x1a6   : > { %v1339_v12 = vadd.s32 536870912, %v1338_v61  ;;  %vm1228_vm13 = vweird.f32 %v6487_v17  ;;  %v1230_v11 = vand.u32 3, %v1229_v1  ;;  %v1420_v42 = vor.u32 %v1419_v44, %v1418_v13 }
 0x1a7   : > { %v1218_v32 = vmul.f32 %v1217_v39, %v1213_v34  ;;  %v1225_v43 = vmul.f32 %v1224_v7, %v1213_v34  ;;  %v1423_v46 = vor.u32 %v1422_v35, %v1421_v19  ;;  %v1426_v49 = vor.u32 %v1425_v40, %v1424_v45 }
 0x1a8   : > { %v6835_v26 = vshrl.u32 %v1339_v12, 30  ;;  %vm1430_vm14 = vcmp.lt.s32.totalorder %v6813_v62, 4  ;;  %vm1427_vm1 = vcmp.lt.s32.totalorder %v6813_v62, 1  ;;  %vm1429_vm2 = vcmp.lt.s32.totalorder %v6813_v62, 3 }
 0x1a9   : > { %v1219_v5 = vadd.f32 1.0, %v1218_v32  ;;  %v1226_v51 = vadd.f32 1.0, %v1225_v43  ;;  %v1436_v34 = vsel %vm1430_vm14, %v1423_v46, 920167782  ;;  %v402_v57 = vperm.slane %v6625_v27, 7 }
 0x1aa   : > { %v1341_v20 = vshll.u32 %v6835_v26, 30  ;;  %v1435_v55 = vsel %vm1427_vm1, %v1414_v36, %v6832_v59  ;;  %vm1231_vm15 = vcmp.lt.s32.totalorder %v1230_v11, 2  ;;  %v1437_v48 = vsel %vm1429_vm2, %v1420_v42, %v1436_v34 }
 0x1ab   : > { %v1227_v29 = vmul.f32 %v1226_v51, %v1211_v50  ;;  %v1236_v31 = vxor.u32 2147483648, %v1219_v5  ;;  %v1440_v9 = vsel %vm1430_vm14, %v1426_v49, 1326507024  ;;  %v6851_v24 = vshll.u32 %v1403_v60, 8 }
 0x1ac   : > { %v1342_v1 = vsub.s32 %v1338_v61, %v1341_v20  ;;  %vm1428_vm3 = vcmp.lt.s32.totalorder %v6813_v62, 2  ;;  %v1439_v27 = vsel %vm1427_vm1, %v6832_v59, %v1420_v42  ;;  %vm1232_vm4 = vcmp.eq.s32.totalorder %v1230_v11, 0 }
 0x1ad   : > { %v1233_v53 = vxor.u32 2147483648, %v1227_v29  ;;  %vm1235_vm5 = vcmp.eq.s32.totalorder %v1230_v11, 2  ;;  %v1438_v50 = vsel %vm1428_vm3, %v1435_v55, %v1437_v48  ;;  %v1441_v52 = vsel %vm1429_vm2, %v1423_v46, %v1440_v9 }
 0x1ae   : > { %v1237_v38 = vsel %vm1235_vm5, %v1236_v31, %v1227_v29  ;;  %vm1343_vm6 = vcmp.lt.s32.totalorder %v1342_v1, 0  ;;  %v1344_v60 = vsub.s32 0, %v1342_v1  ;;  %v1411_v10 = vshrl.u32 %v5789_v16, %v6808_v47 }
 0x1af   : > { %v1234_v58 = vsel %vm1232_vm4, %v1219_v5, %v1233_v53  ;;  %v1442_v56 = vsel %vm1428_vm3, %v1439_v27, %v1441_v52  ;;  %v1444_v3 = vand.u32 65535, %v6851_v24  ;;  %v1469_v6 = vshrl.u32 %v1438_v50, 16 }
 0x1b0   : > { %v1238_v28 = vsel %vm1231_vm15, %v1234_v58, %v1237_v38  ;;  %v1345_v8 = vsel %vm1343_vm6, %v1344_v60, %v1342_v1  ;;  %v1446_v63 = vand.u32 65535, %v1442_v56  ;;  %v1447_v39 = vshrl.u32 %v1442_v56, 16 }
 0x1b1   : > { %v1239_v54 = vsel %vm1228_vm13, nan, %v1238_v28  ;;  %v1346_v44 = vclz %v1345_v8  ;;  %v1468_v7 = vand.u32 65535, %v1438_v50  ;;  %v1334_v61 = vadd.s32 %v6805_v21, %v6810_v4 }
 0x1b2   : > { %v2953_v13 = vpack.c.bf16 %v1239_v54, %v1239_v54  ;;  %v6873_v47 = vsel %vm1427_vm1, %v1411_v10, %v1414_v36  ;;  %v1445_v19 = vshrl.u32 %v6851_v24, 16  ;;  %v1432_v45 = vsel %vm1430_vm14, %v1420_v42, 2102212464 }
 0x1b3   : > { %v5118_v17 = vadd.s32 4294967294, %v1346_v44  ;;  %v1449_v40 = vmul.u32 %v1447_v39, %v1444_v3  ;;  %v1364_v32 = vsub.s32 4, %v6835_v26  ;;  %v1471_v12 = vmul.u32 %v1469_v6, %v1444_v3 }
 0x1b4   : > { %v3513_v35 = vsel %vm8805_vm12, %v2953_v13, 0  ;;  %v1450_v43 = vmul.u32 %v1446_v63, %v1445_v19  ;;  %v434_v21 = vmul.f32 %v402_v57, %v6083_v15  ;;  %v1448_v4 = vmul.u32 %v1446_v63, %v1444_v3 }
 0x1b5   : > { %3631 = vmatpush.bf16.msrb.mxu0 %v3513_v35  ;;  %vm5119_vm7 = vcmp.lt.s32.totalorder %v5118_v17, 0  ;;  %v1452_v36 = vshll.u32 %v1449_v40, 16  ;;  %v1470_v11 = vmul.u32 %v1468_v7, %v1444_v3  ;;  %v1451_v49 = vmul.u32 %v1447_v39, %v1445_v19 }
 0x1b6   : > { %v1349_v46 = vsel %vm5119_vm7, 0, %v5118_v17  ;;  %v1472_v5 = vmul.u32 %v1468_v7, %v1445_v19  ;;  %v1474_v51 = vshll.u32 %v1471_v12, 16  ;;  %v1473_v42 = vmul.u32 %v1469_v6, %v1445_v19 }
 0x1b7   : > { %v1350_v34 = vsub.s32 32, %v1349_v46  ;;  %v1354_v29 = vsub.s32 4294967266, %v1349_v46  ;;  %vm1456_vm9 = vc.u32 %v1448_v4, %v1452_v36  ;;  %v1351_v31 = vshll.u32 %v1342_v1, %v1349_v46  ;;  %v6885_v1 = vld [vmem:[%s5969_s15 + $0x8] sm:$0xff] }
 0x1b8   : > { %v1454_v20 = vshll.u32 %v1450_v43, 16  ;;  %v1457_v55 = vsel %vm1456_vm9, 1, %v5788_v0  ;;  %v1458_v48 = vadd.s32 %v1452_v36, %v1448_v4  ;;  %vm1478_vm10 = vc.u32 %v1470_v11, %v1474_v51 }
 0x1b9   : > { %v1352_v9 = vshrl.u32 %v1334_v61, %v1350_v34  ;;  %v1355_v57 = vadd.s32 127, %v1354_v29  ;;  %v1459_v53 = vadd.s32 %v1457_v55, %v1451_v49  ;;  %v1476_v27 = vshll.u32 %v1472_v5, 16 }
 0x1ba   : > { %vm1460_vm11 = vc.u32 %v1458_v48, %v1454_v20  ;;  %v1479_v50 = vsel %vm1478_vm10, 1, %v5788_v0  ;;  %v1480_v52 = vadd.s32 %v1474_v51, %v1470_v11  ;;  %v1453_v10 = vshrl.u32 %v1449_v40, 16 }
 0x1bb   : > { %v1353_v58 = vor.u32 %v1352_v9, %v1351_v31  ;;  %v1356_v38 = vshll.u32 %v1355_v57, 23  ;;  %v1461_v60 = vsel %vm1460_vm11, 1, %v5788_v0  ;;  %v1481_v28 = vadd.s32 %v1479_v50, %v1473_v42 }
 0x1bc   : > { %v1463_v56 = vadd.s32 %v1461_v60, %v1459_v53  ;;  %vm1482_vm8 = vc.u32 %v1480_v52, %v1476_v27  ;;  %v6888_v3 = vadd.f32 %v6106_v41, %v434_v21  ;;  %v1455_v8 = vshrl.u32 %v1450_v43, 16 }
 0x1bd   : > { %v1357_v54 = vor.u32 4788187, %v1356_v38  ;;  %v1475_v63 = vshrl.u32 %v1471_v12, 16  ;;  %v1483_v6 = vsel %vm1482_vm8, 1, %v5788_v0  ;;  %v403_v7 = vperm.slane %v6885_v1, 0 }
 0x1be   : > { %v1464_v13 = vadd.s32 %v1463_v56, %v1453_v10  ;;  %v1485_v44 = vadd.s32 %v1483_v6, %v1481_v28  ;;  %v1550_v39 = vand.u32 2147483647, %v6888_v3  ;;  %v1360_v19 = vcvt.s32.f32 %v1353_v58 }
 0x1bf   : > { %v1358_v61 = vand.u32 2147483647, %v1357_v54  ;;  %v1433_v35 = vsel %vm1429_vm2, %v6832_v59, %v1432_v45  ;;  %v1553_v17 = vand.u32 2139095040, %v6888_v3  ;;  %vm1242_vm13 = vcmp.lt.s32.totalorder %v6662_v37, 0 }
 0x1c0   : > { %v1465_v40 = vadd.s32 %v1464_v13, %v1455_v8  ;;  %v1477_v43 = vshrl.u32 %v1472_v5, 16  ;;  %v1486_v12 = vadd.s32 %v1485_v44, %v1475_v63  ;;  %v1365_v4 = vsel %vm1242_vm13, %v1364_v32, %v6835_v26 }
 0x1c1   : > { %v1361_v21 = vmul.f32 %v1360_v19, %v1358_v61  ;;  %v1484_v36 = vadd.s32 %v1480_v52, %v1476_v27  ;;  %v1554_v11 = vshrl.u32 %v1553_v17, 23  ;;  %v1434_v46 = vsel %vm1428_vm3, %v6873_v47, %v1433_v35 }
 0x1c2   : > { %v1487_v49 = vadd.s32 %v1486_v12, %v1477_v43  ;;  %v1557_v59 = vand.u32 8388607, %v1550_v39  ;;  %v435_v45 = vmul.f32 %v403_v7, %v6083_v15  ;;  %vm1241_vm1 = vcmp.le.f32.partialorder %v1240_v2, 0.7853982 }
 0x1c3   : > { %v1362_v51 = vxor.u32 2147483648, %v1361_v21  ;;  %vm1490_vm14 = vc.u32 %v1465_v40, %v1484_v36  ;;  %v5123_v5 = vadd.s32 4294967169, %v1554_v11  ;;  %v1367_v47 = vsel %vm1241_vm1, 0, %v1365_v4 }
 0x1c4   : > { %v1491_v34 = vadd.s32 1, %v1487_v49  ;;  %v6910_v26 = vadd.f32 %v6106_v41, %v435_v45  ;;  %v1488_v32 = vmul.u32 %v6851_v24, %v1434_v46  ;;  %v1558_v20 = vor.u32 8388608, %v1557_v59 }
 0x1c5   : > { %v1363_v62 = vsel %vm1242_vm13, %v1362_v51, %v1361_v21  ;;  %v1560_v29 = vadd.s32 1, %v5123_v5  ;;  %v1384_v9 = vadd.s32 3, %v1367_v47  ;;  %vm1397_vm15 = vcmp.lt.s32.totalorder %v6681_v23, 0 }
 0x1c6   : > { %v1366_v42 = vsel %vm1241_vm1, %v6662_v37, %v1363_v62  ;;  %v1492_v31 = vsel %vm1490_vm14, %v1491_v34, %v1487_v49  ;;  %v1705_v57 = vand.u32 2147483647, %v6910_v26  ;;  %v6917_v58 = vshll.u32 %v1558_v20, 8 }
 0x1c7   : > { %v1368_v55 = vmul.f32 %v1366_v42, %v1366_v42  ;;  %v1493_v48 = vadd.s32 %v1492_v31, %v1488_v32  ;;  %vm1561_vm2 = vcmp.gt.s32.totalorder %v1560_v29, 0  ;;  %v6920_v28 = vand.u32 3, %v1384_v9 }
 0x1c8   : > { %v1562_v2 = vsel %vm1561_vm2, %v1560_v29, 0  ;;  %v6922_v10 = vadd.s32 %v1484_v36, %v1465_v40  ;;  %v1708_v54 = vand.u32 2139095040, %v6910_v26  ;;  %v6927_v13 = vand.u32 8388607, %v1705_v57 }
 0x1c9   : > { %v1369_v53 = vmul.f32 -0.001358992, %v1368_v55  ;;  %v1376_v27 = vmul.f32 -0.00019511016, %v1368_v55  ;;  %v1494_v50 = vadd.s32 536870912, %v1493_v48  ;;  %v1564_v52 = vand.u32 31, %v1562_v2 }
 0x1ca   : > { %vm6931_vm3 = vcmp.le.f32.partialorder %v1395_v14, 0.7853982  ;;  %v6935_v61 = vshrl.u32 %v1562_v2, 5  ;;  %v6938_v19 = vand.u32 65535, %v6917_v58  ;;  %v6941_v35 = vshrl.u32 %v6917_v58, 16 }
 0x1cb   : > { %v1370_v38 = vadd.f32 0.041655596, %v1369_v53  ;;  %v1377_v24 = vadd.f32 0.008332121, %v1376_v27  ;;  %v1495_v60 = vshrl.u32 %v1494_v50, 30  ;;  %v1565_v56 = vsub.s32 32, %v1564_v52 }
 0x1cc   : > { %v1567_v12 = vshll.u32 %v5789_v16, %v1564_v52  ;;  %vm1387_vm4 = vcmp.eq.s32.totalorder %v6920_v28, 0  ;;  %vm1390_vm5 = vcmp.eq.s32.totalorder %v6920_v28, 2  ;;  %v1570_v21 = vshll.u32 %v5790_v18, %v1564_v52 }
 0x1cd   : > { %v1371_v8 = vmul.f32 %v1370_v38, %v1368_v55  ;;  %v1378_v63 = vmul.f32 %v1377_v24, %v1368_v55  ;;  %v1496_v6 = vshll.u32 %v1495_v60, 30  ;;  %v1519_v7 = vsub.s32 4, %v1495_v60 }
 0x1ce   : > { %v1568_v14 = vshrl.u32 %v5790_v18, %v1565_v56  ;;  %v1571_v4 = vshrl.u32 %v5791_v22, %v1565_v56  ;;  %v1574_v36 = vshrl.u32 %v8803_v25, %v1565_v56  ;;  %vm1386_vm6 = vcmp.lt.s32.totalorder %v6920_v28, 2 }
 0x1cf   : > { %v1372_v17 = vadd.f32 -0.4999988, %v1371_v8  ;;  %v1379_v40 = vadd.f32 -0.16666654, %v1378_v63  ;;  %v6943_v43 = vsub.s32 %v1493_v48, %v1496_v6  ;;  %vm1383_vm9 = vweird.f32 %v6662_v37 }
 0x1d0   : > { %v1520_v59 = vsel %vm1397_vm15, %v1519_v7, %v1495_v60  ;;  %v1573_v45 = vshll.u32 %v5791_v22, %v1564_v52  ;;  %v1576_v51 = vshll.u32 %v8803_v25, %v1564_v52  ;;  %v1577_v5 = vshrl.u32 %v8801_v30, %v1565_v56 }
 0x1d1   : > { %v1373_v11 = vmul.f32 %v1372_v17, %v1368_v55  ;;  %v1380_v46 = vmul.f32 %v1379_v40, %v1368_v55  ;;  %vm1498_vm7 = vcmp.lt.s32.totalorder %v6943_v43, 0  ;;  %v1499_v49 = vsub.s32 0, %v6943_v43 }
 0x1d2   : > { %v1580_v32 = vshrl.u32 %v8800_v33, %v1565_v56  ;;  %v1569_v31 = vor.u32 %v1568_v14, %v1567_v12  ;;  %v1572_v20 = vor.u32 %v1571_v4, %v1570_v21  ;;  %v1578_v55 = vor.u32 %v1577_v5, %v1576_v51 }
 0x1d3   : > { %v1374_v34 = vadd.f32 1.0, %v1373_v11  ;;  %v1381_v62 = vadd.f32 1.0, %v1380_v46  ;;  %v1500_v47 = vsel %vm1498_vm7, %v1499_v49, %v6943_v43  ;;  %v1575_v2 = vor.u32 %v1574_v36, %v1573_v45 }
 0x1d4   : > { %v1501_v29 = vclz %v1500_v47  ;;  %v1579_v53 = vshll.u32 %v8801_v30, %v1564_v52  ;;  %v1566_v50 = vshrl.u32 %v5789_v16, %v1565_v56  ;;  %vm1582_vm10 = vcmp.lt.s32.totalorder %v6935_v61, 1 }
 0x1d5   : > { %v1382_v48 = vmul.f32 %v1381_v62, %v1366_v42  ;;  %v1391_v9 = vxor.u32 2147483648, %v1374_v34  ;;  %v1709_v38 = vshrl.u32 %v1708_v54, 23  ;;  %v1522_v60 = vsel %vm6931_vm3, 0, %v1520_v59 }
 0x1d6   : > { %v5121_v27 = vadd.s32 4294967294, %v1501_v29  ;;  %v1581_v8 = vor.u32 %v1580_v32, %v1579_v53  ;;  %vm1585_vm11 = vcmp.lt.s32.totalorder %v6935_v61, 4  ;;  %vm1584_vm13 = vcmp.lt.s32.totalorder %v6935_v61, 3 }
 0x1d7   : > { %v1388_v24 = vxor.u32 2147483648, %v1382_v48  ;;  %v1590_v42 = vsel %vm1582_vm10, %v1569_v31, %v1572_v20  ;;  %v1591_v52 = vsel %vm1585_vm11, %v1578_v55, 920167782  ;;  %v1392_v54 = vsel %vm1390_vm5, %v1391_v9, %v1382_v48 }
 0x1d8   : > { %vm5122_vm8 = vcmp.lt.s32.totalorder %v5121_v27, 0  ;;  %v1592_v6 = vsel %vm1584_vm13, %v1575_v2, %v1591_v52  ;;  %vm1583_vm14 = vcmp.lt.s32.totalorder %v6935_v61, 2  ;;  %v1594_v4 = vsel %vm1582_vm10, %v1572_v20, %v1575_v2 }
 0x1d9   : > { %v1389_v56 = vsel %vm1387_vm4, %v1374_v34, %v1388_v24  ;;  %v1504_v63 = vsel %vm5122_vm8, 0, %v5121_v27  ;;  %v1593_v21 = vsel %vm1583_vm14, %v1590_v42, %v1592_v6  ;;  %v1595_v46 = vsel %vm1585_vm11, %v1581_v8, 1326507024 }
 0x1da   : > { %v1393_v7 = vsel %vm1386_vm6, %v1389_v56, %v1392_v54  ;;  %v1505_v17 = vsub.s32 32, %v1504_v63  ;;  %v1509_v40 = vsub.s32 4294967266, %v1504_v63  ;;  %v1506_v14 = vshll.u32 %v6943_v43, %v1504_v63 }
 0x1db   : > { %v1394_v12 = vsel %vm1383_vm9, nan, %v1393_v7  ;;  %v1587_v49 = vsel %vm1585_vm11, %v1575_v2, 2102212464  ;;  %v1596_v37 = vsel %vm1584_vm13, %v1578_v55, %v1595_v46  ;;  %v1623_v43 = vand.u32 65535, %v1593_v21 }
 0x1dc   : > { %v2954_v36 = vpack.c.bf16 %v1394_v12, %v1394_v12  ;;  %v1507_v11 = vshrl.u32 %v6922_v10, %v1505_v17  ;;  %v1510_v28 = vadd.s32 127, %v1509_v40  ;;  %v1624_v59 = vshrl.u32 %v1593_v21, 16 }
 0x1dd   : > { %v1597_v34 = vsel %vm1583_vm14, %v1594_v4, %v1596_v37  ;;  %v5126_v32 = vadd.s32 4294967169, %v1709_v38  ;;  %v1539_v48 = vadd.s32 3, %v1522_v60  ;;  %v1586_v55 = vsel %vm1582_vm10, %v1566_v50, %v1569_v31 }
 0x1de   : > { %v3516_v45 = vsel %vm8805_vm12, %v2954_v36, 0  ;;  %v1508_v51 = vor.u32 %v1507_v11, %v1506_v14  ;;  %v1511_v5 = vshll.u32 %v1510_v28, 23  ;;  %v1601_v10 = vand.u32 65535, %v1597_v34 }
 0x1df   : > { %3650 = vmatpush.bf16.msrb.mxu1 %v3516_v45  ;;  %v1602_v62 = vshrl.u32 %v1597_v34, 16  ;;  %v1626_v47 = vmul.u32 %v1624_v59, %v6938_v19  ;;  %v1627_v9 = vmul.u32 %v1623_v43, %v6941_v35  ;;  %v1588_v2 = vsel %vm1584_vm13, %v1572_v20, %v1587_v49 }
 0x1e0   : > { %v1512_v29 = vor.u32 4788187, %v1511_v5  ;;  %v1605_v27 = vmul.u32 %v1601_v10, %v6941_v35  ;;  %v1625_v24 = vmul.u32 %v1623_v43, %v6938_v19  ;;  %v1515_v42 = vcvt.s32.f32 %v1508_v51 }
 0x1e1   : > { %v1604_v53 = vmul.u32 %v1602_v62, %v6938_v19  ;;  %v1628_v38 = vmul.u32 %v1624_v59, %v6941_v35  ;;  %v1629_v52 = vshll.u32 %v1626_v47, 16  ;;  %v1603_v60 = vmul.u32 %v1601_v10, %v6938_v19 }
 0x1e2   : > { %v1513_v8 = vand.u32 2147483647, %v1512_v29  ;;  %v1606_v31 = vmul.u32 %v1602_v62, %v6941_v35  ;;  %v1631_v56 = vshll.u32 %v1627_v9, 16  ;;  %v1609_v63 = vshll.u32 %v1605_v27, 16 }
 0x1e3   : > { %v1607_v50 = vshll.u32 %v1604_v53, 16  ;;  %vm1633_vm1 = vc.u32 %v1625_v24, %v1629_v52  ;;  %v1635_v20 = vadd.s32 %v1629_v52, %v1625_v24  ;;  %v1715_v17 = vadd.s32 1, %v5126_v32 }
 0x1e4   : > { %v1516_v54 = vmul.f32 %v1515_v42, %v1513_v8  ;;  %v1634_v7 = vsel %vm1633_vm1, 1, %v5788_v0  ;;  %v1630_v19 = vshrl.u32 %v1626_v47, 16  ;;  %v1608_v46 = vshrl.u32 %v1604_v53, 16 }
 0x1e5   : > { %vm1611_vm2 = vc.u32 %v1603_v60, %v1607_v50  ;;  %v1613_v6 = vadd.s32 %v1607_v50, %v1603_v60  ;;  %v1636_v14 = vadd.s32 %v1634_v7, %v1628_v38  ;;  %vm1637_vm4 = vc.u32 %v1635_v20, %v1631_v56 }
 0x1e6   : > { %v1517_v40 = vxor.u32 2147483648, %v1516_v54  ;;  %v1612_v12 = vsel %vm1611_vm2, 1, %v5788_v0  ;;  %v1638_v35 = vsel %vm1637_vm4, 1, %v5788_v0  ;;  %vm1716_vm6 = vcmp.gt.s32.totalorder %v1715_v17, 0 }
 0x1e7   : > { %v1614_v21 = vadd.s32 %v1612_v12, %v1606_v31  ;;  %vm1615_vm5 = vc.u32 %v1613_v6, %v1609_v63  ;;  %v1640_v11 = vadd.s32 %v1638_v35, %v1636_v14  ;;  %v1717_v37 = vsel %vm1716_vm6, %v1715_v17, 0 }
 0x1e8   : > { %v1518_v4 = vsel %vm1397_vm15, %v1517_v40, %v1516_v54  ;;  %v1616_v36 = vsel %vm1615_vm5, 1, %v5788_v0  ;;  %v1632_v59 = vshrl.u32 %v1627_v9, 16  ;;  %v1719_v51 = vand.u32 31, %v1717_v37 }
 0x1e9   : > { %v1521_v28 = vsel %vm6931_vm3, %v6681_v23, %v1518_v4  ;;  %v1618_v49 = vadd.s32 %v1616_v36, %v1614_v21  ;;  %v1641_v45 = vadd.s32 %v1640_v11, %v1630_v19  ;;  %v1589_v5 = vsel %vm1583_vm14, %v1586_v55, %v1588_v2 }
 0x1ea   : > { %v1523_v43 = vmul.f32 %v1521_v28, %v1521_v28  ;;  %v1610_v34 = vshrl.u32 %v1605_v27, 16  ;;  %v7023_v29 = vsub.s32 32, %v1719_v51  ;;  %v7025_v24 = vand.u32 3, %v1539_v48 }
 0x1eb   : > { %v1619_v10 = vadd.s32 %v1618_v49, %v1608_v46  ;;  %v1642_v32 = vadd.s32 %v1641_v45, %v1632_v59  ;;  %v7029_v53 = vadd.s32 %v1635_v20, %v1631_v56  ;;  %v1713_v9 = vor.u32 8388608, %v6927_v13 }
 0x1ec   : > { %v1524_v62 = vmul.f32 -0.001358992, %v1523_v43  ;;  %v1531_v47 = vmul.f32 -0.00019511016, %v1523_v43  ;;  %v1643_v61 = vmul.u32 %v6917_v58, %v1589_v5  ;;  %v7035_v2 = vshrl.u32 %v1717_v37, 5 }
 0x1ed   : > { %v7027_v44 = vadd.s32 %v1619_v10, %v1610_v34  ;;  %v1646_v55 = vadd.s32 1, %v1642_v32  ;;  %v1723_v48 = vshrl.u32 %v5790_v18, %v7023_v29  ;;  %v1726_v27 = vshrl.u32 %v5791_v22, %v7023_v29 }
 0x1ee   : > { %v1525_v8 = vadd.f32 0.041655596, %v1524_v62  ;;  %v1532_v42 = vadd.f32 0.008332121, %v1531_v47  ;;  %v1722_v13 = vshll.u32 %v5789_v16, %v1719_v51  ;;  %v1725_v58 = vshll.u32 %v5790_v18, %v1719_v51 }
 0x1ef   : > { %vm1645_vm15 = vc.u32 %v7027_v44, %v7029_v53  ;;  %v1728_v50 = vshll.u32 %v5791_v22, %v1719_v51  ;;  %v1729_v56 = vshrl.u32 %v8803_v25, %v7023_v29  ;;  %v1731_v20 = vshll.u32 %v8803_v25, %v1719_v51 }
 0x1f0   : > { %v1526_v38 = vmul.f32 %v1525_v8, %v1523_v43  ;;  %v1533_v52 = vmul.f32 %v1532_v42, %v1523_v43  ;;  %v1647_v60 = vsel %vm1645_vm15, %v1646_v55, %v1642_v32  ;;  %v1732_v6 = vshrl.u32 %v8801_v30, %v7023_v29 }
 0x1f1   : > { %v1648_v31 = vadd.s32 %v1647_v60, %v1643_v61  ;;  %v1724_v17 = vor.u32 %v1723_v48, %v1722_v13  ;;  %v1727_v40 = vor.u32 %v1726_v27, %v1725_v58  ;;  %v1735_v12 = vshrl.u32 %v8800_v33, %v7023_v29 }
 0x1f2   : > { %v1527_v54 = vadd.f32 -0.4999988, %v1526_v38  ;;  %v1534_v63 = vadd.f32 -0.16666654, %v1533_v52  ;;  %v1733_v19 = vor.u32 %v1732_v6, %v1731_v20  ;;  %v404_v35 = vperm.slane %v6885_v1, 1 }
 0x1f3   : > { %v1649_v7 = vadd.s32 536870912, %v1648_v31  ;;  %vm1538_vm3 = vweird.f32 %v6681_v23  ;;  %vm1541_vm7 = vcmp.lt.s32.totalorder %v7025_v24, 2  ;;  %v1730_v36 = vor.u32 %v1729_v56, %v1728_v50 }
 0x1f4   : > { %v1528_v14 = vmul.f32 %v1527_v54, %v1523_v43  ;;  %v1535_v21 = vmul.f32 %v1534_v63, %v1523_v43  ;;  %v1734_v11 = vshll.u32 %v8801_v30, %v1719_v51  ;;  %vm1737_vm9 = vcmp.lt.s32.totalorder %v7035_v2, 1 }
 0x1f5   : > { %v7054_v4 = vshrl.u32 %v1649_v7, 30  ;;  %v7058_v37 = vshll.u32 %v1713_v9, 8  ;;  %vm1740_vm10 = vcmp.lt.s32.totalorder %v7035_v2, 4  ;;  %v1745_v45 = vsel %vm1737_vm9, %v1724_v17, %v1727_v40 }
 0x1f6   : > { %v1529_v46 = vadd.f32 1.0, %v1528_v14  ;;  %v1536_v49 = vadd.f32 1.0, %v1535_v21  ;;  %v1736_v59 = vor.u32 %v1735_v12, %v1734_v11  ;;  %vm1739_vm11 = vcmp.lt.s32.totalorder %v7035_v2, 3 }
 0x1f7   : > { %v1651_v43 = vshll.u32 %v7054_v4, 30  ;;  %v1746_v51 = vsel %vm1740_vm10, %v1733_v19, 920167782  ;;  %vm1542_vm8 = vcmp.eq.s32.totalorder %v7025_v24, 0  ;;  %vm1738_vm13 = vcmp.lt.s32.totalorder %v7035_v2, 2 }
 0x1f8   : > { %v1537_v5 = vmul.f32 %v1536_v49, %v1521_v28  ;;  %v1546_v34 = vxor.u32 2147483648, %v1529_v46  ;;  %v1747_v62 = vsel %vm1739_vm11, %v1730_v36, %v1746_v51  ;;  %vm1545_vm14 = vcmp.eq.s32.totalorder %v7025_v24, 2 }
 0x1f9   : > { %v1652_v10 = vsub.s32 %v1648_v31, %v1651_v43  ;;  %v1748_v28 = vsel %vm1738_vm13, %v1745_v45, %v1747_v62  ;;  %v1749_v32 = vsel %vm1737_vm9, %v1727_v40, %v1730_v36  ;;  %v1750_v8 = vsel %vm1740_vm10, %v1736_v59, 1326507024 }
 0x1fa   : > { %v1543_v47 = vxor.u32 2147483648, %v1537_v5  ;;  %v1754_v42 = vand.u32 65535, %v7058_v37  ;;  %v1547_v55 = vsel %vm1545_vm14, %v1546_v34, %v1537_v5  ;;  %v1751_v48 = vsel %vm1739_vm11, %v1733_v19, %v1750_v8 }
 0x1fb   : > { %vm1653_vm1 = vcmp.lt.s32.totalorder %v1652_v10, 0  ;;  %v1654_v9 = vsub.s32 0, %v1652_v10  ;;  %v1755_v27 = vshrl.u32 %v7058_v37, 16  ;;  %v1752_v60 = vsel %vm1738_vm13, %v1749_v32, %v1751_v48 }
 0x1fc   : > { %v1544_v61 = vsel %vm1542_vm8, %v1529_v46, %v1543_v47  ;;  %v1779_v13 = vshrl.u32 %v1748_v28, 16  ;;  %v1756_v50 = vand.u32 65535, %v1752_v60  ;;  %v1757_v56 = vshrl.u32 %v1752_v60, 16 }
 0x1fd   : > { %v1548_v38 = vsel %vm1541_vm7, %v1544_v61, %v1547_v55  ;;  %v1655_v52 = vsel %vm1653_vm1, %v1654_v9, %v1652_v10  ;;  %v1721_v63 = vshrl.u32 %v5789_v16, %v7023_v29  ;;  %v1742_v20 = vsel %vm1740_vm10, %v1730_v36, 2102212464 }
 0x1fe   : > { %v1549_v31 = vsel %vm1538_vm3, nan, %v1548_v38  ;;  %v1656_v58 = vclz %v1655_v52  ;;  %v1778_v24 = vand.u32 65535, %v1748_v28  ;;  %v1644_v6 = vadd.s32 %v7029_v53, %v7027_v44 }
 0x1ff   : > { %v2955_v54 = vpack.c.bf16 %v1549_v31, %v1549_v31  ;;  %v1759_v12 = vmul.u32 %v1757_v56, %v1754_v42  ;;  %v1760_v14 = vmul.u32 %v1756_v50, %v1755_v27  ;;  %v1674_v21 = vsub.s32 4, %v7054_v4 }
 0x200   : > { %v5124_v7 = vadd.s32 4294967294, %v1656_v58  ;;  %v1741_v19 = vsel %vm1737_vm9, %v1721_v63, %v1724_v17  ;;  %v1781_v11 = vmul.u32 %v1779_v13, %v1754_v42  ;;  %v1743_v29 = vsel %vm1739_vm11, %v1727_v40, %v1742_v20 }
 0x201   : > { %v3519_v23 = vsel %vm8805_vm12, %v2955_v54, 0  ;;  %v1758_v36 = vmul.u32 %v1756_v50, %v1754_v42  ;;  %v1762_v46 = vshll.u32 %v1759_v12, 16  ;;  %vm1552_vm4 = vcmp.lt.s32.totalorder %v6888_v3, 0 }
 0x202   : > { %3669 = vmatpush.bf16.msrb.mxu2 %v3519_v23  ;;  %vm5125_vm2 = vcmp.lt.s32.totalorder %v5124_v7, 0  ;;  %v1761_v53 = vmul.u32 %v1757_v56, %v1755_v27  ;;  %v1780_v49 = vmul.u32 %v1778_v24, %v1754_v42  ;;  %v1782_v43 = vmul.u32 %v1778_v24, %v1755_v27 }
 0x203   : > { %v1659_v44 = vsel %vm5125_vm2, 0, %v5124_v7  ;;  %v1764_v5 = vshll.u32 %v1760_v14, 16  ;;  %vm1766_vm5 = vc.u32 %v1758_v36, %v1762_v46  ;;  %v1768_v34 = vadd.s32 %v1762_v46, %v1758_v36 }
 0x204   : > { %v1660_v59 = vsub.s32 32, %v1659_v44  ;;  %v1664_v45 = vsub.s32 4294967266, %v1659_v44  ;;  %v1767_v17 = vsel %vm1766_vm5, 1, %v5788_v0  ;;  %v1783_v51 = vmul.u32 %v1779_v13, %v1755_v27 }
 0x205   : > { %v1784_v62 = vshll.u32 %v1781_v11, 16  ;;  %v1661_v47 = vshll.u32 %v1652_v10, %v1659_v44  ;;  %v1769_v32 = vadd.s32 %v1767_v17, %v1761_v53  ;;  %vm1770_vm6 = vc.u32 %v1768_v34, %v1764_v5 }
 0x206   : > { %v1662_v28 = vshrl.u32 %v1644_v6, %v1660_v59  ;;  %v1665_v40 = vadd.s32 127, %v1664_v45  ;;  %v1786_v9 = vshll.u32 %v1782_v43, 16  ;;  %v1771_v55 = vsel %vm1770_vm6, 1, %v5788_v0  ;;  %v5435_v6 = vld [vmem:[%s8788_s4] sm:$0xff] }
 0x207   : > { %vm1788_vm15 = vc.u32 %v1780_v49, %v1784_v62  ;;  %v1790_v8 = vadd.s32 %v1784_v62, %v1780_v49  ;;  %v1763_v38 = vshrl.u32 %v1759_v12, 16  ;;  %v1773_v52 = vadd.s32 %v1771_v55, %v1769_v32 }
 0x208   : > { %v1663_v61 = vor.u32 %v1662_v28, %v1661_v47  ;;  %v1666_v42 = vshll.u32 %v1665_v40, 23  ;;  %v1789_v48 = vsel %vm1788_vm15, 1, %v5788_v0  ;;  %v1765_v13 = vshrl.u32 %v1760_v14, 16 }
 0x209   : > { %v1791_v60 = vadd.s32 %v1789_v48, %v1783_v51  ;;  %vm1792_vm3 = vc.u32 %v1790_v8, %v1786_v9  ;;  %v1785_v10 = vshrl.u32 %v1781_v11, 16  ;;  %v1774_v58 = vadd.s32 %v1773_v52, %v1763_v38 }
 0x20a   : > { %v1667_v27 = vor.u32 4788187, %v1666_v42  ;;  %v1793_v31 = vsel %vm1792_vm3, 1, %v5788_v0  ;;  %v436_v56 = vmul.f32 %v404_v35, %v6083_v15  ;;  %v405_v54 = vperm.slane %v6885_v1, 2 }
 0x20b   : > { %v1795_v50 = vadd.s32 %v1793_v31, %v1791_v60  ;;  %v1670_v20 = vcvt.s32.f32 %v1663_v61  ;;  %v1675_v24 = vsel %vm1552_vm4, %v1674_v21, %v7054_v4  ;;  %vm3492_vm7 = vcmask 64512  }
 0x20c   : > { %v1668_v63 = vand.u32 2147483647, %v1667_v27  ;;  %v1775_v7 = vadd.s32 %v1774_v58, %v1765_v13  ;;  %v1787_v12 = vshrl.u32 %v1782_v43, 16  ;;  %v7116_v23 = vadd.f32 %v6106_v41, %v436_v56  ;;  %5326 = vmatmul.msk.bf16.vlgmr.msra.gmra.mxu0 %vm3492_vm7, %v5435_v6  ;;  %5328 = vmatmul.msk.bf16.vlgmr.msra.gmra.mxu1 %vm3492_vm7, %v5435_v6 }
 0x20d   : > { %v1796_v14 = vadd.s32 %v1795_v50, %v1785_v10  ;;  %vm7120_vm9 = vcmp.le.f32.partialorder %v1550_v39, 0.7853982  ;;  %v1794_v4 = vadd.s32 %v1790_v8, %v1786_v9  ;;  %5330 = vmatmul.msk.bf16.vlgmr.msra.gmra.mxu2 %vm3492_vm7, %v5435_v6  ;;  %5332 = vmatmul.msk.bf16.vlgmr.msra.gmra.mxu3 %vm3492_vm7, %v5435_v6  ;;  %v1744_v21 = vsel %vm1738_vm13, %v1741_v19, %v1743_v29 }
 0x20e   : > { %v1671_v35 = vmul.f32 %v1670_v20, %v1668_v63  ;;  %v1860_v36 = vand.u32 2147483647, %v7116_v23  ;;  %v437_v39 = vmul.f32 %v405_v54, %v6083_v15  ;;  %v1677_v44 = vsel %vm7120_vm9, 0, %v1675_v24 }
 0x20f   : > { %v1797_v11 = vadd.s32 %v1796_v14, %v1787_v12  ;;  %vm1800_vm10 = vc.u32 %v1775_v7, %v1794_v4  ;;  %v1863_v53 = vand.u32 2139095040, %v7116_v23  ;;  %v1798_v19 = vmul.u32 %v7058_v37, %v1744_v21 }
 0x210   : > { %v1672_v46 = vxor.u32 2147483648, %v1671_v35  ;;  %v7136_v43 = vadd.f32 %v6106_v41, %v437_v39  ;;  %v1694_v45 = vadd.s32 3, %v1677_v44  ;;  %v1867_v17 = vand.u32 8388607, %v1860_v36 }
 0x211   : > { %v1801_v49 = vadd.s32 1, %v1797_v11  ;;  %v1864_v29 = vshrl.u32 %v1863_v53, 23  ;;  %vm1707_vm8 = vcmp.lt.s32.totalorder %v6910_v26, 0  ;;  %vm7152_vm13 = vcmp.le.f32.partialorder %v1705_v57, 0.7853982 }
 0x212   : > { %v1673_v2 = vsel %vm1552_vm4, %v1672_v46, %v1671_v35  ;;  %v2018_v47 = vand.u32 2139095040, %v7136_v43  ;;  %v7147_v37 = vand.u32 3, %v1694_v45  ;;  %v1868_v8 = vor.u32 8388608, %v1867_v17 }
 0x213   : > { %v1676_v59 = vsel %vm7120_vm9, %v6888_v3, %v1673_v2  ;;  %v1802_v5 = vsel %vm1800_vm10, %v1801_v49, %v1797_v11  ;;  %v5129_v62 = vadd.s32 4294967169, %v1864_v29  ;;  %v1799_v63 = vadd.s32 %v1794_v4, %v1775_v7 }
 0x214   : > { %v1678_v34 = vmul.f32 %v1676_v59, %v1676_v59  ;;  %v1803_v51 = vadd.s32 %v1802_v5, %v1798_v19  ;;  %v2019_v38 = vshrl.u32 %v2018_v47, 23  ;;  %v7156_v58 = vshll.u32 %v1868_v8, 8 }
 0x215   : > { %v1870_v9 = vadd.s32 1, %v5129_v62  ;;  %vm1700_vm14 = vcmp.eq.s32.totalorder %v7147_v37, 2  ;;  %vm1697_vm1 = vcmp.eq.s32.totalorder %v7147_v37, 0  ;;  %v2015_v24 = vand.u32 2147483647, %v7136_v43 }
 0x216   : > { %v1679_v28 = vmul.f32 -0.001358992, %v1678_v34  ;;  %v1686_v40 = vmul.f32 -0.00019511016, %v1678_v34  ;;  %v1804_v32 = vadd.s32 536870912, %v1803_v51  ;;  %v5132_v6 = vadd.s32 4294967169, %v2019_v38 }
 0x217   : > { %vm1871_vm11 = vcmp.gt.s32.totalorder %v1870_v9, 0  ;;  %vm1696_vm2 = vcmp.lt.s32.totalorder %v7147_v37, 2  ;;  %vm1693_vm5 = vweird.f32 %v6888_v3  ;;  %v7169_v7 = vand.u32 65535, %v7156_v58 }
 0x218   : > { %v1680_v61 = vadd.f32 0.041655596, %v1679_v28  ;;  %v1687_v42 = vadd.f32 0.008332121, %v1686_v40  ;;  %v1805_v55 = vshrl.u32 %v1804_v32, 30  ;;  %v1872_v48 = vsel %vm1871_vm11, %v1870_v9, 0 }
 0x219   : > { %v1874_v31 = vand.u32 31, %v1872_v48  ;;  %v7172_v4 = vshrl.u32 %v7156_v58, 16  ;;  %v7175_v53 = vshrl.u32 %v1872_v48, 5  ;;  %v7178_v2 = vadd.s32 1, %v5132_v6 }
 0x21a   : > { %v1681_v52 = vmul.f32 %v1680_v61, %v1678_v34  ;;  %v1688_v60 = vmul.f32 %v1687_v42, %v1678_v34  ;;  %v1806_v27 = vshll.u32 %v1805_v55, 30  ;;  %v1829_v10 = vsub.s32 4, %v1805_v55 }
 0x21b   : > { %v1875_v20 = vsub.s32 32, %v1874_v31  ;;  %v1877_v49 = vshll.u32 %v5789_v16, %v1874_v31  ;;  %v1880_v45 = vshll.u32 %v5790_v18, %v1874_v31  ;;  %v1883_v62 = vshll.u32 %v5791_v22, %v1874_v31 }
 0x21c   : > { %v1682_v50 = vadd.f32 -0.4999988, %v1681_v52  ;;  %v1689_v56 = vadd.f32 -0.16666654, %v1688_v60  ;;  %v1807_v54 = vsub.s32 %v1803_v51, %v1806_v27  ;;  %v7165_v1 = vsel %vm1707_vm8, %v1829_v10, %v1805_v55 }
 0x21d   : > { %v1878_v35 = vshrl.u32 %v5790_v18, %v1875_v20  ;;  %v1881_v46 = vshrl.u32 %v5791_v22, %v1875_v20  ;;  %v1884_v5 = vshrl.u32 %v8803_v25, %v1875_v20  ;;  %v1886_v40 = vshll.u32 %v8803_v25, %v1874_v31 }
 0x21e   : > { %v1683_v57 = vmul.f32 %v1682_v50, %v1678_v34  ;;  %v1690_v12 = vmul.f32 %v1689_v56, %v1678_v34  ;;  %vm1808_vm4 = vcmp.lt.s32.totalorder %v1807_v54, 0  ;;  %v1809_v14 = vsub.s32 0, %v1807_v54 }
 0x21f   : > { %v1832_v34 = vsel %vm7152_vm13, 0, %v7165_v1  ;;  %v1879_v51 = vor.u32 %v1878_v35, %v1877_v49  ;;  %v1882_v28 = vor.u32 %v1881_v46, %v1880_v45  ;;  %v1887_v32 = vshrl.u32 %v8801_v30, %v1875_v20 }
 0x220   : > { %v1684_v21 = vadd.f32 1.0, %v1683_v57  ;;  %v1691_v11 = vadd.f32 1.0, %v1690_v12  ;;  %v1810_v39 = vsel %vm1808_vm4, %v1809_v14, %v1807_v54  ;;  %v1885_v9 = vor.u32 %v1884_v5, %v1883_v62 }
 0x221   : > { %v1811_v44 = vclz %v1810_v39  ;;  %v1890_v8 = vshrl.u32 %v8800_v33, %v1875_v20  ;;  %v1888_v55 = vor.u32 %v1887_v32, %v1886_v40  ;;  %v1889_v48 = vshll.u32 %v8801_v30, %v1874_v31 }
 0x222   : > { %v1692_v19 = vmul.f32 %v1691_v11, %v1676_v59  ;;  %v1701_v29 = vxor.u32 2147483648, %v1684_v21  ;;  %v1876_v27 = vshrl.u32 %v5789_v16, %v1875_v20  ;;  %vm1892_vm15 = vcmp.lt.s32.totalorder %v7175_v53, 1 }
 0x223   : > { %v5127_v17 = vadd.s32 4294967294, %v1811_v44  ;;  %v1891_v56 = vor.u32 %v1890_v8, %v1889_v48  ;;  %vm1895_vm3 = vcmp.lt.s32.totalorder %v7175_v53, 4  ;;  %vm1894_vm9 = vcmp.lt.s32.totalorder %v7175_v53, 3 }
 0x224   : > { %v1698_v47 = vxor.u32 2147483648, %v1692_v19  ;;  %v1702_v59 = vsel %vm1700_vm14, %v1701_v29, %v1692_v19  ;;  %v1897_v37 = vsel %vm1895_vm3, %v1885_v9, 2102212464  ;;  %v1900_v31 = vsel %vm1892_vm15, %v1879_v51, %v1882_v28 }
 0x225   : > { %vm5128_vm6 = vcmp.lt.s32.totalorder %v5127_v17, 0  ;;  %v1901_v14 = vsel %vm1895_vm3, %v1888_v55, 920167782  ;;  %v1904_v3 = vsel %vm1892_vm15, %v1882_v28, %v1885_v9  ;;  %vm1893_vm10 = vcmp.lt.s32.totalorder %v7175_v53, 2 }
 0x226   : > { %v1699_v61 = vsel %vm1697_vm1, %v1684_v21, %v1698_v47  ;;  %v1814_v42 = vsel %vm5128_vm6, 0, %v5127_v17  ;;  %v1905_v21 = vsel %vm1895_vm3, %v1891_v56, 1326507024  ;;  %v1898_v39 = vsel %vm1894_vm9, %v1882_v28, %v1897_v37 }
 0x227   : > { %v1703_v38 = vsel %vm1696_vm2, %v1699_v61, %v1702_v59  ;;  %v1815_v52 = vsub.s32 32, %v1814_v42  ;;  %v1819_v60 = vsub.s32 4294967266, %v1814_v42  ;;  %v1816_v50 = vshll.u32 %v1807_v54, %v1814_v42 }
 0x228   : > { %v1704_v10 = vsel %vm1693_vm5, nan, %v1703_v38  ;;  %v1896_v54 = vsel %vm1892_vm15, %v1876_v27, %v1879_v51  ;;  %v1906_v44 = vsel %vm1894_vm9, %v1888_v55, %v1905_v21  ;;  %vm2026_vm11 = vcmp.gt.s32.totalorder %v7178_v2, 0 }
 0x229   : > { %v2956_v6 = vpack.c.bf16 %v1704_v10, %v1704_v10  ;;  %v1817_v57 = vshrl.u32 %v1799_v63, %v1815_v52  ;;  %v1820_v12 = vadd.s32 127, %v1819_v60  ;;  %v1902_v63 = vsel %vm1894_vm9, %v1885_v9, %v1901_v14 }
 0x22a   : > { %v1903_v46 = vsel %vm1893_vm10, %v1900_v31, %v1902_v63  ;;  %v1907_v49 = vsel %vm1893_vm10, %v1904_v3, %v1906_v44  ;;  %v1849_v62 = vadd.s32 3, %v1832_v34  ;;  %v7219_v40 = vand.u32 8388607, %v2015_v24 }
 0x22b   : > { %v3522_v1 = vsel %vm8805_vm12, %v2956_v6, 0  ;;  %v1818_v20 = vor.u32 %v1817_v57, %v1816_v50  ;;  %v1821_v35 = vshll.u32 %v1820_v12, 23  ;;  %v1933_v19 = vand.u32 65535, %v1903_v46 }
 0x22c   : > { %3688 = vmatpush.bf16.msrb.mxu3 %v3522_v1  ;;  %v1934_v29 = vshrl.u32 %v1903_v46, 16  ;;  %v1911_v17 = vand.u32 65535, %v1907_v49  ;;  %v1912_v51 = vshrl.u32 %v1907_v49, 16  ;;  %v7223_v59 = vsel %vm1893_vm10, %v1896_v54, %v1898_v39 }
 0x22d   : > { %v1822_v11 = vor.u32 4788187, %v1821_v35  ;;  %v1825_v5 = vcvt.s32.f32 %v1818_v20  ;;  %v1937_v28 = vmul.u32 %v1933_v19, %v7172_v4  ;;  %v1935_v61 = vmul.u32 %v1933_v19, %v7169_v7 }
 0x22e   : > { %v1936_v47 = vmul.u32 %v1934_v29, %v7169_v7  ;;  %v1914_v9 = vmul.u32 %v1912_v51, %v7169_v7  ;;  %v1915_v8 = vmul.u32 %v1911_v17, %v7172_v4  ;;  %v1938_v34 = vmul.u32 %v1934_v29, %v7172_v4 }
 0x22f   : > { %v1823_v45 = vand.u32 2147483647, %v1822_v11  ;;  %v2027_v55 = vsel %vm2026_vm11, %v7178_v2, 0  ;;  %v1913_v38 = vmul.u32 %v1911_v17, %v7169_v7  ;;  %v1916_v53 = vmul.u32 %v1912_v51, %v7172_v4 }
 0x230   : > { %v1939_v42 = vshll.u32 %v1936_v47, 16  ;;  %v1917_v52 = vshll.u32 %v1914_v9, 16  ;;  %v1919_v60 = vshll.u32 %v1915_v8, 16  ;;  %v1941_v27 = vshll.u32 %v1937_v28, 16 }
 0x231   : > { %v1826_v32 = vmul.f32 %v1825_v5, %v1823_v45  ;;  %v1918_v31 = vshrl.u32 %v1914_v9, 16  ;;  %v1940_v1 = vshrl.u32 %v1936_v47, 16  ;;  %v2029_v63 = vand.u32 31, %v2027_v55 }
 0x232   : > { %vm1943_vm14 = vc.u32 %v1935_v61, %v1939_v42  ;;  %v1945_v10 = vadd.s32 %v1939_v42, %v1935_v61  ;;  %vm1921_vm1 = vc.u32 %v1913_v38, %v1917_v52  ;;  %v1923_v56 = vadd.s32 %v1917_v52, %v1913_v38 }
 0x233   : > { %v1827_v48 = vxor.u32 2147483648, %v1826_v32  ;;  %v1944_v6 = vsel %vm1943_vm14, 1, %v5788_v0  ;;  %v1922_v7 = vsel %vm1921_vm1, 1, %v5788_v0  ;;  %v1920_v13 = vshrl.u32 %v1915_v8, 16 }
 0x234   : > { %v1946_v57 = vadd.s32 %v1944_v6, %v1938_v34  ;;  %vm1947_vm2 = vc.u32 %v1945_v10, %v1941_v27  ;;  %v1924_v12 = vadd.s32 %v1922_v7, %v1916_v53  ;;  %vm1925_vm4 = vc.u32 %v1923_v56, %v1919_v60 }
 0x235   : > { %v1828_v50 = vsel %vm1707_vm8, %v1827_v48, %v1826_v32  ;;  %v1948_v37 = vsel %vm1947_vm2, 1, %v5788_v0  ;;  %v1926_v14 = vsel %vm1925_vm4, 1, %v5788_v0  ;;  %v1942_v21 = vshrl.u32 %v1937_v28, 16 }
 0x236   : > { %v1831_v2 = vsel %vm7152_vm13, %v6910_v26, %v1828_v50  ;;  %v1950_v20 = vadd.s32 %v1948_v37, %v1946_v57  ;;  %v1928_v54 = vadd.s32 %v1926_v14, %v1924_v12  ;;  %v2023_v39 = vor.u32 8388608, %v7219_v40 }
 0x237   : > { %v1833_v4 = vmul.f32 %v1831_v2, %v1831_v2  ;;  %v7244_v19 = vsub.s32 32, %v2029_v63  ;;  %v1850_v29 = vand.u32 3, %v1849_v62  ;;  %v7246_v45 = vadd.s32 %v1945_v10, %v1941_v27 }
 0x238   : > { %v1951_v11 = vadd.s32 %v1950_v20, %v1940_v1  ;;  %v1929_v49 = vadd.s32 %v1928_v54, %v1918_v31  ;;  %v1953_v17 = vmul.u32 %v7156_v58, %v7223_v59  ;;  %v2032_v28 = vshll.u32 %v5789_v16, %v2029_v63 }
 0x239   : > { %v1834_v35 = vmul.f32 -0.001358992, %v1833_v4  ;;  %v1841_v3 = vmul.f32 -0.00019511016, %v1833_v4  ;;  %v2033_v40 = vshrl.u32 %v5790_v18, %v7244_v19  ;;  %v2035_v8 = vshll.u32 %v5790_v18, %v2029_v63 }
 0x23a   : > { %v1952_v5 = vadd.s32 %v1951_v11, %v1942_v21  ;;  %v7250_v32 = vadd.s32 %v1929_v49, %v1920_v13  ;;  %v2036_v62 = vshrl.u32 %v5791_v22, %v7244_v19  ;;  %v2039_v58 = vshrl.u32 %v8803_v25, %v7244_v19 }
 0x23b   : > { %v1835_v46 = vadd.f32 0.041655596, %v1834_v35  ;;  %v1842_v44 = vadd.f32 0.008332121, %v1841_v3  ;;  %v7262_v42 = vshrl.u32 %v2027_v55, 5  ;;  %v7264_v48 = vor.u32 %v2033_v40, %v2032_v28 }
 0x23c   : > { %v1956_v9 = vadd.s32 1, %v1952_v5  ;;  %vm1955_vm8 = vc.u32 %v7250_v32, %v7246_v45  ;;  %v2038_v38 = vshll.u32 %v5791_v22, %v2029_v63  ;;  %v7267_v27 = vor.u32 %v2036_v62, %v2035_v8 }
 0x23d   : > { %v1836_v51 = vmul.f32 %v1835_v46, %v1833_v4  ;;  %v1843_v47 = vmul.f32 %v1842_v44, %v1833_v4  ;;  %v2041_v10 = vshll.u32 %v8803_v25, %v2029_v63  ;;  %v2042_v50 = vshrl.u32 %v8801_v30, %v7244_v19 }
 0x23e   : > { %v1957_v59 = vsel %vm1955_vm8, %v1956_v9, %v1952_v5  ;;  %v2044_v56 = vshll.u32 %v8801_v30, %v2029_v63  ;;  %v2045_v55 = vshrl.u32 %v8800_v33, %v7244_v19  ;;  %v2040_v12 = vor.u32 %v2039_v58, %v2038_v38 }
 0x23f   : > { %v1837_v61 = vadd.f32 -0.4999988, %v1836_v51  ;;  %v1844_v34 = vadd.f32 -0.16666654, %v1843_v47  ;;  %v1958_v60 = vadd.s32 %v1957_v59, %v1953_v17  ;;  %vm1851_vm13 = vcmp.lt.s32.totalorder %v1850_v29, 2 }
 0x240   : > { %vm1852_vm5 = vcmp.eq.s32.totalorder %v1850_v29, 0  ;;  %v2046_v37 = vor.u32 %v2045_v55, %v2044_v56  ;;  %vm2050_vm6 = vcmp.lt.s32.totalorder %v7262_v42, 4  ;;  %vm2047_vm15 = vcmp.lt.s32.totalorder %v7262_v42, 1 }
 0x241   : > { %v1838_v53 = vmul.f32 %v1837_v61, %v1833_v4  ;;  %v1845_v52 = vmul.f32 %v1844_v34, %v1833_v4  ;;  %v1959_v57 = vadd.s32 536870912, %v1958_v60  ;;  %v2043_v4 = vor.u32 %v2042_v50, %v2041_v10 }
 0x242   : > { %vm2049_vm3 = vcmp.lt.s32.totalorder %v7262_v42, 3  ;;  %v2060_v35 = vsel %vm2050_vm6, %v2046_v37, 1326507024  ;;  %v2059_v63 = vsel %vm2047_vm15, %v7267_v27, %v2040_v12  ;;  %vm1855_vm9 = vcmp.eq.s32.totalorder %v1850_v29, 2 }
 0x243   : > { %v1839_v6 = vadd.f32 1.0, %v1838_v53  ;;  %v1846_v7 = vadd.f32 1.0, %v1845_v52  ;;  %v7275_v1 = vshrl.u32 %v1959_v57, 30  ;;  %v2056_v20 = vsel %vm2050_vm6, %v2043_v4, 920167782 }
 0x244   : > { %v2057_v13 = vsel %vm2049_vm3, %v2040_v12, %v2056_v20  ;;  %v2061_v21 = vsel %vm2049_vm3, %v2043_v4, %v2060_v35  ;;  %v7296_v11 = vshll.u32 %v2023_v39, 8  ;;  %vm2048_vm10 = vcmp.lt.s32.totalorder %v7262_v42, 2 }
 0x245   : > { %v1847_v31 = vmul.f32 %v1846_v7, %v1831_v2  ;;  %v1856_v14 = vxor.u32 2147483648, %v1839_v6  ;;  %v1961_v54 = vshll.u32 %v7275_v1, 30  ;;  %v2055_v2 = vsel %vm2047_vm15, %v7264_v48, %v7267_v27 }
 0x246   : > { %vm1848_vm11 = vweird.f32 %v6910_v26  ;;  %v2058_v17 = vsel %vm2048_vm10, %v2055_v2, %v2057_v13  ;;  %v2062_v51 = vsel %vm2048_vm10, %v2059_v63, %v2061_v21  ;;  %v2064_v9 = vand.u32 65535, %v7296_v11 }
 0x247   : > { %v1853_v3 = vxor.u32 2147483648, %v1847_v31  ;;  %v1857_v44 = vsel %vm1855_vm9, %v1856_v14, %v1847_v31  ;;  %v1962_v49 = vsub.s32 %v1958_v60, %v1961_v54  ;;  %v2066_v40 = vand.u32 65535, %v2062_v51 }
 0x248   : > { %v2067_v8 = vshrl.u32 %v2062_v51, 16  ;;  %v2065_v61 = vshrl.u32 %v7296_v11, 16  ;;  %v2089_v26 = vshrl.u32 %v2058_v17, 16  ;;  %v2031_v59 = vshrl.u32 %v5789_v16, %v7244_v19 }
 0x249   : > { %v1854_v46 = vsel %vm1852_vm5, %v1839_v6, %v1853_v3  ;;  %vm1963_vm14 = vcmp.lt.s32.totalorder %v1962_v49, 0  ;;  %v1964_v39 = vsub.s32 0, %v1962_v49  ;;  %v2088_v53 = vand.u32 65535, %v2058_v17 }
 0x24a   : > { %v1858_v5 = vsel %vm1851_vm13, %v1854_v46, %v1857_v44  ;;  %v2069_v58 = vmul.u32 %v2067_v8, %v2064_v9  ;;  %v2070_v38 = vmul.u32 %v2066_v40, %v2065_v61  ;;  %v1954_v52 = vadd.s32 %v7246_v45, %v7250_v32 }
 0x24b   : > { %v1859_v47 = vsel %vm1848_vm11, nan, %v1858_v5  ;;  %v1965_v62 = vsel %vm1963_vm14, %v1964_v39, %v1962_v49  ;;  %v2068_v10 = vmul.u32 %v2066_v40, %v2064_v9  ;;  %v2051_v56 = vsel %vm2047_vm15, %v2031_v59, %v7264_v48 }
 0x24c   : > { %v2957_v28 = vpack.c.bf16 %v1859_v47, %v1859_v47  ;;  %v1966_v34 = vclz %v1965_v62  ;;  %v2072_v50 = vshll.u32 %v2069_v58, 16  ;;  %v2052_v55 = vsel %vm2050_vm6, %v2040_v12, 2102212464  ;;  %v7323_v47 = vld [vmem:[%s5969_s15 + $0x8] sm:$0xff] }
 0x24d   : > { %v2071_v6 = vmul.u32 %v2067_v8, %v2065_v61  ;;  %v2091_v7 = vmul.u32 %v2089_v26, %v2064_v9  ;;  %v2074_v57 = vshll.u32 %v2070_v38, 16  ;;  %v2092_v45 = vmul.u32 %v2088_v53, %v2065_v61 }
 0x24e   : > { %v3525_v29 = vsel %vm8805_vm12, %v2957_v28, 0  ;;  %v5130_v60 = vadd.s32 4294967294, %v1966_v34  ;;  %vm2076_vm2 = vc.u32 %v2068_v10, %v2072_v50  ;;  %v2078_v19 = vadd.s32 %v2072_v50, %v2068_v10 }
 0x24f   : > { %3707 = vmatpush.bf16.msra.mxu0 %v3525_v29  ;;  %v2077_v37 = vsel %vm2076_vm2, 1, %v5788_v0  ;;  %v2094_v32 = vshll.u32 %v2091_v7, 16  ;;  %vm1862_vm4 = vcmp.lt.s32.totalorder %v7116_v23, 0  ;;  %v2090_v48 = vmul.u32 %v2088_v53, %v2064_v9 }
 0x250   : > { %vm5131_vm1 = vcmp.lt.s32.totalorder %v5130_v60, 0  ;;  %v2079_v20 = vadd.s32 %v2077_v37, %v2071_v6  ;;  %v2073_v12 = vshrl.u32 %v2069_v58, 16  ;;  %vm2080_vm8 = vc.u32 %v2078_v19, %v2074_v57 }
 0x251   : > { %v1969_v4 = vsel %vm5131_vm1, 0, %v5130_v60  ;;  %v2093_v3 = vmul.u32 %v2089_v26, %v2065_v61  ;;  %v2081_v63 = vsel %vm2080_vm8, 1, %v5788_v0  ;;  %vm2098_vm13 = vc.u32 %v2090_v48, %v2094_v32 }
 0x252   : > { %v1970_v31 = vsub.s32 32, %v1969_v4  ;;  %v1974_v14 = vsub.s32 4294967266, %v1969_v4  ;;  %v1971_v35 = vshll.u32 %v1962_v49, %v1969_v4  ;;  %v2083_v13 = vadd.s32 %v2081_v63, %v2079_v20 }
 0x253   : > { %v2096_v21 = vshll.u32 %v2092_v45, 16  ;;  %v2099_v46 = vsel %vm2098_vm13, 1, %v5788_v0  ;;  %v2100_v44 = vadd.s32 %v2094_v32, %v2090_v48  ;;  %v406_v49 = vperm.slane %v7323_v47, 3 }
 0x254   : > { %v1972_v54 = vshrl.u32 %v1954_v52, %v1970_v31  ;;  %v1975_v2 = vadd.s32 127, %v1974_v14  ;;  %v2101_v51 = vadd.s32 %v2099_v46, %v2093_v3  ;;  %v1984_v39 = vsub.s32 4, %v7275_v1 }
 0x255   : > { %v2084_v28 = vadd.s32 %v2083_v13, %v2073_v12  ;;  %vm2102_vm5 = vc.u32 %v2100_v44, %v2096_v21  ;;  %v407_v9 = vperm.slane %v7323_v47, 4  ;;  %v2075_v8 = vshrl.u32 %v2070_v38, 16 }
 0x256   : > { %v1973_v5 = vor.u32 %v1972_v54, %v1971_v35  ;;  %v1976_v17 = vshll.u32 %v1975_v2, 23  ;;  %v2103_v62 = vsel %vm2102_vm5, 1, %v5788_v0  ;;  %v438_v61 = vmul.f32 %v406_v49, %v6083_v15 }
 0x257   : > { %v2053_v26 = vsel %vm2049_vm3, %v7267_v27, %v2052_v55  ;;  %v2095_v29 = vshrl.u32 %v2091_v7, 16  ;;  %v2105_v34 = vadd.s32 %v2103_v62, %v2101_v51  ;;  %v439_v58 = vmul.f32 %v407_v9, %v6083_v15 }
 0x258   : > { %v1977_v40 = vor.u32 4788187, %v1976_v17  ;;  %v1980_v53 = vcvt.s32.f32 %v1973_v5  ;;  %v2085_v52 = vadd.s32 %v2084_v28, %v2075_v8  ;;  %v7335_v60 = vadd.f32 %v6106_v41, %v438_v61 }
 0x259   : > { %v1985_v38 = vsel %vm1862_vm4, %v1984_v39, %v7275_v1  ;;  %v2097_v10 = vshrl.u32 %v2092_v45, 16  ;;  %v2106_v50 = vadd.s32 %v2105_v34, %v2095_v29  ;;  %v7341_v6 = vadd.f32 %v6106_v41, %v439_v58 }
 0x25a   : > { %v1978_v59 = vand.u32 2147483647, %v1977_v40  ;;  %v2104_v55 = vadd.s32 %v2100_v44, %v2096_v21  ;;  %v2170_v7 = vand.u32 2147483647, %v7335_v60  ;;  %v2173_v57 = vand.u32 2139095040, %v7335_v60 }
 0x25b   : > { %v2054_v19 = vsel %vm2048_vm10, %v2051_v56, %v2053_v26  ;;  %v2107_v4 = vadd.s32 %v2106_v50, %v2097_v10  ;;  %vm1861_vm6 = vcmp.le.f32.partialorder %v1860_v36, 0.7853982  ;;  %v2328_v14 = vand.u32 2139095040, %v7341_v6 }
 0x25c   : > { %v1981_v27 = vmul.f32 %v1980_v53, %v1978_v59  ;;  %vm2110_vm15 = vc.u32 %v2085_v52, %v2104_v55  ;;  %v2174_v1 = vshrl.u32 %v2173_v57, 23  ;;  %v1987_v45 = vsel %vm1861_vm6, 0, %v1985_v38 }
 0x25d   : > { %v2111_v32 = vadd.s32 1, %v2107_v4  ;;  %v2177_v31 = vand.u32 8388607, %v2170_v7  ;;  %v2108_v42 = vmul.u32 %v7296_v11, %v2054_v19  ;;  %v2004_v12 = vadd.s32 3, %v1987_v45 }
 0x25e   : > { %v1982_v37 = vxor.u32 2147483648, %v1981_v27  ;;  %v5135_v56 = vadd.s32 4294967169, %v2174_v1  ;;  %v2329_v63 = vshrl.u32 %v2328_v14, 23  ;;  %vm2017_vm9 = vcmp.lt.s32.totalorder %v7136_v43, 0 }
 0x25f   : > { %v2112_v35 = vsel %vm2110_vm15, %v2111_v32, %v2107_v4  ;;  %v2178_v2 = vor.u32 8388608, %v2177_v31  ;;  %v7356_v51 = vand.u32 3, %v2004_v12  ;;  %v2109_v62 = vadd.s32 %v2104_v55, %v2085_v52 }
 0x260   : > { %v1983_v20 = vsel %vm1862_vm4, %v1982_v37, %v1981_v27  ;;  %v2113_v3 = vadd.s32 %v2112_v35, %v2108_v42  ;;  %v2180_v54 = vadd.s32 1, %v5135_v56  ;;  %v5138_v28 = vadd.s32 4294967169, %v2329_v63 }
 0x261   : > { %v1986_v48 = vsel %vm1861_vm6, %v7116_v23, %v1983_v20  ;;  %v7358_v39 = vshll.u32 %v2178_v2, 8  ;;  %vm2010_vm10 = vcmp.eq.s32.totalorder %v7356_v51, 2  ;;  %v2325_v58 = vand.u32 2147483647, %v7341_v6 }
 0x262   : > { %v1988_v36 = vmul.f32 %v1986_v48, %v1986_v48  ;;  %v2114_v46 = vadd.s32 536870912, %v2113_v3  ;;  %vm2181_vm3 = vcmp.gt.s32.totalorder %v2180_v54, 0  ;;  %vm2007_vm11 = vcmp.eq.s32.totalorder %v7356_v51, 0 }
 0x263   : > { %v2182_v44 = vsel %vm2181_vm3, %v2180_v54, 0  ;;  %v7369_v53 = vand.u32 65535, %v7358_v39  ;;  %v7372_v38 = vshrl.u32 %v7358_v39, 16  ;;  %v7374_v52 = vadd.s32 1, %v5138_v28 }
 0x264   : > { %v1989_v13 = vmul.f32 -0.001358992, %v1988_v36  ;;  %v1996_v21 = vmul.f32 -0.00019511016, %v1988_v36  ;;  %v2115_v11 = vshrl.u32 %v2114_v46, 30  ;;  %v2184_v49 = vand.u32 31, %v2182_v44 }
 0x265   : > { %v7366_v59 = vshrl.u32 %v2182_v44, 5  ;;  %vm2006_vm14 = vcmp.lt.s32.totalorder %v7356_v51, 2  ;;  %vm2003_vm2 = vweird.f32 %v7116_v23  ;;  %vm7392_vm4 = vcmp.le.f32.partialorder %v2015_v24, 0.7853982 }
 0x266   : > { %v1990_v5 = vadd.f32 0.041655596, %v1989_v13  ;;  %v1997_v17 = vadd.f32 0.008332121, %v1996_v21  ;;  %v2116_v8 = vshll.u32 %v2115_v11, 30  ;;  %v2185_v61 = vsub.s32 32, %v2184_v49 }
 0x267   : > { %v2139_v55 = vsub.s32 4, %v2115_v11  ;;  %v2187_v57 = vshll.u32 %v5789_v16, %v2184_v49  ;;  %v2190_v4 = vshll.u32 %v5790_v18, %v2184_v49  ;;  %v2193_v14 = vshll.u32 %v5791_v22, %v2184_v49 }
 0x268   : > { %v1991_v9 = vmul.f32 %v1990_v5, %v1988_v36  ;;  %v1998_v40 = vmul.f32 %v1997_v17, %v1988_v36  ;;  %v7362_v34 = vsub.s32 %v2113_v3, %v2116_v8  ;;  %v2188_v19 = vshrl.u32 %v5790_v18, %v2185_v61 }
 0x269   : > { %v2191_v32 = vshrl.u32 %v5791_v22, %v2185_v61  ;;  %v2194_v20 = vshrl.u32 %v8803_v25, %v2185_v61  ;;  %v2197_v42 = vshrl.u32 %v8801_v30, %v2185_v61  ;;  %v2200_v12 = vshrl.u32 %v8800_v33, %v2185_v61 }
 0x26a   : > { %v1992_v26 = vadd.f32 -0.4999988, %v1991_v9  ;;  %v1999_v29 = vadd.f32 -0.16666654, %v1998_v40  ;;  %vm2118_vm1 = vcmp.lt.s32.totalorder %v7362_v34, 0  ;;  %v2119_v27 = vsub.s32 0, %v7362_v34 }
 0x26b   : > { %v2140_v2 = vsel %vm2017_vm9, %v2139_v55, %v2115_v11  ;;  %v2186_v63 = vshrl.u32 %v5789_v16, %v2185_v61  ;;  %v2199_v13 = vshll.u32 %v8801_v30, %v2184_v49  ;;  %v2189_v21 = vor.u32 %v2188_v19, %v2187_v57 }
 0x26c   : > { %v1993_v10 = vmul.f32 %v1992_v26, %v1988_v36  ;;  %v2000_v50 = vmul.f32 %v1999_v29, %v1988_v36  ;;  %v2120_v45 = vsel %vm2118_vm1, %v2119_v27, %v7362_v34  ;;  %v2196_v36 = vshll.u32 %v8803_v25, %v2184_v49 }
 0x26d   : > { %v2121_v31 = vclz %v2120_v45  ;;  %v2192_v46 = vor.u32 %v2191_v32, %v2190_v4  ;;  %v2195_v24 = vor.u32 %v2194_v20, %v2193_v14  ;;  %v2201_v17 = vor.u32 %v2200_v12, %v2199_v13 }
 0x26e   : > { %v1994_v37 = vadd.f32 1.0, %v1993_v10  ;;  %v2001_v1 = vadd.f32 1.0, %v2000_v50  ;;  %v2198_v44 = vor.u32 %v2197_v42, %v2196_v36  ;;  %vm2336_vm13 = vcmp.gt.s32.totalorder %v7374_v52, 0 }
 0x26f   : > { %v5133_v54 = vadd.s32 4294967294, %v2121_v31  ;;  %vm2202_vm5 = vcmp.lt.s32.totalorder %v7366_v59, 1  ;;  %vm2203_vm6 = vcmp.lt.s32.totalorder %v7366_v59, 2  ;;  %vm2205_vm15 = vcmp.lt.s32.totalorder %v7366_v59, 4 }
 0x270   : > { %v2002_v56 = vmul.f32 %v2001_v1, %v1986_v48  ;;  %v2011_v35 = vxor.u32 2147483648, %v1994_v37  ;;  %vm2204_vm3 = vcmp.lt.s32.totalorder %v7366_v59, 3  ;;  %v2210_v61 = vsel %vm2202_vm5, %v2189_v21, %v2192_v46 }
 0x271   : > { %vm5134_vm8 = vcmp.lt.s32.totalorder %v5133_v54, 0  ;;  %v2211_v26 = vsel %vm2205_vm15, %v2198_v44, 920167782  ;;  %v2207_v51 = vsel %vm2205_vm15, %v2195_v24, 2102212464  ;;  %v2214_v57 = vsel %vm2202_vm5, %v2192_v46, %v2195_v24 }
 0x272   : > { %v2008_v48 = vxor.u32 2147483648, %v2002_v56  ;;  %v2012_v5 = vsel %vm2010_vm10, %v2011_v35, %v2002_v56  ;;  %v2124_v11 = vsel %vm5134_vm8, 0, %v5133_v54  ;;  %v2212_v55 = vsel %vm2204_vm3, %v2195_v24, %v2211_v26 }
 0x273   : > { %v2125_v9 = vsub.s32 32, %v2124_v11  ;;  %v2129_v40 = vsub.s32 4294967266, %v2124_v11  ;;  %v2126_v10 = vshll.u32 %v7362_v34, %v2124_v11  ;;  %v2215_v23 = vsel %vm2205_vm15, %v2201_v17, 1326507024 }
 0x274   : > { %v2009_v28 = vsel %vm2007_vm11, %v1994_v37, %v2008_v48  ;;  %v2213_v1 = vsel %vm2203_vm6, %v2210_v61, %v2212_v55  ;;  %v2216_v34 = vsel %vm2204_vm3, %v2198_v44, %v2215_v23  ;;  %v2206_v14 = vsel %vm2202_vm5, %v2186_v63, %v2189_v21 }
 0x275   : > { %v2013_v49 = vsel %vm2006_vm14, %v2009_v28, %v2012_v5  ;;  %v2127_v50 = vshrl.u32 %v2109_v62, %v2125_v9  ;;  %v2130_v27 = vadd.s32 127, %v2129_v40  ;;  %v2142_v62 = vsel %vm7392_vm4, 0, %v2140_v2 }
 0x276   : > { %v2014_v8 = vsel %vm2003_vm2, nan, %v2013_v49  ;;  %v2243_v45 = vand.u32 65535, %v2213_v1  ;;  %v2244_v32 = vshrl.u32 %v2213_v1, 16  ;;  %v2208_v20 = vsel %vm2204_vm3, %v2192_v46, %v2207_v51 }
 0x277   : > { %v2958_v29 = vpack.c.bf16 %v2014_v8, %v2014_v8  ;;  %v2128_v4 = vor.u32 %v2127_v50, %v2126_v10  ;;  %v2131_v37 = vshll.u32 %v2130_v27, 23  ;;  %v2217_v42 = vsel %vm2203_vm6, %v2214_v57, %v2216_v34 }
 0x278   : > { %v2221_v56 = vand.u32 65535, %v2217_v42  ;;  %v2222_v35 = vshrl.u32 %v2217_v42, 16  ;;  %v2246_v36 = vmul.u32 %v2244_v32, %v7369_v53  ;;  %v7436_v12 = vand.u32 8388607, %v2325_v58 }
 0x279   : > { %v3528_v19 = vsel %vm8805_vm12, %v2958_v29, 0  ;;  %v2132_v31 = vor.u32 4788187, %v2131_v37  ;;  %v2135_v2 = vcvt.s32.f32 %v2128_v4  ;;  %v7438_v13 = vadd.s32 3, %v2142_v62 }
 0x27a   : > { %3726 = vmatpush.bf16.msra.mxu1 %v3528_v19  ;;  %v2247_v63 = vmul.u32 %v2243_v45, %v7372_v38  ;;  %v7443_v48 = vsel %vm2203_vm6, %v2206_v14, %v2208_v20  ;;  %v2224_v21 = vmul.u32 %v2222_v35, %v7369_v53  ;;  %v2225_v46 = vmul.u32 %v2221_v56, %v7372_v38 }
 0x27b   : > { %v2133_v54 = vand.u32 2147483647, %v2132_v31  ;;  %v2337_v44 = vsel %vm2336_vm13, %v7374_v52, 0  ;;  %v2245_v24 = vmul.u32 %v2243_v45, %v7369_v53  ;;  %v2248_v17 = vmul.u32 %v2244_v32, %v7372_v38 }
 0x27c   : > { %v2249_v28 = vshll.u32 %v2246_v36, 16  ;;  %v2223_v11 = vmul.u32 %v2221_v56, %v7369_v53  ;;  %v2226_v59 = vmul.u32 %v2222_v35, %v7372_v38  ;;  %v2227_v49 = vshll.u32 %v2224_v21, 16 }
 0x27d   : > { %v2136_v5 = vmul.f32 %v2135_v2, %v2133_v54  ;;  %v2251_v9 = vshll.u32 %v2247_v63, 16  ;;  %v2229_v8 = vshll.u32 %v2225_v46, 16  ;;  %v2339_v29 = vand.u32 31, %v2337_v44 }
 0x27e   : > { %vm2253_vm10 = vc.u32 %v2245_v24, %v2249_v28  ;;  %v2255_v61 = vadd.s32 %v2249_v28, %v2245_v24  ;;  %vm2231_vm11 = vc.u32 %v2223_v11, %v2227_v49  ;;  %v2233_v26 = vadd.s32 %v2227_v49, %v2223_v11 }
 0x27f   : > { %v2137_v40 = vxor.u32 2147483648, %v2136_v5  ;;  %v2254_v52 = vsel %vm2253_vm10, 1, %v5788_v0  ;;  %v2232_v50 = vsel %vm2231_vm11, 1, %v5788_v0  ;;  %v2250_v23 = vshrl.u32 %v2246_v36, 16 }
 0x280   : > { %v2256_v27 = vadd.s32 %v2254_v52, %v2248_v17  ;;  %vm2257_vm14 = vc.u32 %v2255_v61, %v2251_v9  ;;  %v2234_v38 = vadd.s32 %v2232_v50, %v2226_v59  ;;  %vm2235_vm1 = vc.u32 %v2233_v26, %v2229_v8 }
 0x281   : > { %v2138_v10 = vsel %vm2017_vm9, %v2137_v40, %v2136_v5  ;;  %v2258_v51 = vsel %vm2257_vm14, 1, %v5788_v0  ;;  %v2236_v57 = vsel %vm2235_vm1, 1, %v5788_v0  ;;  %v2228_v4 = vshrl.u32 %v2224_v21, 16 }
 0x282   : > { %v2141_v53 = vsel %vm7392_vm4, %v7136_v43, %v2138_v10  ;;  %v2260_v19 = vadd.s32 %v2258_v51, %v2256_v27  ;;  %v2238_v37 = vadd.s32 %v2236_v57, %v2234_v38  ;;  %v2263_v1 = vmul.u32 %v7358_v39, %v7443_v48 }
 0x283   : > { %v2143_v55 = vmul.f32 %v2141_v53, %v2141_v53  ;;  %v7465_v62 = vsub.s32 32, %v2339_v29  ;;  %v2252_v3 = vshrl.u32 %v2247_v63, 16  ;;  %v2230_v31 = vshrl.u32 %v2225_v46, 16 }
 0x284   : > { %v2261_v32 = vadd.s32 %v2260_v19, %v2250_v23  ;;  %v2239_v14 = vadd.s32 %v2238_v37, %v2228_v4  ;;  %v7467_v20 = vadd.s32 %v2255_v61, %v2251_v9  ;;  %v7469_v42 = vshrl.u32 %v2337_v44, 5 }
 0x285   : > { %v2144_v34 = vmul.f32 -0.001358992, %v2143_v55  ;;  %v2151_v45 = vmul.f32 -0.00019511016, %v2143_v55  ;;  %v2342_v54 = vshll.u32 %v5789_v16, %v2339_v29  ;;  %v2343_v39 = vshrl.u32 %v5790_v18, %v7465_v62 }
 0x286   : > { %v2262_v36 = vadd.s32 %v2261_v32, %v2252_v3  ;;  %v7472_v2 = vadd.s32 %v2239_v14, %v2230_v31  ;;  %v2345_v48 = vshll.u32 %v5790_v18, %v2339_v29  ;;  %v2346_v63 = vshrl.u32 %v5791_v22, %v7465_v62 }
 0x287   : > { %v2145_v56 = vadd.f32 0.041655596, %v2144_v34  ;;  %v2152_v35 = vadd.f32 0.008332121, %v2151_v45  ;;  %v2349_v44 = vshrl.u32 %v8803_v25, %v7465_v62  ;;  %v2348_v24 = vshll.u32 %v5791_v22, %v2339_v29 }
 0x288   : > { %v2266_v5 = vadd.s32 1, %v2262_v36  ;;  %vm2265_vm9 = vc.u32 %v7472_v2, %v7467_v20  ;;  %v2351_v17 = vshll.u32 %v8803_v25, %v2339_v29  ;;  %v2352_v28 = vshrl.u32 %v8801_v30, %v7465_v62 }
 0x289   : > { %v2146_v21 = vmul.f32 %v2145_v56, %v2143_v55  ;;  %v2153_v46 = vmul.f32 %v2152_v35, %v2143_v55  ;;  %v2355_v9 = vshrl.u32 %v8800_v33, %v7465_v62  ;;  %v7489_v8 = vor.u32 %v2343_v39, %v2342_v54 }
 0x28a   : > { %v2267_v49 = vsel %vm2265_vm9, %v2266_v5, %v2262_v36  ;;  %v2353_v61 = vor.u32 %v2352_v28, %v2351_v17  ;;  %v2354_v26 = vshll.u32 %v8801_v30, %v2339_v29  ;;  %v7492_v50 = vor.u32 %v2346_v63, %v2345_v48 }
 0x28b   : > { %v2147_v11 = vadd.f32 -0.4999988, %v2146_v21  ;;  %v2154_v59 = vadd.f32 -0.16666654, %v2153_v46  ;;  %v2268_v40 = vadd.s32 %v2267_v49, %v2263_v1  ;;  %v2350_v27 = vor.u32 %v2349_v44, %v2348_v24 }
 0x28c   : > { %v2333_v51 = vor.u32 8388608, %v7436_v12  ;;  %v2356_v57 = vor.u32 %v2355_v9, %v2354_v26  ;;  %vm2360_vm2 = vcmp.lt.s32.totalorder %v7469_v42, 4  ;;  %v2160_v4 = vand.u32 3, %v7438_v13 }
 0x28d   : > { %v2148_v52 = vmul.f32 %v2147_v11, %v2143_v55  ;;  %v2155_v10 = vmul.f32 %v2154_v59, %v2143_v55  ;;  %v2269_v38 = vadd.s32 536870912, %v2268_v40  ;;  %v2366_v37 = vsel %vm2360_vm2, %v2353_v61, 920167782 }
 0x28e   : > { %vm2158_vm4 = vweird.f32 %v7136_v43  ;;  %vm2357_vm8 = vcmp.lt.s32.totalorder %v7469_v42, 1  ;;  %vm2359_vm13 = vcmp.lt.s32.totalorder %v7469_v42, 3  ;;  %v2370_v3 = vsel %vm2360_vm2, %v2356_v57, 1326507024 }
 0x28f   : > { %v2149_v23 = vadd.f32 1.0, %v2148_v52  ;;  %v2156_v19 = vadd.f32 1.0, %v2155_v10  ;;  %v7500_v29 = vshrl.u32 %v2269_v38, 30  ;;  %v2365_v1 = vsel %vm2357_vm8, %v7489_v8, %v7492_v50 }
 0x290   : > { %v2369_v13 = vsel %vm2357_vm8, %v7492_v50, %v2350_v27  ;;  %v2367_v45 = vsel %vm2359_vm13, %v2350_v27, %v2366_v37  ;;  %v7516_v32 = vshll.u32 %v2333_v51, 8  ;;  %vm2161_vm5 = vcmp.lt.s32.totalorder %v2160_v4, 2 }
 0x291   : > { %v2157_v55 = vmul.f32 %v2156_v19, %v2141_v53  ;;  %v2166_v12 = vxor.u32 2147483648, %v2149_v23  ;;  %v2271_v34 = vshll.u32 %v7500_v29, 30  ;;  %vm2358_vm6 = vcmp.lt.s32.totalorder %v7469_v42, 2 }
 0x292   : > { %v2371_v31 = vsel %vm2359_vm13, %v2353_v61, %v2370_v3  ;;  %vm2162_vm15 = vcmp.eq.s32.totalorder %v2160_v4, 0  ;;  %vm2165_vm3 = vcmp.eq.s32.totalorder %v2160_v4, 2  ;;  %v2368_v54 = vsel %vm2358_vm6, %v2365_v1, %v2367_v45 }
 0x293   : > { %v2163_v53 = vxor.u32 2147483648, %v2157_v55  ;;  %v2272_v14 = vsub.s32 %v2268_v40, %v2271_v34  ;;  %v2372_v56 = vsel %vm2358_vm6, %v2369_v13, %v2371_v31  ;;  %v2167_v36 = vsel %vm2165_vm3, %v2166_v12, %v2157_v55 }
 0x294   : > { %v2376_v39 = vand.u32 65535, %v2372_v56  ;;  %v2375_v21 = vshrl.u32 %v7516_v32, 16  ;;  %v2374_v5 = vand.u32 65535, %v7516_v32  ;;  %v2377_v44 = vshrl.u32 %v2372_v56, 16 }
 0x295   : > { %v2164_v35 = vsel %vm2162_vm15, %v2149_v23, %v2163_v53  ;;  %vm2273_vm10 = vcmp.lt.s32.totalorder %v2272_v14, 0  ;;  %v2274_v63 = vsub.s32 0, %v2272_v14  ;;  %v2399_v11 = vshrl.u32 %v2368_v54, 16 }
 0x296   : > { %v2168_v48 = vsel %vm2161_vm5, %v2164_v35, %v2167_v36  ;;  %v2380_v28 = vmul.u32 %v2376_v39, %v2375_v21  ;;  %v2379_v49 = vmul.u32 %v2377_v44, %v2374_v5  ;;  %v2398_v9 = vand.u32 65535, %v2368_v54 }
 0x297   : > { %v2169_v46 = vsel %vm2158_vm4, nan, %v2168_v48  ;;  %v2275_v17 = vsel %vm2273_vm10, %v2274_v63, %v2272_v14  ;;  %v2341_v61 = vshrl.u32 %v5789_v16, %v7465_v62  ;;  %v2264_v43 = vadd.s32 %v7467_v20, %v7472_v2 }
 0x298   : > { %v2959_v24 = vpack.c.bf16 %v2169_v46, %v2169_v46  ;;  %v2276_v59 = vclz %v2275_v17  ;;  %v2378_v52 = vmul.u32 %v2376_v39, %v2374_v5  ;;  %v2382_v10 = vshll.u32 %v2379_v49, 16 }
 0x299   : > { %v2362_v38 = vsel %vm2360_vm2, %v2350_v27, 2102212464  ;;  %v2381_v51 = vmul.u32 %v2377_v44, %v2375_v21  ;;  %v2384_v57 = vshll.u32 %v2380_v28, 16  ;;  %v2401_v23 = vmul.u32 %v2399_v11, %v2374_v5 }
 0x29a   : > { %v3531_v40 = vsel %vm8805_vm12, %v2959_v24, 0  ;;  %v5136_v26 = vadd.s32 4294967294, %v2276_v59  ;;  %vm2386_vm14 = vc.u32 %v2378_v52, %v2382_v10  ;;  %v2388_v19 = vadd.s32 %v2382_v10, %v2378_v52 }
 0x29b   : > { %3745 = vmatpush.bf16.msra.mxu2 %v3531_v40  ;;  %v2400_v4 = vmul.u32 %v2398_v9, %v2374_v5  ;;  %v2387_v62 = vsel %vm2386_vm14, 1, %v5788_v0  ;;  %v2402_v55 = vmul.u32 %v2398_v9, %v2375_v21  ;;  %v2404_v12 = vshll.u32 %v2401_v23, 16 }
 0x29c   : > { %vm5137_vm11 = vcmp.lt.s32.totalorder %v5136_v26, 0  ;;  %vm2172_vm1 = vcmp.lt.s32.totalorder %v7335_v60, 0  ;;  %v2383_v1 = vshrl.u32 %v2379_v49, 16  ;;  %v2389_v13 = vadd.s32 %v2387_v62, %v2381_v51 }
 0x29d   : > { %v2279_v37 = vsel %vm5137_vm11, 0, %v5136_v26  ;;  %vm2390_vm9 = vc.u32 %v2388_v19, %v2384_v57  ;;  %v2403_v27 = vmul.u32 %v2399_v11, %v2375_v21  ;;  %vm2408_vm2 = vc.u32 %v2400_v4, %v2404_v12 }
 0x29e   : > { %v2280_v20 = vsub.s32 32, %v2279_v37  ;;  %v2284_v2 = vsub.s32 4294967266, %v2279_v37  ;;  %v2281_v34 = vshll.u32 %v2272_v14, %v2279_v37  ;;  %v2391_v53 = vsel %vm2390_vm9, 1, %v5788_v0 }
 0x29f   : > { %v2409_v31 = vsel %vm2408_vm2, 1, %v5788_v0  ;;  %v2393_v56 = vadd.s32 %v2391_v53, %v2389_v13  ;;  %v2406_v35 = vshll.u32 %v2402_v55, 16  ;;  %v2410_v36 = vadd.s32 %v2404_v12, %v2400_v4 }
 0x2a0   : > { %v2282_v45 = vshrl.u32 %v2264_v43, %v2280_v20  ;;  %v2285_v3 = vadd.s32 127, %v2284_v2  ;;  %v2411_v54 = vadd.s32 %v2409_v31, %v2403_v27  ;;  %v408_v63 = vperm.slane %v7323_v47, 5 }
 0x2a1   : > { %v409_v46 = vperm.slane %v7323_v47, 6  ;;  %v2294_v14 = vsub.s32 4, %v7500_v29  ;;  %v2361_v21 = vsel %vm2357_vm8, %v2341_v61, %v7489_v8  ;;  %v2394_v5 = vadd.s32 %v2393_v56, %v2383_v1  ;;  %v7555_v8 = vld [vmem:[%s8788_s4 + $0x8] sm:$0xff] }
 0x2a2   : > { %v2283_v39 = vor.u32 %v2282_v45, %v2281_v34  ;;  %v2286_v48 = vshll.u32 %v2285_v3, 23  ;;  %vm2412_vm4 = vc.u32 %v2410_v36, %v2406_v35  ;;  %v2385_v24 = vshrl.u32 %v2380_v28, 16  ;;  %5327 = vmatmul.msk.bf16.gmra.mxu0 %vm3492_vm7, %v7555_v8  ;;  %5329 = vmatmul.msk.bf16.gmra.mxu1 %vm3492_vm7, %v7555_v8 }
 0x2a3   : > { %v2413_v17 = vsel %vm2412_vm4, 1, %v5788_v0  ;;  %v440_v11 = vmul.f32 %v408_v63, %v6083_v15  ;;  %v2363_v59 = vsel %vm2359_vm13, %v7492_v50, %v2362_v38  ;;  %v2405_v49 = vshrl.u32 %v2401_v23, 16  ;;  %5331 = vmatmul.msk.bf16.gmra.mxu2 %vm3492_vm7, %v7555_v8  ;;  %5333 = vmatmul.msk.bf16.gmra.mxu3 %vm3492_vm7, %v7555_v8 }
 0x2a4   : > { %v2287_v44 = vor.u32 4788187, %v2286_v48  ;;  %v2415_v47 = vadd.s32 %v2413_v17, %v2411_v54  ;;  %v441_v9 = vmul.f32 %v409_v46, %v6083_v15  ;;  %v2290_v43 = vcvt.s32.f32 %v2283_v39 }
 0x2a5   : > { %v2395_v28 = vadd.s32 %v2394_v5, %v2385_v24  ;;  %v7558_v61 = vadd.f32 %v6106_v41, %v440_v11  ;;  %v2295_v26 = vsel %vm2172_vm1, %v2294_v14, %v7500_v29  ;;  %v2407_v50 = vshrl.u32 %v2402_v55, 16 }
 0x2a6   : > { %v2288_v40 = vand.u32 2147483647, %v2287_v44  ;;  %v2416_v52 = vadd.s32 %v2415_v47, %v2405_v49  ;;  %v7564_v10 = vadd.f32 %v6106_v41, %v441_v9  ;;  %v2414_v51 = vadd.s32 %v2410_v36, %v2406_v35 }
 0x2a7   : > { %v2480_v57 = vand.u32 2147483647, %v7558_v61  ;;  %v2483_v23 = vand.u32 2139095040, %v7558_v61  ;;  %v2364_v29 = vsel %vm2358_vm6, %v2361_v21, %v2363_v59  ;;  %vm2171_vm8 = vcmp.le.f32.partialorder %v2170_v7, 0.7853982 }
 0x2a8   : > { %v2291_v38 = vmul.f32 %v2290_v43, %v2288_v40  ;;  %v2417_v19 = vadd.s32 %v2416_v52, %v2407_v50  ;;  %vm2420_vm13 = vc.u32 %v2395_v28, %v2414_v51  ;;  %v2297_v62 = vsel %vm2171_vm8, 0, %v2295_v26 }
 0x2a9   : > { %v2484_v37 = vshrl.u32 %v2483_v23, 23  ;;  %v2487_v12 = vand.u32 8388607, %v2480_v57  ;;  %v2638_v20 = vand.u32 2139095040, %v7564_v10  ;;  %v2418_v42 = vmul.u32 %v7516_v32, %v2364_v29 }
 0x2aa   : > { %v2292_v4 = vxor.u32 2147483648, %v2291_v38  ;;  %v2421_v55 = vadd.s32 1, %v2417_v19  ;;  %v2314_v27 = vadd.s32 3, %v2297_v62  ;;  %vm2327_vm6 = vcmp.lt.s32.totalorder %v7341_v6, 0 }
 0x2ab   : > { %v5141_v1 = vadd.s32 4294967169, %v2484_v37  ;;  %v2488_v53 = vor.u32 8388608, %v2487_v12  ;;  %v2639_v31 = vshrl.u32 %v2638_v20, 23  ;;  %v7592_v17 = vadd.s32 %v2414_v51, %v2395_v28 }
 0x2ac   : > { %v2293_v2 = vsel %vm2172_vm1, %v2292_v4, %v2291_v38  ;;  %v2422_v34 = vsel %vm2420_vm13, %v2421_v55, %v2417_v19  ;;  %v7587_v63 = vand.u32 3, %v2314_v27  ;;  %v8799_v9 = vand.u32 2147483647, %v7564_v10  ;;  %v7613_v38 = vld [vmem:[%s8788_s4] sm:$0xff] }
 0x2ad   : > { %v2296_v13 = vsel %vm2171_vm8, %v7335_v60, %v2293_v2  ;;  %v2423_v45 = vadd.s32 %v2422_v34, %v2418_v42  ;;  %v2490_v3 = vadd.s32 1, %v5141_v1  ;;  %v7589_v14 = vshll.u32 %v2488_v53, 8 }
 0x2ae   : > { %v2298_v7 = vmul.f32 %v2296_v13, %v2296_v13  ;;  %v5144_v21 = vadd.s32 4294967169, %v2639_v31  ;;  %vm2320_vm15 = vcmp.eq.s32.totalorder %v7587_v63, 2  ;;  %vm2317_vm3 = vcmp.eq.s32.totalorder %v7587_v63, 0 }
 0x2af   : > { %v2424_v36 = vadd.s32 536870912, %v2423_v45  ;;  %vm2491_vm5 = vcmp.gt.s32.totalorder %v2490_v3, 0  ;;  %v7602_v43 = vand.u32 65535, %v7589_v14  ;;  %v7605_v26 = vshrl.u32 %v7589_v14, 16 }
 0x2b0   : > { %v2299_v56 = vmul.f32 -0.001358992, %v2298_v7  ;;  %v2306_v35 = vmul.f32 -0.00019511016, %v2298_v7  ;;  %v2492_v54 = vsel %vm2491_vm5, %v2490_v3, 0  ;;  %v7607_v28 = vadd.s32 1, %v5144_v21 }
 0x2b1   : > { %v2425_v32 = vshrl.u32 %v2424_v36, 30  ;;  %v2494_v46 = vand.u32 31, %v2492_v54  ;;  %v7599_v40 = vshrl.u32 %v2492_v54, 5  ;;  %vm2316_vm10 = vcmp.lt.s32.totalorder %v7587_v63, 2 }
 0x2b2   : > { %v2300_v39 = vadd.f32 0.041655596, %v2299_v56  ;;  %v2307_v48 = vadd.f32 0.008332121, %v2306_v35  ;;  %5334 = vmatmul.msk.bf16.vlgmr.msrb.gmra.mxu0 %vm3492_vm7, %v7613_v38  ;;  %5336 = vmatmul.msk.bf16.vlgmr.msrb.gmra.mxu1 %vm3492_vm7, %v7613_v38  ;;  %vm2313_vm14 = vweird.f32 %v7335_v60  ;;  %vm7638_vm1 = vcmp.le.f32.partialorder %v2325_v58, 0.7853982 }
 0x2b3   : > { %v2426_v24 = vshll.u32 %v2425_v32, 30  ;;  %v2495_v11 = vsub.s32 32, %v2494_v46  ;;  %5338 = vmatmul.msk.bf16.vlgmr.msrb.gmra.mxu2 %vm3492_vm7, %v7613_v38  ;;  %5340 = vmatmul.msk.bf16.vlgmr.msrb.gmra.mxu3 %vm3492_vm7, %v7613_v38  ;;  %v2449_v23 = vsub.s32 4, %v2425_v32  ;;  %v2497_v29 = vshll.u32 %v5789_v16, %v2494_v46 }
 0x2b4   : > { %v2301_v5 = vmul.f32 %v2300_v39, %v2298_v7  ;;  %v2308_v44 = vmul.f32 %v2307_v48, %v2298_v7  ;;  %v2500_v4 = vshll.u32 %v5790_v18, %v2494_v46  ;;  %v2503_v2 = vshll.u32 %v5791_v22, %v2494_v46 }
 0x2b5   : > { %v7595_v47 = vsub.s32 %v2423_v45, %v2426_v24  ;;  %v2498_v19 = vshrl.u32 %v5790_v18, %v2495_v11  ;;  %v2501_v12 = vshrl.u32 %v5791_v22, %v2495_v11  ;;  %v2504_v42 = vshrl.u32 %v8803_v25, %v2495_v11 }
 0x2b6   : > { %v2302_v59 = vadd.f32 -0.4999988, %v2301_v5  ;;  %v2309_v49 = vadd.f32 -0.16666654, %v2308_v44  ;;  %v2507_v1 = vshrl.u32 %v8801_v30, %v2495_v11  ;;  %v2506_v27 = vshll.u32 %v8803_v25, %v2494_v46 }
 0x2b7   : > { %vm2428_vm11 = vcmp.lt.s32.totalorder %v7595_v47, 0  ;;  %v2429_v51 = vsub.s32 0, %v7595_v47  ;;  %v2510_v45 = vshrl.u32 %v8800_v33, %v2495_v11  ;;  %v2450_v31 = vsel %vm2327_vm6, %v2449_v23, %v2425_v32 }
 0x2b8   : > { %v2303_v50 = vmul.f32 %v2302_v59, %v2298_v7  ;;  %v2310_v52 = vmul.f32 %v2309_v49, %v2298_v7  ;;  %v2496_v56 = vshrl.u32 %v5789_v16, %v2495_v11  ;;  %v2509_v35 = vshll.u32 %v8801_v30, %v2494_v46 }
 0x2b9   : > { %v2430_v55 = vsel %vm2428_vm11, %v2429_v51, %v7595_v47  ;;  %v2499_v36 = vor.u32 %v2498_v19, %v2497_v29  ;;  %v2502_v54 = vor.u32 %v2501_v12, %v2500_v4  ;;  %v2508_v39 = vor.u32 %v2507_v1, %v2506_v27 }
 0x2ba   : > { %v2304_v37 = vadd.f32 1.0, %v2303_v50  ;;  %v2311_v62 = vadd.f32 1.0, %v2310_v52  ;;  %v2431_v20 = vclz %v2430_v55  ;;  %v2505_v58 = vor.u32 %v2504_v42, %v2503_v2 }
 0x2bb   : > { %v2511_v21 = vor.u32 %v2510_v45, %v2509_v35  ;;  %vm2646_vm2 = vcmp.gt.s32.totalorder %v7607_v28, 0  ;;  %vm2512_vm4 = vcmp.lt.s32.totalorder %v7599_v40, 1  ;;  %vm2513_vm8 = vcmp.lt.s32.totalorder %v7599_v40, 2 }
 0x2bc   : > { %v2312_v34 = vmul.f32 %v2311_v62, %v2296_v13  ;;  %v2321_v7 = vxor.u32 2147483648, %v2304_v37  ;;  %v5139_v53 = vadd.s32 4294967294, %v2431_v20  ;;  %vm2515_vm13 = vcmp.lt.s32.totalorder %v7599_v40, 4 }
 0x2bd   : > { %vm2514_vm5 = vcmp.lt.s32.totalorder %v7599_v40, 3  ;;  %v2520_v59 = vsel %vm2512_vm4, %v2499_v36, %v2502_v54  ;;  %v2521_v49 = vsel %vm2515_vm13, %v2508_v39, 920167782  ;;  %v2517_v23 = vsel %vm2515_vm13, %v2505_v58, 2102212464 }
 0x2be   : > { %v2318_v13 = vxor.u32 2147483648, %v2312_v34  ;;  %v2322_v48 = vsel %vm2320_vm15, %v2321_v7, %v2312_v34  ;;  %vm5140_vm9 = vcmp.lt.s32.totalorder %v5139_v53, 0  ;;  %v2522_v29 = vsel %vm2514_vm5, %v2505_v58, %v2521_v49 }
 0x2bf   : > { %v2434_v32 = vsel %vm5140_vm9, 0, %v5139_v53  ;;  %v2524_v60 = vsel %vm2512_vm4, %v2502_v54, %v2505_v58  ;;  %v2525_v19 = vsel %vm2515_vm13, %v2511_v21, 1326507024  ;;  %v2523_v55 = vsel %vm2513_vm8, %v2520_v59, %v2522_v29  ;;  %v7707_v21 = vpop.f32.mrf.mxu1 }
 0x2c0   : > { %v2319_v5 = vsel %vm2317_vm3, %v2304_v37, %v2318_v13  ;;  %v2435_v44 = vsub.s32 32, %v2434_v32  ;;  %v2439_v24 = vsub.s32 4294967266, %v2434_v32  ;;  %v2436_v52 = vshll.u32 %v7595_v47, %v2434_v32 }
 0x2c1   : > { %v2323_v46 = vsel %vm2316_vm10, %v2319_v5, %v2322_v48  ;;  %v2526_v47 = vsel %vm2514_vm5, %v2508_v39, %v2525_v19  ;;  %v2553_v12 = vand.u32 65535, %v2523_v55  ;;  %v2554_v20 = vshrl.u32 %v2523_v55, 16 }
 0x2c2   : > { %v2324_v11 = vsel %vm2313_vm14, nan, %v2323_v46  ;;  %v2437_v51 = vshrl.u32 %v7592_v17, %v2435_v44  ;;  %v2440_v63 = vadd.s32 127, %v2439_v24  ;;  %v2452_v17 = vsel %vm7638_vm1, 0, %v2450_v31  ;;  %5335 = vmatmul.msk.bf16.gmra.mxu0 %vm3492_vm7, %v7555_v8  ;;  %5337 = vmatmul.msk.bf16.gmra.mxu1 %vm3492_vm7, %v7555_v8  ;;  %v7711_v24 = vpop.f32.mrf.mxu2 }
 0x2c3   : > { %v2960_v50 = vpack.c.bf16 %v2324_v11, %v2324_v11  ;;  %v2516_v42 = vsel %vm2512_vm4, %v2496_v56, %v2499_v36  ;;  %v2518_v1 = vsel %vm2514_vm5, %v2502_v54, %v2517_v23  ;;  %v2527_v34 = vsel %vm2513_vm8, %v2524_v60, %v2526_v47  ;;  %5339 = vmatmul.msk.bf16.gmra.mxu2 %vm3492_vm7, %v7555_v8  ;;  %v7696_v36 = vpop.f32.mrf.mxu0 }
 0x2c4   : > { %v2438_v37 = vor.u32 %v2437_v51, %v2436_v52  ;;  %v2441_v62 = vshll.u32 %v2440_v63, 23  ;;  %v2531_v7 = vand.u32 65535, %v2527_v34  ;;  %v2532_v27 = vshrl.u32 %v2527_v34, 16  ;;  %5341 = vmatmul.msk.bf16.gmra.mxu3 %vm3492_vm7, %v7555_v8 }
 0x2c5   : > { %v3534_v4 = vsel %vm8805_vm12, %v2960_v50, 0  ;;  %v2556_v45 = vmul.u32 %v2554_v20, %v7602_v43  ;;  %v7683_v53 = vand.u32 8388607, %v8799_v9  ;;  %v7689_v35 = vadd.s32 3, %v2452_v17  ;;  %v7715_v50 = vpop.f32.mrf.mxu3 }
 0x2c6   : > { %3764 = vmatpush.bf16.msra.mxu3 %v3534_v4  ;;  %v2442_v2 = vor.u32 4788187, %v2441_v62  ;;  %v2445_v56 = vcvt.s32.f32 %v2438_v37  ;;  %v2557_v13 = vmul.u32 %v2553_v12, %v7605_v26  ;;  %v7700_v54 = vsel %vm2513_vm8, %v2516_v42, %v2518_v1 }
 0x2c7   : > { %v2534_v39 = vmul.u32 %v2532_v27, %v7602_v43  ;;  %v2535_v48 = vmul.u32 %v2531_v7, %v7605_v26  ;;  %v2647_v58 = vsel %vm2646_vm2, %v7607_v28, 0  ;;  %v2555_v32 = vmul.u32 %v2553_v12, %v7602_v43 }
 0x2c8   : > { %v2443_v31 = vand.u32 2147483647, %v2442_v2  ;;  %v2558_v46 = vmul.u32 %v2554_v20, %v7605_v26  ;;  %v2559_v44 = vshll.u32 %v2556_v45, 16  ;;  %v2533_v40 = vmul.u32 %v2531_v7, %v7602_v43 }
 0x2c9   : > { %v2536_v11 = vmul.u32 %v2532_v27, %v7605_v26  ;;  %v2537_v59 = vshll.u32 %v2534_v39, 16  ;;  %v2561_v49 = vshll.u32 %v2557_v13, 16  ;;  %v2539_v28 = vshll.u32 %v2535_v48, 16 }
 0x2ca   : > { %v2446_v5 = vmul.f32 %v2445_v56, %v2443_v31  ;;  %vm2563_vm15 = vc.u32 %v2555_v32, %v2559_v44  ;;  %v2565_v51 = vadd.s32 %v2559_v44, %v2555_v32  ;;  %v2649_v29 = vand.u32 31, %v2647_v58 }
 0x2cb   : > { %vm2541_vm3 = vc.u32 %v2533_v40, %v2537_v59  ;;  %v2543_v63 = vadd.s32 %v2537_v59, %v2533_v40  ;;  %v2564_v23 = vsel %vm2563_vm15, 1, %v5788_v0  ;;  %v2560_v17 = vshrl.u32 %v2556_v45, 16  ;;  %v7734_v27 = vpop.f32.mrf.mxu0  ;;  %v7740_v45 = vpop.f32.mrf.mxu1 }
 0x2cc   : > { %v2447_v52 = vxor.u32 2147483648, %v2446_v5  ;;  %v2542_v43 = vsel %vm2541_vm3, 1, %v5788_v0  ;;  %v2566_v19 = vadd.s32 %v2564_v23, %v2558_v46  ;;  %vm2567_vm10 = vc.u32 %v2565_v51, %v2561_v49 }
 0x2cd   : > { %v2544_v4 = vadd.s32 %v2542_v43, %v2536_v11  ;;  %vm2545_vm11 = vc.u32 %v2543_v63, %v2539_v28  ;;  %v2568_v37 = vsel %vm2567_vm10, 1, %v5788_v0  ;;  %v2538_v12 = vshrl.u32 %v2534_v39, 16  ;;  %v7752_v11 = vpop.f32.mrf.mxu3 }
 0x2ce   : > { %v2448_v60 = vsel %vm2327_vm6, %v2447_v52, %v2446_v5  ;;  %v2546_v55 = vsel %vm2545_vm11, 1, %v5788_v0  ;;  %v2570_v47 = vadd.s32 %v2568_v37, %v2566_v19  ;;  %v2573_v2 = vmul.u32 %v7589_v14, %v7700_v54  ;;  %v7743_v54 = vpop.f32.mrf.mxu2 }
 0x2cf   : > { %v7724_v26 = vsel %vm7638_vm1, %v7341_v6, %v2448_v60  ;;  %v2548_v20 = vadd.s32 %v2546_v55, %v2544_v4  ;;  %v7732_v42 = vsub.s32 32, %v2649_v29  ;;  %v2562_v34 = vshrl.u32 %v2557_v13, 16 }
 0x2d0   : > { %v2453_v62 = vmul.f32 %v7724_v26, %v7724_v26  ;;  %v2571_v7 = vadd.s32 %v2570_v47, %v2560_v17  ;;  %v2540_v31 = vshrl.u32 %v2535_v48, 16  ;;  %v7736_v5 = vadd.s32 %v2565_v51, %v2561_v49 }
 0x2d1   : > { %v2549_v56 = vadd.s32 %v2548_v20, %v2538_v12  ;;  %v7738_v32 = vshrl.u32 %v2647_v58, 5  ;;  %v2652_v14 = vshll.u32 %v5789_v16, %v2649_v29  ;;  %v2653_v13 = vshrl.u32 %v5790_v18, %v7732_v42 }
 0x2d2   : > { %v2454_v3 = vmul.f32 -0.001358992, %v2453_v62  ;;  %v2461_v1 = vmul.f32 -0.00019511016, %v2453_v62  ;;  %v2572_v44 = vadd.s32 %v2571_v7, %v2562_v34  ;;  %v2655_v48 = vshll.u32 %v5790_v18, %v2649_v29  ;;  %5342 = vmatmul.msk.bf16.vlgmr.msra.gmra.mxu0 %vm3492_vm7, %v7613_v38  ;;  %5344 = vmatmul.msk.bf16.vlgmr.msra.gmra.mxu1 %vm3492_vm7, %v7613_v38 }
 0x2d3   : > { %v7745_v40 = vadd.s32 %v2549_v56, %v2540_v31  ;;  %v2656_v58 = vshrl.u32 %v5791_v22, %v7732_v42  ;;  %v2659_v28 = vshrl.u32 %v8803_v25, %v7732_v42  ;;  %v2658_v51 = vshll.u32 %v5791_v22, %v2649_v29  ;;  %5346 = vmatmul.msk.bf16.vlgmr.msra.gmra.mxu2 %vm3492_vm7, %v7613_v38 }
 0x2d4   : > { %v2455_v39 = vadd.f32 0.041655596, %v2454_v3  ;;  %v2462_v46 = vadd.f32 0.008332121, %v2461_v1  ;;  %v2576_v52 = vadd.s32 1, %v2572_v44  ;;  %v2661_v63 = vshll.u32 %v8803_v25, %v2649_v29  ;;  %5348 = vmatmul.msk.bf16.vlgmr.msra.gmra.mxu3 %vm3492_vm7, %v7613_v38 }
 0x2d5   : > { %vm2575_vm6 = vc.u32 %v7745_v40, %v7736_v5  ;;  %v2662_v23 = vshrl.u32 %v8801_v30, %v7732_v42  ;;  %v2665_v4 = vshrl.u32 %v8800_v33, %v7732_v42  ;;  %v7770_v55 = vor.u32 %v2653_v13, %v2652_v14 }
 0x2d6   : > { %v2456_v59 = vmul.f32 %v2455_v39, %v2453_v62  ;;  %v2463_v49 = vmul.f32 %v2462_v46, %v2453_v62  ;;  %v2577_v19 = vsel %vm2575_vm6, %v2576_v52, %v2572_v44  ;;  %v2664_v47 = vshll.u32 %v8801_v30, %v2649_v29  ;;  %v7784_v46 = vpop.f32.mrf.mxu0  ;;  %v7812_v52 = vpop.f32.mrf.mxu3 }
 0x2d7   : > { %v2578_v37 = vadd.s32 %v2577_v19, %v2573_v2  ;;  %v2663_v17 = vor.u32 %v2662_v23, %v2661_v63  ;;  %v7775_v3 = vor.u32 %v2656_v58, %v2655_v48  ;;  %v7777_v1 = vor.u32 %v2659_v28, %v2658_v51  ;;  %v7802_v48 = vpop.f32.mrf.mxu2 }
 0x2d8   : > { %v2457_v60 = vadd.f32 -0.4999988, %v2456_v59  ;;  %v2464_v43 = vadd.f32 -0.16666654, %v2463_v49  ;;  %v2643_v7 = vor.u32 8388608, %v7683_v53  ;;  %v2666_v31 = vor.u32 %v2665_v4, %v2664_v47  ;;  %v7791_v53 = vpop.f32.mrf.mxu1 }
 0x2d9   : > { %v2579_v34 = vadd.s32 536870912, %v2578_v37  ;;  %vm2670_vm14 = vcmp.lt.s32.totalorder %v7738_v32, 4  ;;  %v2470_v39 = vand.u32 3, %v7689_v35  ;;  %vm2468_vm1 = vweird.f32 %v7341_v6 }
 0x2da   : > { %v2458_v12 = vmul.f32 %v2457_v60, %v2453_v62  ;;  %v2465_v20 = vmul.f32 %v2464_v43, %v2453_v62  ;;  %v2676_v29 = vsel %vm2670_vm14, %v2663_v17, 920167782  ;;  %vm2667_vm9 = vcmp.lt.s32.totalorder %v7738_v32, 1 }
 0x2db   : > { %v7787_v62 = vshrl.u32 %v2579_v34, 30  ;;  %vm2669_vm2 = vcmp.lt.s32.totalorder %v7738_v32, 3  ;;  %v2675_v35 = vsel %vm2667_vm9, %v7770_v55, %v7775_v3  ;;  %v2679_v13 = vsel %vm2667_vm9, %v7775_v3, %v7777_v1 }
 0x2dc   : > { %v2459_v2 = vadd.f32 1.0, %v2458_v12  ;;  %v2466_v56 = vadd.f32 1.0, %v2465_v20  ;;  %v2677_v59 = vsel %vm2669_vm2, %v7777_v1, %v2676_v29  ;;  %v7810_v49 = vshll.u32 %v2643_v7, 8 }
 0x2dd   : > { %v2581_v58 = vshll.u32 %v7787_v62, 30  ;;  %vm2471_vm4 = vcmp.lt.s32.totalorder %v2470_v39, 2  ;;  %vm2668_vm8 = vcmp.lt.s32.totalorder %v7738_v32, 2  ;;  %vm2472_vm13 = vcmp.eq.s32.totalorder %v2470_v39, 0 }
 0x2de   : > { %v2467_v44 = vmul.f32 %v2466_v56, %v7724_v26  ;;  %v2476_v14 = vxor.u32 2147483648, %v2459_v2  ;;  %v2680_v26 = vsel %vm2670_vm14, %v2666_v31, 1326507024  ;;  %vm2475_vm5 = vcmp.eq.s32.totalorder %v2470_v39, 2 }
 0x2df   : > { %v2681_v51 = vsel %vm2669_vm2, %v2663_v17, %v2680_v26  ;;  %v7817_v63 = vsub.s32 %v2578_v37, %v2581_v58  ;;  %v2678_v19 = vsel %vm2668_vm8, %v2675_v35, %v2677_v59  ;;  %v2685_v17 = vshrl.u32 %v7810_v49, 16 }
 0x2e0   : > { %v2473_v28 = vxor.u32 2147483648, %v2467_v44  ;;  %v2682_v23 = vsel %vm2668_vm8, %v2679_v13, %v2681_v51  ;;  %v2477_v43 = vsel %vm2475_vm5, %v2476_v14, %v2467_v44  ;;  %v2684_v20 = vand.u32 65535, %v7810_v49  ;;  %v7832_v14 = vpop.f32.mrf.mxu0  ;;  %v7837_v6 = vpop.f32.mrf.mxu1 }
 0x2e1   : > { %v2686_v4 = vand.u32 65535, %v2682_v23  ;;  %vm2583_vm15 = vcmp.lt.s32.totalorder %v7817_v63, 0  ;;  %v2584_v12 = vsub.s32 0, %v7817_v63  ;;  %v2687_v34 = vshrl.u32 %v2682_v23, 16 }
 0x2e2   : > { %v2474_v60 = vsel %vm2472_vm13, %v2459_v2, %v2473_v28  ;;  %v2709_v56 = vshrl.u32 %v2678_v19, 16  ;;  %v2708_v44 = vand.u32 65535, %v2678_v19  ;;  %5343 = vmatmul.msk.bf16.gmra.mxu0 %vm3492_vm7, %v7555_v8  ;;  %v2651_v58 = vshrl.u32 %v5789_v16, %v7732_v42  ;;  %5345 = vmatmul.msk.bf16.gmra.mxu1 %vm3492_vm7, %v7555_v8  ;;  %v7843_v28 = vpop.f32.mrf.mxu2  ;;  %v7850_v19 = vpop.f32.mrf.mxu3 }
 0x2e3   : > { %v2478_v47 = vsel %vm2471_vm4, %v2474_v60, %v2477_v43  ;;  %v2585_v31 = vsel %vm2583_vm15, %v2584_v12, %v7817_v63  ;;  %v7830_v2 = vmul.u32 %v2686_v4, %v2685_v17  ;;  %v2689_v29 = vmul.u32 %v2687_v34, %v2684_v20  ;;  %5347 = vmatmul.msk.bf16.gmra.mxu2 %vm3492_vm7, %v7555_v8 }
 0x2e4   : > { %v2479_v37 = vsel %vm2468_vm1, nan, %v2478_v47  ;;  %v2586_v39 = vclz %v2585_v31  ;;  %v2688_v59 = vmul.u32 %v2686_v4, %v2684_v20  ;;  %v2574_v51 = vadd.s32 %v7736_v5, %v7745_v40  ;;  %5349 = vmatmul.msk.bf16.gmra.mxu3 %vm3492_vm7, %v7555_v8 }
 0x2e5   : > { %v2961_v7 = vpack.c.bf16 %v2479_v37, %v2479_v37  ;;  %v2692_v26 = vshll.u32 %v2689_v29, 16  ;;  %v2691_v23 = vmul.u32 %v2687_v34, %v2685_v17  ;;  %v2694_v60 = vshll.u32 %v7830_v2, 16 }
 0x2e6   : > { %v5142_v13 = vadd.s32 4294967294, %v2586_v39  ;;  %v2711_v43 = vmul.u32 %v2709_v56, %v2684_v20  ;;  %v2710_v4 = vmul.u32 %v2708_v44, %v2684_v20  ;;  %v2712_v5 = vmul.u32 %v2708_v44, %v2685_v17 }
 0x2e7   : > { %v3537_v35 = vsel %vm8805_vm12, %v2961_v7, 0  ;;  %vm2696_vm10 = vc.u32 %v2688_v59, %v2692_v26  ;;  %v2698_v42 = vadd.s32 %v2692_v26, %v2688_v59  ;;  %v2693_v7 = vshrl.u32 %v2689_v29, 16 }
 0x2e8   : > { %3783 = vmatpush.bf16.msrb.mxu0 %v3537_v35  ;;  %vm5143_vm3 = vcmp.lt.s32.totalorder %v5142_v13, 0  ;;  %v2697_v12 = vsel %vm2696_vm10, 1, %v5788_v0  ;;  %v2714_v40 = vshll.u32 %v2711_v43, 16  ;;  %v2713_v35 = vmul.u32 %v2709_v56, %v2685_v17 }
 0x2e9   : > { %v2589_v47 = vsel %vm5143_vm3, 0, %v5142_v13  ;;  %v2699_v31 = vadd.s32 %v2697_v12, %v2691_v23  ;;  %vm2700_vm11 = vc.u32 %v2698_v42, %v2694_v60  ;;  %v2716_v9 = vshll.u32 %v2712_v5, 16 }
 0x2ea   : > { %v2590_v37 = vsub.s32 32, %v2589_v47  ;;  %v2594_v34 = vsub.s32 4294967266, %v2589_v47  ;;  %v2591_v39 = vshll.u32 %v7817_v63, %v2589_v47  ;;  %vm2718_vm6 = vc.u32 %v2710_v4, %v2714_v40  ;;  %v5614_v63 = vld [vmem:[%s5969_s15 + $0x8] sm:$0xff] }
 0x2eb   : > { %v2701_v26 = vsel %vm2700_vm11, 1, %v5788_v0  ;;  %v2719_v8 = vsel %vm2718_vm6, 1, %v5788_v0  ;;  %v2720_v44 = vadd.s32 %v2714_v40, %v2710_v4  ;;  %v2672_v29 = vsel %vm2670_vm14, %v7777_v1, 2102212464 }
 0x2ec   : > { %v2592_v59 = vshrl.u32 %v2574_v51, %v2590_v37  ;;  %v2595_v20 = vadd.s32 127, %v2594_v34  ;;  %v2703_v13 = vadd.s32 %v2701_v26, %v2699_v31  ;;  %v2721_v33 = vadd.s32 %v2719_v8, %v2713_v35 }
 0x2ed   : > { %v410_v23 = vperm.slane %v5614_v63, 7  ;;  %v2671_v17 = vsel %vm2667_vm9, %v2651_v58, %v7770_v55  ;;  %vm2722_vm1 = vc.u32 %v2720_v44, %v2716_v9  ;;  %v2695_v60 = vshrl.u32 %v7830_v2, 16 }
 0x2ee   : > { %v2593_v30 = vor.u32 %v2592_v59, %v2591_v39  ;;  %v2596_v25 = vshll.u32 %v2595_v20, 23  ;;  %v2704_v56 = vadd.s32 %v2703_v13, %v2693_v7  ;;  %v2723_v42 = vsel %vm2722_vm1, 1, %v5788_v0 }
 0x2ef   : > { %v442_v4 = vmul.f32 %v410_v23, %v6083_v15  ;;  %v2604_v47 = vsub.s32 4, %v7787_v62  ;;  %v2673_v1 = vsel %vm2669_vm2, %v7775_v3, %v2672_v29  ;;  %v2715_v12 = vshrl.u32 %v2711_v43, 16 }
 0x2f0   : > { %v2597_v51 = vor.u32 4788187, %v2596_v25  ;;  %v2725_v40 = vadd.s32 %v2723_v42, %v2721_v33  ;;  %v2600_v34 = vcvt.s32.f32 %v2593_v30  ;;  %v7872_v55 = vadd.s32 %v2704_v56, %v2695_v60 }
 0x2f1   : > { %v7875_v25 = vadd.f32 %v6106_v41, %v442_v4  ;;  %v2717_v2 = vshrl.u32 %v2712_v5, 16  ;;  %vm2482_vm14 = vcmp.lt.s32.totalorder %v7558_v61, 0  ;;  %v7878_v7 = vadd.s32 %v2720_v44, %v2716_v9 }
 0x2f2   : > { %v2598_v37 = vand.u32 2147483647, %v2597_v51  ;;  %v2726_v58 = vadd.s32 %v2725_v40, %v2715_v12  ;;  %v2605_v3 = vsel %vm2482_vm14, %v2604_v47, %v7787_v62  ;;  %v2674_v33 = vsel %vm2668_vm8, %v2671_v17, %v2673_v1 }
 0x2f3   : > { %v2793_v31 = vand.u32 2139095040, %v7875_v25  ;;  %vm2730_vm9 = vc.u32 %v7872_v55, %v7878_v7  ;;  %vm2481_vm2 = vcmp.le.f32.partialorder %v2480_v57, 0.7853982  ;;  %v2728_v35 = vmul.u32 %v7810_v49, %v2674_v33 }
 0x2f4   : > { %v2601_v15 = vmul.f32 %v2600_v34, %v2598_v37  ;;  %v2727_v30 = vadd.s32 %v2726_v58, %v2717_v2  ;;  %v2607_v9 = vsel %vm2481_vm2, 0, %v2605_v3  ;;  %v2790_v23 = vand.u32 2147483647, %v7875_v25 }
 0x2f5   : > { %v2794_v41 = vshrl.u32 %v2793_v31, 23  ;;  %v2624_v13 = vadd.s32 3, %v2607_v9  ;;  %vm2623_vm3 = vweird.f32 %v7558_v61 }
 0x2f6   : > { %v2602_v43 = vxor.u32 2147483648, %v2601_v15  ;;  %v2731_v5 = vadd.s32 1, %v2727_v30  ;;  %v2797_v1 = vand.u32 8388607, %v2790_v23 }
 0x2f7   : > { %v5147_v59 = vadd.s32 4294967169, %v2794_v41  ;;  %v2625_v49 = vand.u32 3, %v2624_v13 }
 0x2f8   : > { %v2603_v39 = vsel %vm2482_vm14, %v2602_v43, %v2601_v15  ;;  %v2732_v20 = vsel %vm2730_vm9, %v2731_v5, %v2727_v30  ;;  %v2798_v31 = vor.u32 8388608, %v2797_v1  ;;  %vm2637_vm9 = vcmp.lt.s32.totalorder %v7564_v10, 0 }
 0x2f9   : > { %v2606_v62 = vsel %vm2481_vm2, %v7558_v61, %v2603_v39  ;;  %v2733_v26 = vadd.s32 %v2732_v20, %v2728_v35  ;;  %v2800_v8 = vadd.s32 1, %v5147_v59  ;;  %vm2627_vm8 = vcmp.eq.s32.totalorder %v2625_v49, 0 }
 0x2fa   : > { %v2608_v32 = vmul.f32 %v2606_v62, %v2606_v62  ;;  %vm2630_vm13 = vcmp.eq.s32.totalorder %v2625_v49, 2  ;;  %vm2626_vm5 = vcmp.lt.s32.totalorder %v2625_v49, 2  ;;  %v8838_v59 = vmov 2102212464  }
 0x2fb   : > { %v2734_v63 = vadd.s32 536870912, %v2733_v26  ;;  %vm2801_vm4 = vcmp.gt.s32.totalorder %v2800_v8, 0 }
 0x2fc   : > { %v2609_v44 = vmul.f32 -0.001358992, %v2608_v32  ;;  %v2616_v29 = vmul.f32 -0.00019511016, %v2608_v32  ;;  %v2802_v57 = vsel %vm2801_vm4, %v2800_v8, 0 }
 0x2fd   : > { %v7891_v51 = vshrl.u32 %v2734_v63, 30  ;;  %v2804_v60 = vand.u32 31, %v2802_v57  ;;  %v7899_v3 = vshrl.u32 %v2802_v57, 5  ;;  %v2729_v57 = vadd.s32 %v7878_v7, %v7872_v55 }
 0x2fe   : > { %v2610_v17 = vadd.f32 0.041655596, %v2609_v44  ;;  %v2617_v56 = vadd.f32 0.008332121, %v2616_v29  ;;  %v8840_v29 = vmov 1326507024  }
 0x2ff   : > { %v2736_v47 = vshll.u32 %v7891_v51, 30  ;;  %v7896_v12 = vsub.s32 32, %v2804_v60  ;;  %v2807_v33 = vshll.u32 %v5789_v16, %v2804_v60  ;;  %v2810_v35 = vshll.u32 %v5790_v18, %v2804_v60 }
 0x300   : > { %v2611_v42 = vmul.f32 %v2610_v17, %v2608_v32  ;;  %v2618_v4 = vmul.f32 %v2617_v56, %v2608_v32  ;;  %v2816_v44 = vshll.u32 %v8838_v59, %v2804_v60  ;;  %vm2822_vm11 = vcmp.lt.s32.totalorder %v7899_v3, 1 }
 0x301   : > { %v2737_v34 = vsub.s32 %v2733_v26, %v2736_v47  ;;  %v2808_v30 = vshrl.u32 %v5790_v18, %v7896_v12  ;;  %v2811_v39 = vshrl.u32 %v5791_v22, %v7896_v12  ;;  %v2814_v20 = vshrl.u32 %v8838_v59, %v7896_v12 }
 0x302   : > { %v2612_v40 = vadd.f32 -0.4999988, %v2611_v42  ;;  %v2619_v37 = vadd.f32 -0.16666654, %v2618_v4  ;;  %v2820_v63 = vshrl.u32 %v8840_v29, %v7896_v12  ;;  %v2813_v18 = vshll.u32 %v5791_v22, %v2804_v60 }
 0x303   : > { %vm2738_vm15 = vcmp.lt.s32.totalorder %v2737_v34, 0  ;;  %v2739_v15 = vsub.s32 0, %v2737_v34  ;;  %v7916_v56 = vor.u32 %v2808_v30, %v2807_v33  ;;  %v7919_v4 = vor.u32 %v2811_v39, %v2810_v35 }
 0x304   : > { %v2613_v2 = vmul.f32 %v2612_v40, %v2608_v32  ;;  %v2620_v58 = vmul.f32 %v2619_v37, %v2608_v32  ;;  %v8839_v32 = vmov 920167782   ;;  %v2815_v40 = vor.u32 %v2814_v20, %v2813_v18 }
 0x305   : > { %v2740_v5 = vsel %vm2738_vm15, %v2739_v15, %v2737_v34  ;;  %v2817_v26 = vshrl.u32 %v8839_v32, %v7896_v12  ;;  %v7923_v37 = vshll.u32 %v2798_v31, 8  ;;  %vm2825_vm6 = vcmp.lt.s32.totalorder %v7899_v3, 4 }
 0x306   : > { %v2614_v43 = vadd.f32 1.0, %v2613_v2  ;;  %v2621_v41 = vadd.f32 1.0, %v2620_v58  ;;  %v2741_v9 = vclz %v2740_v5  ;;  %vm2824_vm1 = vcmp.lt.s32.totalorder %v7899_v3, 3 }
 0x307   : > { %v2818_v47 = vor.u32 %v2817_v26, %v2816_v44  ;;  %v2830_v31 = vsel %vm2822_vm11, %v7916_v56, %v7919_v4  ;;  %vm2823_vm14 = vcmp.lt.s32.totalorder %v7899_v3, 2  ;;  %v2834_v5 = vsel %vm2822_vm11, %v7919_v4, %v2815_v40 }
 0x308   : > { %v2622_v8 = vmul.f32 %v2621_v41, %v2606_v62  ;;  %v2631_v13 = vxor.u32 2147483648, %v2614_v43  ;;  %v5145_v17 = vadd.s32 4294967294, %v2741_v9  ;;  %v2819_v62 = vshll.u32 %v8839_v32, %v2804_v60 }
 0x309   : > { %v2831_v33 = vsel %vm2825_vm6, %v2818_v47, 920167782  ;;  %v2839_v32 = vand.u32 65535, %v7923_v37  ;;  %v2840_v29 = vshrl.u32 %v7923_v37, 16  ;;  %v8841_v18 = vand.u32 2147483647, %v7564_v10 }
 0x30a   : > { %v2628_v42 = vxor.u32 2147483648, %v2622_v8  ;;  %v2632_v1 = vsel %vm2630_vm13, %v2631_v13, %v2622_v8  ;;  %vm5146_vm10 = vcmp.lt.s32.totalorder %v5145_v17, 0  ;;  %v2821_v7 = vor.u32 %v2820_v63, %v2819_v62 }
 0x30b   : > { %v2744_v55 = vsel %vm5146_vm10, 0, %v5145_v17  ;;  %v2832_v61 = vsel %vm2824_vm1, %v2815_v40, %v2831_v33  ;;  %vm7958_vm2 = vcmp.le.f32.partialorder %v8841_v18, 0.7853982 }
 0x30c   : > { %v2629_v2 = vsel %vm2627_vm8, %v2614_v43, %v2628_v42  ;;  %v2745_v58 = vsub.s32 32, %v2744_v55  ;;  %v2749_v15 = vsub.s32 4294967266, %v2744_v55  ;;  %v2746_v49 = vshll.u32 %v2737_v34, %v2744_v55 }
 0x30d   : > { %v2633_v22 = vsel %vm2626_vm5, %v2629_v2, %v2632_v1  ;;  %v2835_v39 = vsel %vm2825_vm6, %v2821_v7, 1326507024  ;;  %v2833_v34 = vsel %vm2823_vm14, %v2830_v31, %v2832_v61  ;;  %v2759_v2 = vsub.s32 4, %v7891_v51 }
 0x30e   : > { %v2634_v60 = vsel %vm2623_vm3, nan, %v2633_v22  ;;  %v2747_v43 = vshrl.u32 %v2729_v57, %v2745_v58  ;;  %v2750_v41 = vadd.s32 127, %v2749_v15  ;;  %v2836_v20 = vsel %vm2824_vm1, %v2818_v47, %v2835_v39 }
 0x30f   : > { %v2962_v30 = vpack.c.bf16 %v2634_v60, %v2634_v60  ;;  %v2863_v26 = vand.u32 65535, %v2833_v34  ;;  %v2864_v8 = vshrl.u32 %v2833_v34, 16  ;;  %v2837_v44 = vsel %vm2823_vm14, %v2834_v5, %v2836_v20 }
 0x310   : > { %v2748_v35 = vor.u32 %v2747_v43, %v2746_v49  ;;  %v2751_v59 = vshll.u32 %v2750_v41, 23  ;;  %v2841_v63 = vand.u32 65535, %v2837_v44  ;;  %v2842_v57 = vshrl.u32 %v2837_v44, 16 }
 0x311   : > { %v3540_v9 = vsel %vm8805_vm12, %v2962_v30, 0  ;;  %v2866_v17 = vmul.u32 %v2864_v8, %v2839_v32  ;;  %v2867_v1 = vmul.u32 %v2863_v26, %v2840_v29  ;;  %v2806_v55 = vshrl.u32 %v5789_v16, %v7896_v12 }
 0x312   : > { %3802 = vmatpush.bf16.msrb.mxu1 %v3540_v9  ;;  %v2752_v13 = vor.u32 4788187, %v2751_v59  ;;  %v2755_v62 = vcvt.s32.f32 %v2748_v35  ;;  %v2844_v7 = vmul.u32 %v2842_v57, %v2839_v32  ;;  %v2845_v22 = vmul.u32 %v2841_v63, %v2840_v29 }
 0x313   : > { %v2827_v15 = vsel %vm2825_vm6, %v2815_v40, 2102212464  ;;  %v2865_v60 = vmul.u32 %v2863_v26, %v2839_v32  ;;  %v2869_v31 = vshll.u32 %v2866_v17, 16  ;;  %v2843_v33 = vmul.u32 %v2841_v63, %v2839_v32 }
 0x314   : > { %v2753_v47 = vand.u32 2147483647, %v2752_v13  ;;  %v2846_v30 = vmul.u32 %v2842_v57, %v2840_v29  ;;  %v2847_v49 = vshll.u32 %v2844_v7, 16  ;;  %v2868_v43 = vmul.u32 %v2864_v8, %v2840_v29 }
 0x315   : > { %v2871_v61 = vshll.u32 %v2867_v1, 16  ;;  %vm2873_vm4 = vc.u32 %v2865_v60, %v2869_v31  ;;  %v2875_v5 = vadd.s32 %v2869_v31, %v2865_v60  ;;  %v2849_v39 = vshll.u32 %v2845_v22, 16 }
 0x316   : > { %v2756_v58 = vmul.f32 %v2755_v62, %v2753_v47  ;;  %vm2851_vm8 = vc.u32 %v2843_v33, %v2847_v49  ;;  %v2853_v9 = vadd.s32 %v2847_v49, %v2843_v33  ;;  %v2874_v16 = vsel %vm2873_vm4, 1, %v5788_v0 }
 0x317   : > { %v2852_v40 = vsel %vm2851_vm8, 1, %v5788_v0  ;;  %v2876_v35 = vadd.s32 %v2874_v16, %v2868_v43  ;;  %vm2877_vm13 = vc.u32 %v2875_v5, %v2871_v61  ;;  %v2870_v8 = vshrl.u32 %v2866_v17, 16 }
 0x318   : > { %v2757_v41 = vxor.u32 2147483648, %v2756_v58  ;;  %v2854_v34 = vadd.s32 %v2852_v40, %v2846_v30  ;;  %vm2855_vm5 = vc.u32 %v2853_v9, %v2849_v39  ;;  %v2878_v20 = vsel %vm2877_vm13, 1, %v5788_v0 }
 0x319   : > { %v2856_v26 = vsel %vm2855_vm5, 1, %v5788_v0  ;;  %v2880_v13 = vadd.s32 %v2878_v20, %v2876_v35  ;;  %v2826_v44 = vsel %vm2822_vm11, %v2806_v55, %v7916_v56  ;;  %v2828_v29 = vsel %vm2824_vm1, %v7919_v4, %v2827_v15 }
 0x31a   : > { %v2758_v12 = vsel %vm2637_vm9, %v2757_v41, %v2756_v58  ;;  %v2848_v63 = vshrl.u32 %v2844_v7, 16  ;;  %v2858_v57 = vadd.s32 %v2856_v26, %v2854_v34  ;;  %v2872_v62 = vshrl.u32 %v2867_v1, 16 }
 0x31b   : > { %v2761_v59 = vsel %vm7958_vm2, %v7564_v10, %v2758_v12  ;;  %v2881_v58 = vadd.s32 %v2880_v13, %v2870_v8  ;;  %v2760_v0 = vsel %vm2637_vm9, %v2759_v2, %v7891_v51  ;;  %v2850_v17 = vshrl.u32 %v2845_v22, 16 }
 0x31c   : > { %v2763_v32 = vmul.f32 %v2761_v59, %v2761_v59  ;;  %v2859_v60 = vadd.s32 %v2858_v57, %v2848_v63  ;;  %v2829_v56 = vsel %vm2823_vm14, %v2826_v44, %v2828_v29  ;;  %v2879_v4 = vadd.s32 %v2875_v5, %v2871_v61 }
 0x31d   : > { %v2882_v55 = vadd.s32 %v2881_v58, %v2872_v62  ;;  %v2762_v7 = vsel %vm7958_vm2, 0, %v2760_v0  ;;  %v2883_v43 = vmul.u32 %v7923_v37, %v2829_v56  ;;  %vm2778_vm6 = vweird.f32 %v7564_v10  ;;  %v7994_v62 = vpop.f32.mrf.mxu1  ;;  %v7996_v58 = vpop.f32.mrf.mxu2 }
 0x31e   : > { %v2764_v18 = vmul.f32 -0.001358992, %v2763_v32  ;;  %v2771_v47 = vmul.f32 -0.00019511016, %v2763_v32  ;;  %v2860_v30 = vadd.s32 %v2859_v60, %v2850_v17  ;;  %v2779_v41 = vadd.s32 3, %v2762_v7  ;;  %v7998_v0 = vpop.f32.mrf.mxu3 }
 0x31f   : > { %v2886_v49 = vadd.s32 1, %v2882_v55  ;;  %vm2792_vm9 = vcmp.lt.s32.totalorder %v7875_v25, 0  ;;  %vm8017_vm2 = vcmp.le.f32.partialorder %v2790_v23, 0.7853982  ;;  %vm2933_vm5 = vweird.f32 %v7875_v25 }
 0x320   : > { %v2765_v31 = vadd.f32 0.041655596, %v2764_v18  ;;  %v2772_v33 = vadd.f32 0.008332121, %v2771_v47  ;;  %vm2885_vm15 = vc.u32 %v2860_v30, %v2879_v4  ;;  %v2780_v61 = vand.u32 3, %v2779_v41  ;;  %v7992_v47 = vpop.f32.mrf.mxu0 }
 0x321   : > { %v2887_v22 = vsel %vm2885_vm15, %v2886_v49, %v2882_v55  ;;  %v2884_v17 = vadd.s32 %v2879_v4, %v2860_v30 }
 0x322   : > { %v2766_v15 = vmul.f32 %v2765_v31, %v2763_v32  ;;  %v2773_v1 = vmul.f32 %v2772_v33, %v2763_v32  ;;  %v2888_v39 = vadd.s32 %v2887_v22, %v2883_v43  ;;  %vm2782_vm3 = vcmp.eq.s32.totalorder %v2780_v61, 0 }
 0x323   : > { %vm2785_vm10 = vcmp.eq.s32.totalorder %v2780_v61, 2  ;;  %vm2781_vm11 = vcmp.lt.s32.totalorder %v2780_v61, 2 }
 0x324   : > { %v2767_v51 = vadd.f32 -0.4999988, %v2766_v15  ;;  %v2774_v2 = vadd.f32 -0.16666654, %v2773_v1  ;;  %v2889_v16 = vadd.s32 536870912, %v2888_v39 }
 0x325   : > { %v8008_v30 = vpop.f32.mrf.mxu2 }
 0x326   : > { %v2768_v9 = vmul.f32 %v2767_v51, %v2763_v32  ;;  %v2775_v3 = vmul.f32 %v2774_v2, %v2763_v32  ;;  %v2890_v5 = vshrl.u32 %v2889_v16, 30  ;;  %v8002_v2 = vpop.f32.mrf.mxu1  ;;  %5352 = vmatmul.msk.bf16.vlgmr.msrb.gmra.mxu1 %vm3492_vm7, %v7613_v38  ;;  %v8010_v4 = vpop.f32.mrf.mxu3 }
 0x328   : > { %v2769_v12 = vadd.f32 1.0, %v2768_v9  ;;  %v2776_v40 = vadd.f32 1.0, %v2775_v3  ;;  %v2891_v34 = vshll.u32 %v2890_v5, 30  ;;  %v8000_v51 = vpop.f32.mrf.mxu0  ;;  %5350 = vmatmul.msk.bf16.vlgmr.msrb.gmra.mxu0 %vm3492_vm7, %v7613_v38  ;;  %v2914_v3 = vsub.s32 4, %v2890_v5 }
 0x32a   : > { %v2777_v42 = vmul.f32 %v2776_v40, %v2761_v59  ;;  %v2786_v35 = vxor.u32 2147483648, %v2769_v12  ;;  %v2892_v37 = vsub.s32 %v2888_v39, %v2891_v34  ;;  %v2915_v34 = vsel %vm2792_vm9, %v2914_v3, %v2890_v5 }
 0x32c   : > { %v2783_v20 = vxor.u32 2147483648, %v2777_v42  ;;  %v2787_v8 = vsel %vm2785_vm10, %v2786_v35, %v2777_v42  ;;  %vm2893_vm1 = vcmp.lt.s32.totalorder %v2892_v37, 0  ;;  %v2894_v32 = vsub.s32 0, %v2892_v37 }
 0x32d   : > { %v8028_v61 = vpop.f32.mrf.mxu2 }
 0x32e   : > { %v2784_v26 = vsel %vm2782_vm3, %v2769_v12, %v2783_v20  ;;  %v2895_v63 = vsel %vm2893_vm1, %v2894_v32, %v2892_v37  ;;  %v8030_v42 = vpop.f32.mrf.mxu3 }
 0x32f   : > { %v2788_v13 = vsel %vm2781_vm11, %v2784_v26, %v2787_v8  ;;  %v2896_v57 = vclz %v2895_v63  ;;  %v2917_v26 = vsel %vm8017_vm2, 0, %v2915_v34 }
 0x330   : > { %v2789_v44 = vsel %vm2778_vm6, nan, %v2788_v13  ;;  %v8024_v40 = vpop.f32.mrf.mxu0  ;;  %v2934_v5 = vadd.s32 3, %v2917_v26 }
 0x331   : > { %v2963_v29 = vpack.c.bf16 %v2789_v44, %v2789_v44  ;;  %v5148_v18 = vadd.s32 4294967294, %v2896_v57  ;;  %v5615_v57 = vld [vmem:[%s8788_s4 + $0x8] sm:$0xff] }
 0x333   : > { %v3543_v59 = vsel %vm8805_vm12, %v2963_v29, 0  ;;  %vm5149_vm14 = vcmp.lt.s32.totalorder %v5148_v18, 0 }
 0x334   : > { %3821 = vmatpush.bf16.msrb.mxu2 %v3543_v59  ;;  %v2899_v10 = vsel %vm5149_vm14, 0, %v5148_v18 }
 0x335   : > { %v2900_v60 = vsub.s32 32, %v2899_v10  ;;  %v2904_v31 = vsub.s32 4294967266, %v2899_v10  ;;  %v2901_v33 = vshll.u32 %v2892_v37, %v2899_v10  ;;  %v8043_v59 = vpop.f32.mrf.mxu2 }
 0x336   : > { %v8045_v18 = vpop.f32.mrf.mxu3 }
 0x337   : > { %v2902_v56 = vshrl.u32 %v2884_v17, %v2900_v60  ;;  %v2905_v55 = vadd.s32 127, %v2904_v31  ;;  %5354 = vmatmul.msk.bf16.vlgmr.msrb.gmra.mxu2 %vm3492_vm7, %v7613_v38  ;;  %v8026_v38 = vpop.f32.mrf.mxu1 }
 0x338   : > { %v8034_v29 = vpop.f32.mrf.mxu0  ;;  %5351 = vmatmul.msk.bf16.gmra.mxu0 %vm3492_vm7, %v5615_v57 }
 0x339   : > { %v2903_v7 = vor.u32 %v2902_v56, %v2901_v33  ;;  %v2906_v15 = vshll.u32 %v2905_v55, 23  ;;  %v2935_v33 = vand.u32 3, %v2934_v5 }
 0x33b   : > { %v2907_v1 = vor.u32 4788187, %v2906_v15  ;;  %v2910_v43 = vcvt.s32.f32 %v2903_v7  ;;  %vm2937_vm4 = vcmp.eq.s32.totalorder %v2935_v33, 0  ;;  %vm2940_vm8 = vcmp.eq.s32.totalorder %v2935_v33, 2 }
 0x33c   : > { %vm2936_vm13 = vcmp.lt.s32.totalorder %v2935_v33, 2 }
 0x33d   : > { %v2908_v49 = vand.u32 2147483647, %v2907_v1 }
 0x33f   : > { %v2911_v22 = vmul.f32 %v2910_v43, %v2908_v49  ;;  %v8036_v63 = vpop.f32.mrf.mxu1  ;;  %5353 = vmatmul.msk.bf16.gmra.mxu1 %vm3492_vm7, %v5615_v57  ;;  %v8052_v49 = vpop.f32.mrf.mxu2 }
 0x340   : > { %v8048_v15 = vpop.f32.mrf.mxu0  ;;  %v8054_v43 = vpop.f32.mrf.mxu3 }
 0x341   : > { %v2912_v41 = vxor.u32 2147483648, %v2911_v22 }
 0x343   : > { %v2913_v9 = vsel %vm2792_vm9, %v2912_v41, %v2911_v22 }
 0x344   : > { %v2916_v16 = vsel %vm8017_vm2, %v7875_v25, %v2913_v9 }
 0x345   : > { %v2918_v12 = vmul.f32 %v2916_v16, %v2916_v16 }
 0x347   : > { %v2919_v35 = vmul.f32 -0.001358992, %v2918_v12  ;;  %v2926_v23 = vmul.f32 -0.00019511016, %v2918_v12  ;;  %5355 = vmatmul.msk.bf16.gmra.mxu2 %vm3492_vm7, %v5615_v57  ;;  %v8050_v1 = vpop.f32.mrf.mxu1 }
 0x348   : > { %v8064_v34 = vpop.f32.mrf.mxu3 }
 0x349   : > { %v2920_v20 = vadd.f32 0.041655596, %v2919_v35  ;;  %v2927_v37 = vadd.f32 0.008332121, %v2926_v23  ;;  %v8062_v23 = vpop.f32.mrf.mxu2  ;;  %8848 = vst [vmem:[#allocation20_spill] sm:$0xff] %v8064_v34 }
 0x34a   : > { %8847 = vst [vmem:[#allocation19_spill] sm:$0xff] %v8062_v23 }
 0x34b   : > { %v2921_v8 = vmul.f32 %v2920_v20, %v2918_v12  ;;  %v2928_v13 = vmul.f32 %v2927_v37, %v2918_v12  ;;  %v5616_v20 = vld [vmem:[%s8788_s4] sm:$0xff] }
 0x34d   : > { %v2922_v32 = vadd.f32 -0.4999988, %v2921_v8  ;;  %v2929_v44 = vadd.f32 -0.16666654, %v2928_v13 }
 0x34f   : > { %v2923_v10 = vmul.f32 %v2922_v32, %v2918_v12  ;;  %v2930_v17 = vmul.f32 %v2929_v44, %v2918_v12  ;;  %v8058_v12 = vpop.f32.mrf.mxu0  ;;  %v8060_v35 = vpop.f32.mrf.mxu1 }
 0x350   : > { %8846 = vst [vmem:[#allocation18_spill] sm:$0xff] %v8060_v35  ;;  %v8076_v8 = vpop.f32.mrf.mxu3 }
 0x351   : > { %v2924_v60 = vadd.f32 1.0, %v2923_v10  ;;  %v2931_v31 = vadd.f32 1.0, %v2930_v17  ;;  %v8074_v26 = vpop.f32.mrf.mxu2 }
 0x353   : > { %v2932_v56 = vmul.f32 %v2931_v31, %v2916_v16  ;;  %v2941_v55 = vxor.u32 2147483648, %v2924_v60 }
 0x355   : > { %v2938_v7 = vxor.u32 2147483648, %v2932_v56  ;;  %v2942_v41 = vsel %vm2940_vm8, %v2941_v55, %v2932_v56 }
 0x357   : > { %v2939_v22 = vsel %vm2937_vm4, %v2924_v60, %v2938_v7  ;;  %v8070_v25 = vpop.f32.mrf.mxu0  ;;  %v8072_v37 = vpop.f32.mrf.mxu1 }
 0x358   : > { %v2943_v39 = vsel %vm2936_vm13, %v2939_v22, %v2942_v41  ;;  %v8084_v5 = vpop.f32.mrf.mxu3 }
 0x359   : > { %v2944_v9 = vsel %vm2933_vm5, nan, %v2943_v39  ;;  %v8082_v44 = vpop.f32.mrf.mxu2  ;;  %8852 = vst [vmem:[#allocation24_spill] sm:$0xff] %v8084_v5 }
 0x35a   : > { %v2964_v3 = vpack.c.bf16 %v2944_v9, %v2944_v9  ;;  %8851 = vst [vmem:[#allocation23_spill] sm:$0xff] %v8082_v44 }
 0x35c   : > { %v3546_v16 = vsel %vm8805_vm12, %v2964_v3, 0 }
 0x35d   : > { %3840 = vmatpush.bf16.msrb.mxu3 %v3546_v16 }
 0x35f   : > { %v8078_v13 = vpop.f32.mrf.mxu0  ;;  %v8080_v32 = vpop.f32.mrf.mxu1 }
 0x360   : > { %5356 = vmatmul.msk.bf16.vlgmr.msrb.gmra.mxu3 %vm3492_vm7, %v5616_v20  ;;  %8849 = vst [vmem:[#allocation21_spill] sm:$0xff] %v8078_v13  ;;  %v8093_v31 = vpop.f32.mrf.mxu3 }
 0x361   : > { %8850 = vst [vmem:[#allocation22_spill] sm:$0xff] %v8080_v32  ;;  %v8091_v60 = vpop.f32.mrf.mxu2 }
 0x362   : > { %8855 = vst [vmem:[#allocation27_spill] sm:$0xff] %v8091_v60 }
 0x363   : > { %8856 = vst [vmem:[#allocation28_spill] sm:$0xff] %v8093_v31 }
 0x367   : > { %v8087_v10 = vpop.f32.mrf.mxu0  ;;  %v8089_v17 = vpop.f32.mrf.mxu1 }
 0x368   : > { %8853 = vst [vmem:[#allocation25_spill] sm:$0xff] %v8087_v10  ;;  %v8101_v7 = vpop.f32.mrf.mxu3 }
 0x369   : > { %8854 = vst [vmem:[#allocation26_spill] sm:$0xff] %v8089_v17  ;;  %v8099_v55 = vpop.f32.mrf.mxu2 }
 0x36a   : > { %8859 = vst [vmem:[#allocation31_spill] sm:$0xff] %v8099_v55 }
 0x36b   : > { %8860 = vst [vmem:[#allocation32_spill] sm:$0xff] %v8101_v7 }
 0x36f   : > { %v8095_v33 = vpop.f32.mrf.mxu0  ;;  %v8097_v56 = vpop.f32.mrf.mxu1 }
 0x370   : > { %5357 = vmatmul.msk.bf16.gmra.mxu3 %vm3492_vm7, %v5615_v57  ;;  %8857 = vst [vmem:[#allocation29_spill] sm:$0xff] %v8095_v33  ;;  %v8109_v39 = vpop.f32.mrf.mxu3 }
 0x371   : > { %8858 = vst [vmem:[#allocation30_spill] sm:$0xff] %v8097_v56  ;;  %v8107_v57 = vpop.f32.mrf.mxu2 }
 0x372   : > { %8863 = vst [vmem:[#allocation35_spill] sm:$0xff] %v8107_v57 }
 0x373   : > { %8864 = vst [vmem:[#allocation36_spill] sm:$0xff] %v8109_v39 }
 0x377   : > { %v8103_v22 = vpop.f32.mrf.mxu0  ;;  %v8105_v41 = vpop.f32.mrf.mxu1 }
 0x378   : > { %8861 = vst [vmem:[#allocation33_spill] sm:$0xff] %v8103_v22  ;;  %v8117_v20 = vpop.f32.mrf.mxu3 }
 0x379   : > { %8862 = vst [vmem:[#allocation34_spill] sm:$0xff] %v8105_v41  ;;  %v8115_v16 = vpop.f32.mrf.mxu2 }
 0x37a   : > { %8867 = vst [vmem:[#allocation39_spill] sm:$0xff] %v8115_v16 }
 0x37b   : > { %8868 = vst [vmem:[#allocation40_spill] sm:$0xff] %v8117_v20 }
 0x37f   : > { %v8111_v9 = vpop.f32.mrf.mxu0  ;;  %v8113_v3 = vpop.f32.mrf.mxu1 }
 0x380   : > { %8865 = vst [vmem:[#allocation37_spill] sm:$0xff] %v8111_v9  ;;  %v3614_v7 = vpop.f32.mrf.mxu3 }
 0x381   : > { %8866 = vst [vmem:[#allocation38_spill] sm:$0xff] %v8113_v3  ;;  %v3595_v33 = vpop.f32.mrf.mxu2  ;;  %v3615_v44 = vadd.f32 %v3614_v7, %v7715_v50 }
 0x382   : > { %v3596_v5 = vadd.f32 %v3595_v33, %v7711_v24 }
 0x387   : > { %v3557_v56 = vpop.f32.mrf.mxu0  ;;  %v3576_v55 = vpop.f32.mrf.mxu1 }
 0x388   : > { %v3616_v41 = vpop.f32.mrf.mxu3  ;;  %v3558_v9 = vadd.f32 %v3557_v56, %v7696_v36  ;;  %v3577_v3 = vadd.f32 %v3576_v55, %v7707_v21 }
 0x389   : > { %v3597_v22 = vpop.f32.mrf.mxu2  ;;  %v3617_v50 = vadd.f32 %v3616_v41, %v7752_v11 }
 0x38a   : > { %v3598_v24 = vadd.f32 %v3597_v22, %v7743_v54  ;;  %v3852_v41 = vmax.f32 %v3558_v9, 0.0 }
 0x38b   : > { %v3871_v54 = vmax.f32 %v3617_v50, 0.0 }
 0x38c   : > { %v3870_v7 = vmax.f32 %v3598_v24, 0.0 }
 0x38f   : > { %v3559_v31 = vpop.f32.mrf.mxu0  ;;  %v3578_v60 = vpop.f32.mrf.mxu1 }
 0x390   : > { %v3619_v39 = vpop.f32.mrf.mxu3  ;;  %v3560_v35 = vadd.f32 %v3559_v31, %v7734_v27  ;;  %v3579_v36 = vadd.f32 %v3578_v60, %v7740_v45 }
 0x391   : > { %v3600_v10 = vpop.f32.mrf.mxu2  ;;  %v3620_v23 = vadd.f32 %v3619_v39, %v7812_v52 }
 0x392   : > { %v3601_v34 = vadd.f32 %v3600_v10, %v7802_v48 }
 0x393   : > { %v3887_v45 = vmax.f32 %v3620_v23, 0.0 }
 0x394   : > { %v3886_v31 = vmax.f32 %v3601_v34, 0.0 }
 0x397   : > { %v3562_v17 = vpop.f32.mrf.mxu0  ;;  %v3581_v57 = vpop.f32.mrf.mxu1 }
 0x398   : > { %v3563_v16 = vadd.f32 %v3562_v17, %v7784_v46  ;;  %v3582_v20 = vadd.f32 %v3581_v57, %v7791_v53  ;;  %v3621_v53 = vpop.f32.mrf.mxu3  ;;  %v3855_v57 = vmax.f32 %v3615_v44, 0.0 }
 0x399   : > { %v3602_v17 = vpop.f32.mrf.mxu2  ;;  %v3622_v52 = vadd.f32 %v3621_v53, %v7850_v19  ;;  %v3854_v19 = vmax.f32 %v3596_v5, 0.0 }
 0x39a   : > { %v3603_v48 = vadd.f32 %v3602_v17, %v7843_v28  ;;  %v3884_v10 = vmax.f32 %v3563_v16, 0.0  ;;  %v3885_v33 = vmax.f32 %v3582_v20, 0.0  ;;  %v3853_v28 = vmax.f32 %v3577_v3, 0.0 }
 0x39c   : > { %v3902_v60 = vmax.f32 %v3603_v48, 0.0  ;;  %v8145_v48 = vld [vmem:[#allocation7 + $0x8] sm:$0xff] }
 0x39e   : > { %v3938_v22 = vpack.c.bf16 %v3902_v60, %v3886_v31 }
 0x39f   : > { %v3564_v32 = vpop.f32.mrf.mxu0  ;;  %v3583_v13 = vpop.f32.mrf.mxu1 }
 0x3a0   : > { %v3565_v21 = vadd.f32 %v3564_v32, %v7832_v14  ;;  %v3584_v46 = vadd.f32 %v3583_v13, %v7837_v6  ;;  %v3903_v14 = vmax.f32 %v3622_v52, 0.0  ;;  %v3868_v32 = vmax.f32 %v3560_v35, 0.0  ;;  %4012 = vmatpush.bf16.msra.mxu2 %v3938_v22  ;;  %v3690_v20 = vpop.f32.mrf.mxu3 }
 0x3a1   : > { %v3869_v6 = vmax.f32 %v3579_v36, 0.0  ;;  %v3671_v35 = vpop.f32.mrf.mxu2  ;;  %v3922_v36 = vpack.c.bf16 %v3870_v7, %v3854_v19 }
 0x3a2   : > { %v3900_v56 = vmax.f32 %v3565_v21, 0.0  ;;  %v3901_v27 = vmax.f32 %v3584_v46, 0.0  ;;  %v3939_v11 = vpack.c.bf16 %v3903_v14, %v3887_v45  ;;  %v3920_v23 = vpack.c.bf16 %v3868_v32, %v3852_v41  ;;  %v8135_v46 = vld [vmem:[#allocation7] sm:$0xff] }
 0x3a3   : > { %v3921_v34 = vpack.c.bf16 %v3869_v6, %v3853_v28  ;;  %v3923_v21 = vpack.c.bf16 %v3871_v54, %v3855_v57 }
 0x3a4   : > { %v3936_v13 = vpack.c.bf16 %v3900_v56, %v3884_v10  ;;  %v3937_v55 = vpack.c.bf16 %v3901_v27, %v3885_v33  ;;  %4031 = vmatpush.bf16.msra.mxu3 %v3939_v11  ;;  %4013 = vmatpush.bf16.msra.mxu2 %v3922_v36  ;;  %v3691_v27 = vadd.f32 %v3690_v20, %v7998_v0 }
 0x3a6   : > { %3974 = vmatpush.bf16.msra.mxu0 %v3936_v13  ;;  %3993 = vmatpush.bf16.msra.mxu1 %v3937_v55 }
 0x3a7   : > { %v3633_v39 = vpop.f32.mrf.mxu0  ;;  %v3652_v16 = vpop.f32.mrf.mxu1  ;;  %5370 = vmatmul.msk.bf16.vlgmr.msra.gmra.mxu2 %vm3171_vm0, %v8135_v46 }
 0x3a8   : > { %4032 = vmatpush.bf16.msra.mxu3 %v3923_v21  ;;  %v3692_v3 = vpop.f32.mrf.mxu3  ;;  %v3634_v52 = vadd.f32 %v3633_v39, %v7992_v47  ;;  %v3653_v10 = vadd.f32 %v3652_v16, %v7994_v62  ;;  %v3672_v47 = vadd.f32 %v3671_v35, %v7996_v58 }
 0x3a9   : > { %v3673_v9 = vpop.f32.mrf.mxu2  ;;  %v3693_v0 = vadd.f32 %v3692_v3, %v8010_v4 }
 0x3aa   : > { %3975 = vmatpush.bf16.msra.mxu0 %v3920_v23  ;;  %3994 = vmatpush.bf16.msra.mxu1 %v3921_v34  ;;  %v3674_v58 = vadd.f32 %v3673_v9, %v8008_v30  ;;  %v3856_v16 = vmax.f32 %v3634_v52, 0.0  ;;  %v3859_v23 = vmax.f32 %v3691_v27, 0.0 }
 0x3ab   : > { %5372 = vmatmul.msk.bf16.vlgmr.msra.gmra.mxu3 %vm3171_vm0, %v8135_v46  ;;  %v3875_v30 = vmax.f32 %v3693_v0, 0.0 }
 0x3ac   : > { %v3874_v57 = vmax.f32 %v3674_v58, 0.0 }
 0x3ad   : > { %5366 = vmatmul.msk.bf16.vlgmr.msra.gmra.mxu0 %vm3171_vm0, %v8135_v46  ;;  %5368 = vmatmul.msk.bf16.vlgmr.msra.gmra.mxu1 %vm3171_vm0, %v8135_v46  ;;  %v3927_v9 = vpack.c.bf16 %v3875_v30, %v3859_v23 }
 0x3af   : > { %v3635_v44 = vpop.f32.mrf.mxu0  ;;  %v3654_v5 = vpop.f32.mrf.mxu1 }
 0x3b0   : > { %v3695_v50 = vpop.f32.mrf.mxu3 }
 0x3b1   : > { %v3676_v24 = vpop.f32.mrf.mxu2  ;;  %v3696_v45 = vadd.f32 %v3695_v50, %v8030_v42 }
 0x3b2   : > { %v3677_v31 = vadd.f32 %v3676_v24, %v8028_v61 }
 0x3b4   : > { %v3890_v22 = vmax.f32 %v3677_v31, 0.0 }
 0x3b7   : > { %v3638_v17 = vpop.f32.mrf.mxu0  ;;  %v3657_v53 = vpop.f32.mrf.mxu1  ;;  %5371 = vmatmul.msk.bf16.gmra.mxu2 %vm3171_vm0, %v8145_v48 }
 0x3b8   : > { %v3639_v33 = vadd.f32 %v3638_v17, %v8024_v40  ;;  %v3658_v56 = vadd.f32 %v3657_v53, %v8026_v38  ;;  %v3636_v40 = vadd.f32 %v3635_v44, %v8000_v51  ;;  %v3655_v38 = vadd.f32 %v3654_v5, %v8002_v2  ;;  %v3697_v13 = vpop.f32.mrf.mxu3 }
 0x3b9   : > { %v3678_v6 = vpop.f32.mrf.mxu2  ;;  %v3698_v42 = vadd.f32 %v3697_v13, %v8045_v18  ;;  %v3891_v2 = vmax.f32 %v3696_v45, 0.0  ;;  %v3858_v18 = vmax.f32 %v3672_v47, 0.0 }
 0x3ba   : > { %v3679_v61 = vadd.f32 %v3678_v6, %v8043_v59  ;;  %v3888_v55 = vmax.f32 %v3639_v33, 0.0  ;;  %v3889_v7 = vmax.f32 %v3658_v56, 0.0  ;;  %v3872_v41 = vmax.f32 %v3636_v40, 0.0  ;;  %v8871_v6 = vld [vmem:[#allocation22_spill] sm:$0xff] }
 0x3bb   : > { %5373 = vmatmul.msk.bf16.gmra.mxu3 %vm3171_vm0, %v8145_v48  ;;  %v3857_v59 = vmax.f32 %v3653_v10, 0.0  ;;  %v3926_v5 = vpack.c.bf16 %v3874_v57, %v3858_v18 }
 0x3bc   : > { %v3906_v11 = vmax.f32 %v3679_v61, 0.0  ;;  %v3924_v20 = vpack.c.bf16 %v3872_v41, %v3856_v16  ;;  %v8872_v61 = vld [vmem:[#allocation19_spill] sm:$0xff] }
 0x3bd   : > { %5367 = vmatmul.msk.bf16.gmra.mxu0 %vm3171_vm0, %v8145_v48  ;;  %5369 = vmatmul.msk.bf16.gmra.mxu1 %vm3171_vm0, %v8145_v48 }
 0x3be   : > { %v3942_v39 = vpack.c.bf16 %v3906_v11, %v3890_v22 }
 0x3bf   : > { %v3640_v60 = vpop.f32.mrf.mxu0  ;;  %v3659_v62 = vpop.f32.mrf.mxu1 }
 0x3c0   : > { %v3641_v14 = vadd.f32 %v3640_v60, %v8034_v29  ;;  %v3660_v32 = vadd.f32 %v3659_v62, %v8036_v63  ;;  %v3907_v29 = vmax.f32 %v3698_v42, 0.0  ;;  %v3873_v63 = vmax.f32 %v3655_v38, 0.0  ;;  %4088 = vmatpush.bf16.msrb.mxu2 %v3942_v39  ;;  %v3766_v44 = vpop.f32.mrf.mxu3  ;;  %v8869_v38 = vld [vmem:[#allocation18_spill] sm:$0xff]  ;;  %v8873_v42 = vld [vmem:[#allocation20_spill] sm:$0xff] }
 0x3c1   : > { %v3747_v21 = vpop.f32.mrf.mxu2  ;;  %v3767_v45 = vadd.f32 %v3766_v44, %v8054_v43 }
 0x3c2   : > { %v3904_v54 = vmax.f32 %v3641_v14, 0.0  ;;  %v3905_v51 = vmax.f32 %v3660_v32, 0.0  ;;  %v3943_v4 = vpack.c.bf16 %v3907_v29, %v3891_v2  ;;  %v3925_v36 = vpack.c.bf16 %v3873_v63, %v3857_v59  ;;  %v8870_v14 = vld [vmem:[#allocation21_spill] sm:$0xff] }
 0x3c4   : > { %v3940_v28 = vpack.c.bf16 %v3904_v54, %v3888_v55  ;;  %v3941_v19 = vpack.c.bf16 %v3905_v51, %v3889_v7  ;;  %4107 = vmatpush.bf16.msrb.mxu3 %v3943_v4  ;;  %4089 = vmatpush.bf16.msrb.mxu2 %v3926_v5  ;;  %v8874_v55 = vld [vmem:[#allocation23_spill] sm:$0xff]  ;;  %v8875_v7 = vld [vmem:[#allocation24_spill] sm:$0xff] }
 0x3c6   : > { %4050 = vmatpush.bf16.msrb.mxu0 %v3940_v28  ;;  %4069 = vmatpush.bf16.msrb.mxu1 %v3941_v19 }
 0x3c7   : > { %v3709_v34 = vpop.f32.mrf.mxu0  ;;  %v3728_v35 = vpop.f32.mrf.mxu1  ;;  %5378 = vmatmul.msk.bf16.vlgmr.msrb.gmra.mxu2 %vm3171_vm0, %v8135_v46 }
 0x3c8   : > { %4108 = vmatpush.bf16.msrb.mxu3 %v3927_v9  ;;  %v3768_v24 = vpop.f32.mrf.mxu3  ;;  %v3710_v56 = vadd.f32 %v3709_v34, %v8048_v15  ;;  %v3729_v47 = vadd.f32 %v3728_v35, %v8050_v1  ;;  %v3748_v15 = vadd.f32 %v3747_v21, %v8052_v49  ;;  %v3863_v34 = vmax.f32 %v3767_v45, 0.0  ;;  %v8878_v45 = vld [vmem:[#allocation33_spill] sm:$0xff] }
 0x3c9   : > { %v3749_v53 = vpop.f32.mrf.mxu2  ;;  %v3769_v43 = vadd.f32 %v3768_v24, %v8873_v42  ;;  %v8885_v42 = vld [vmem:[#allocation30_spill] sm:$0xff] }
 0x3ca   : > { %4051 = vmatpush.bf16.msrb.mxu0 %v3924_v20  ;;  %4070 = vmatpush.bf16.msrb.mxu1 %v3925_v36  ;;  %v3750_v49 = vadd.f32 %v3749_v53, %v8872_v61  ;;  %v3860_v59 = vmax.f32 %v3710_v56, 0.0  ;;  %v3861_v18 = vmax.f32 %v3729_v47, 0.0  ;;  %v3862_v23 = vmax.f32 %v3748_v15, 0.0  ;;  %v8876_v47 = vld [vmem:[#allocation25_spill] sm:$0xff] }
 0x3cb   : > { %5380 = vmatmul.msk.bf16.vlgmr.msrb.gmra.mxu3 %vm3171_vm0, %v8135_v46  ;;  %v3879_v39 = vmax.f32 %v3769_v43, 0.0  ;;  %v8884_v61 = vld [vmem:[#allocation29_spill] sm:$0xff] }
 0x3cc   : > { %v3878_v30 = vmax.f32 %v3750_v49, 0.0 }
 0x3cd   : > { %5374 = vmatmul.msk.bf16.vlgmr.msrb.gmra.mxu0 %vm3171_vm0, %v8135_v46  ;;  %5376 = vmatmul.msk.bf16.vlgmr.msrb.gmra.mxu1 %vm3171_vm0, %v8135_v46 }
 0x3ce   : > { %v3930_v9 = vpack.c.bf16 %v3878_v30, %v3862_v23 }
 0x3cf   : > { %v3711_v3 = vpop.f32.mrf.mxu0  ;;  %v3730_v17 = vpop.f32.mrf.mxu1 }
 0x3d0   : > { %v3771_v33 = vpop.f32.mrf.mxu3 }
 0x3d1   : > { %v3752_v10 = vpop.f32.mrf.mxu2  ;;  %v3772_v62 = vadd.f32 %v3771_v33, %v8076_v8 }
 0x3d2   : > { %v3753_v60 = vadd.f32 %v3752_v10, %v8074_v26 }
 0x3d3   : > { %v3895_v11 = vmax.f32 %v3772_v62, 0.0  ;;  %v8879_v62 = vld [vmem:[#allocation34_spill] sm:$0xff] }
 0x3d4   : > { %v3894_v2 = vmax.f32 %v3753_v60, 0.0 }
 0x3d7   : > { %v3714_v50 = vpop.f32.mrf.mxu0  ;;  %v3733_v52 = vpop.f32.mrf.mxu1  ;;  %5379 = vmatmul.msk.bf16.gmra.mxu2 %vm3171_vm0, %v8145_v48 }
 0x3d8   : > { %v3715_v27 = vadd.f32 %v3714_v50, %v8070_v25  ;;  %v3734_v31 = vadd.f32 %v3733_v52, %v8072_v37  ;;  %v3712_v25 = vadd.f32 %v3711_v3, %v8058_v12  ;;  %v3731_v37 = vadd.f32 %v3730_v17, %v8869_v38  ;;  %v3773_v0 = vpop.f32.mrf.mxu3  ;;  %v8881_v38 = vld [vmem:[#allocation28_spill] sm:$0xff] }
 0x3d9   : > { %v3754_v58 = vpop.f32.mrf.mxu2  ;;  %v3774_v8 = vadd.f32 %v3773_v0, %v8875_v7  ;;  %v3931_v3 = vpack.c.bf16 %v3879_v39, %v3863_v34  ;;  %v8887_v7 = vld [vmem:[#allocation38_spill] sm:$0xff] }
 0x3da   : > { %v3755_v26 = vadd.f32 %v3754_v58, %v8874_v55  ;;  %v3892_v54 = vmax.f32 %v3715_v27, 0.0  ;;  %v3893_v51 = vmax.f32 %v3734_v31, 0.0  ;;  %v3876_v63 = vmax.f32 %v3712_v25, 0.0  ;;  %v8877_v31 = vld [vmem:[#allocation26_spill] sm:$0xff]  ;;  %v8886_v55 = vld [vmem:[#allocation37_spill] sm:$0xff] }
 0x3db   : > { %5381 = vmatmul.msk.bf16.gmra.mxu3 %vm3171_vm0, %v8145_v48  ;;  %v3911_v41 = vmax.f32 %v3774_v8, 0.0  ;;  %v3877_v28 = vmax.f32 %v3731_v37, 0.0 }
 0x3dc   : > { %v3910_v29 = vmax.f32 %v3755_v26, 0.0  ;;  %v3928_v36 = vpack.c.bf16 %v3876_v63, %v3860_v59  ;;  %v8891_v63 = vld [vmem:[#allocation40_spill] sm:$0xff] }
 0x3dd   : > { %5375 = vmatmul.msk.bf16.gmra.mxu0 %vm3171_vm0, %v8145_v48  ;;  %5377 = vmatmul.msk.bf16.gmra.mxu1 %vm3171_vm0, %v8145_v48  ;;  %v3947_v16 = vpack.c.bf16 %v3911_v41, %v3895_v11  ;;  %v3929_v21 = vpack.c.bf16 %v3877_v28, %v3861_v18 }
 0x3de   : > { %v3946_v4 = vpack.c.bf16 %v3910_v29, %v3894_v2  ;;  %v8889_v2 = vld [vmem:[#allocation32_spill] sm:$0xff]  ;;  %v8890_v29 = vld [vmem:[#allocation39_spill] sm:$0xff] }
 0x3df   : > { %v3716_v40 = vpop.f32.mrf.mxu0  ;;  %v3735_v1 = vpop.f32.mrf.mxu1  ;;  %4183 = vmatpush.bf16.msra.mxu3 %v3947_v16 }
 0x3e0   : > { %v3717_v32 = vadd.f32 %v3716_v40, %v8870_v14  ;;  %v3736_v13 = vadd.f32 %v3735_v1, %v8871_v6  ;;  %4164 = vmatpush.bf16.msra.mxu2 %v3946_v4  ;;  %v8880_v1 = vld [vmem:[#allocation27_spill] sm:$0xff]  ;;  %v8883_v6 = vld [vmem:[#allocation36_spill] sm:$0xff] }
 0x3e1   : > { %v3823_v44 = vpop.f32.mrf.mxu2  ;;  %v8882_v14 = vld [vmem:[#allocation35_spill] sm:$0xff] }
 0x3e2   : > { %v3908_v22 = vmax.f32 %v3717_v32, 0.0  ;;  %v3909_v12 = vmax.f32 %v3736_v13, 0.0  ;;  %v3824_v25 = vadd.f32 %v3823_v44, %v8880_v1 }
 0x3e3   : > { %v3842_v5 = vpop.f32.mrf.mxu3  ;;  %4184 = vmatpush.bf16.msra.mxu3 %v3931_v3 }
 0x3e4   : > { %v3944_v19 = vpack.c.bf16 %v3908_v22, %v3892_v54  ;;  %v3945_v57 = vpack.c.bf16 %v3909_v12, %v3893_v51  ;;  %4165 = vmatpush.bf16.msra.mxu2 %v3930_v9  ;;  %v3843_v37 = vadd.f32 %v3842_v5, %v8881_v38  ;;  %v8888_v22 = vld [vmem:[#allocation31_spill] sm:$0xff] }
 0x3e6   : > { %4126 = vmatpush.bf16.msra.mxu0 %v3944_v19  ;;  %4145 = vmatpush.bf16.msra.mxu1 %v3945_v57 }
 0x3e7   : > { %v3785_v35 = vpop.f32.mrf.mxu0  ;;  %v3804_v20 = vpop.f32.mrf.mxu1  ;;  %5386 = vmatmul.msk.bf16.vlgmr.msra.gmra.mxu2 %vm3171_vm0, %v8135_v46 }
 0x3e8   : > { %v3786_v27 = vadd.f32 %v3785_v35, %v8876_v47  ;;  %v3805_v15 = vadd.f32 %v3804_v20, %v8877_v31 }
 0x3e9   : > { %v3825_v24 = vpop.f32.mrf.mxu2 }
 0x3ea   : > { %4127 = vmatpush.bf16.msra.mxu0 %v3928_v36  ;;  %4146 = vmatpush.bf16.msra.mxu1 %v3929_v21  ;;  %v3826_v12 = vadd.f32 %v3825_v24, %v8888_v22  ;;  %v3864_v9 = vmax.f32 %v3786_v27, 0.0  ;;  %v3865_v3 = vmax.f32 %v3805_v15, 0.0 }
 0x3eb   : > { %5388 = vmatmul.msk.bf16.vlgmr.msra.gmra.mxu3 %vm3171_vm0, %v8135_v46  ;;  %v3844_v50 = vpop.f32.mrf.mxu3 }
 0x3ec   : > { %v3845_v11 = vadd.f32 %v3844_v50, %v8889_v2  ;;  %v3882_v36 = vmax.f32 %v3826_v12, 0.0 }
 0x3ed   : > { %5382 = vmatmul.msk.bf16.vlgmr.msra.gmra.mxu0 %vm3171_vm0, %v8135_v46  ;;  %5384 = vmatmul.msk.bf16.vlgmr.msra.gmra.mxu1 %vm3171_vm0, %v8135_v46 }
 0x3ee   : > { %v3883_v21 = vmax.f32 %v3845_v11, 0.0 }
 0x3ef   : > { %v3787_v17 = vpop.f32.mrf.mxu0  ;;  %v3806_v53 = vpop.f32.mrf.mxu1 }
 0x3f0   : > { %v3788_v49 = vadd.f32 %v3787_v17, %v8884_v61  ;;  %v3807_v43 = vadd.f32 %v3806_v53, %v8885_v42  ;;  %v3866_v17 = vmax.f32 %v3824_v25, 0.0  ;;  %v3867_v53 = vmax.f32 %v3843_v37, 0.0 }
 0x3f1   : > { %v3828_v33 = vpop.f32.mrf.mxu2 }
 0x3f2   : > { %v3829_v32 = vadd.f32 %v3828_v33, %v8882_v14  ;;  %v3880_v23 = vmax.f32 %v3788_v49, 0.0  ;;  %v3881_v34 = vmax.f32 %v3807_v43, 0.0 }
 0x3f3   : > { %v3847_v56 = vpop.f32.mrf.mxu3 }
 0x3f4   : > { %v3848_v13 = vadd.f32 %v3847_v56, %v8883_v6  ;;  %v3898_v4 = vmax.f32 %v3829_v32, 0.0  ;;  %v3932_v24 = vpack.c.bf16 %v3880_v23, %v3864_v9  ;;  %v3933_v50 = vpack.c.bf16 %v3881_v34, %v3865_v3  ;;  %v8254_v9 = vld [vmem:[%s8791_s7] sm:$0x1] }
 0x3f6   : > { %v3899_v16 = vmax.f32 %v3848_v13, 0.0 }
 0x3f7   : > { %v3790_v52 = vpop.f32.mrf.mxu0  ;;  %v3809_v10 = vpop.f32.mrf.mxu1  ;;  %5387 = vmatmul.msk.bf16.gmra.mxu2 %vm3171_vm0, %v8145_v48 }
 0x3f8   : > { %v3791_v60 = vadd.f32 %v3790_v52, %v8878_v45  ;;  %v3810_v40 = vadd.f32 %v3809_v10, %v8879_v62  ;;  %v3934_v52 = vpack.c.bf16 %v3882_v36, %v3866_v17  ;;  %v3935_v10 = vpack.c.bf16 %v3883_v21, %v3867_v53 }
 0x3f9   : > { %v3830_v54 = vpop.f32.mrf.mxu2 }
 0x3fa   : > { %v3831_v41 = vadd.f32 %v3830_v54, %v8890_v29  ;;  %v3896_v19 = vmax.f32 %v3791_v60, 0.0  ;;  %v3897_v57 = vmax.f32 %v3810_v40, 0.0 }
 0x3fb   : > { %5389 = vmatmul.msk.bf16.gmra.mxu3 %vm3171_vm0, %v8145_v48  ;;  %v3849_v51 = vpop.f32.mrf.mxu3 }
 0x3fc   : > { %v3850_v28 = vadd.f32 %v3849_v51, %v8891_v63  ;;  %v3914_v59 = vmax.f32 %v3831_v41, 0.0 }
 0x3fd   : > { %5383 = vmatmul.msk.bf16.gmra.mxu0 %vm3171_vm0, %v8145_v48  ;;  %5385 = vmatmul.msk.bf16.gmra.mxu1 %vm3171_vm0, %v8145_v48 }
 0x3fe   : > { %v3915_v18 = vmax.f32 %v3850_v28, 0.0  ;;  %v3950_v44 = vpack.c.bf16 %v3914_v59, %v3898_v4 }
 0x3ff   : > { %v3792_v58 = vpop.f32.mrf.mxu0  ;;  %v3811_v0 = vpop.f32.mrf.mxu1 }
 0x400   : > { %v3793_v26 = vadd.f32 %v3792_v58, %v8886_v55  ;;  %v3812_v8 = vadd.f32 %v3811_v0, %v8887_v7  ;;  %v3951_v5 = vpack.c.bf16 %v3915_v18, %v3899_v16  ;;  %4240 = vmatpush.bf16.msrb.mxu2 %v3950_v44 }
 0x402   : > { %v3912_v30 = vmax.f32 %v3793_v26, 0.0  ;;  %v3913_v39 = vmax.f32 %v3812_v8, 0.0  ;;  %4259 = vmatpush.bf16.msrb.mxu3 %v3951_v5 }
 0x404   : > { %v3948_v35 = vpack.c.bf16 %v3912_v30, %v3896_v19  ;;  %v3949_v20 = vpack.c.bf16 %v3913_v39, %v3897_v57  ;;  %4241 = vmatpush.bf16.msrb.mxu2 %v3934_v52 }
 0x406   : > { %4202 = vmatpush.bf16.msrb.mxu0 %v3948_v35  ;;  %4221 = vmatpush.bf16.msrb.mxu1 %v3949_v20 }
 0x407   : > { %4260 = vmatpush.bf16.msrb.mxu3 %v3935_v10  ;;  %5394 = vmatmul.msk.bf16.vlgmr.msrb.gmra.mxu2 %vm3171_vm0, %v8135_v46 }
 0x40a   : > { %4203 = vmatpush.bf16.msrb.mxu0 %v3932_v24  ;;  %4222 = vmatpush.bf16.msrb.mxu1 %v3933_v50 }
 0x40b   : > { %5396 = vmatmul.msk.bf16.vlgmr.msrb.gmra.mxu3 %vm3171_vm0, %v8135_v46 }
 0x40d   : > { %5390 = vmatmul.msk.bf16.vlgmr.msrb.gmra.mxu0 %vm3171_vm0, %v8135_v46  ;;  %5392 = vmatmul.msk.bf16.vlgmr.msrb.gmra.mxu1 %vm3171_vm0, %v8135_v46 }
 0x417   : > { %5395 = vmatmul.msk.bf16.gmra.mxu2 %vm3171_vm0, %v8145_v48 }
 0x41b   : > { %5397 = vmatmul.msk.bf16.gmra.mxu3 %vm3171_vm0, %v8145_v48 }
 0x41d   : > { %5391 = vmatmul.msk.bf16.gmra.mxu0 %vm3171_vm0, %v8145_v48  ;;  %5393 = vmatmul.msk.bf16.gmra.mxu1 %vm3171_vm0, %v8145_v48 }
 0x42a   : > { %v3977_v33 = vpop.f32.mrf.mxu0  ;;  %v3996_v56 = vpop.f32.mrf.mxu1 }
 0x42b   : > { %v4015_v47 = vpop.f32.mrf.mxu2  ;;  %v4272_v13 = vmax.f32 %v3977_v33, 0.0  ;;  %v4273_v48 = vmax.f32 %v3996_v56, 0.0 }
 0x42c   : > { %v4274_v63 = vmax.f32 %v4015_v47, 0.0 }
 0x42e   : > { %v4034_v27 = vpop.f32.mrf.mxu3 }
 0x42f   : > { %v4275_v28 = vmax.f32 %v4034_v27, 0.0 }
 0x432   : > { %v3979_v31 = vpop.f32.mrf.mxu0  ;;  %v3998_v15 = vpop.f32.mrf.mxu1 }
 0x433   : > { %v4017_v45 = vpop.f32.mrf.mxu2  ;;  %v4288_v58 = vmax.f32 %v3979_v31, 0.0  ;;  %v4289_v0 = vmax.f32 %v3998_v15, 0.0 }
 0x434   : > { %v4290_v2 = vmax.f32 %v4017_v45, 0.0 }
 0x435   : > { %v4337_v42 = vpack.c.bf16 %v4288_v58, %v4272_v13  ;;  %v4338_v43 = vpack.c.bf16 %v4289_v0, %v4273_v48 }
 0x436   : > { %v4036_v46 = vpop.f32.mrf.mxu3  ;;  %v4339_v19 = vpack.c.bf16 %v4290_v2, %v4274_v63 }
 0x437   : > { %v4291_v11 = vmax.f32 %v4036_v46, 0.0 }
 0x439   : > { %v4340_v57 = vpack.c.bf16 %v4291_v11, %v4275_v28 }
 0x43a   : > { %v3982_v60 = vpop.f32.mrf.mxu0  ;;  %v4001_v62 = vpop.f32.mrf.mxu1 }
 0x43b   : > { %v4304_v40 = vmax.f32 %v3982_v60, 0.0  ;;  %v4305_v1 = vmax.f32 %v4001_v62, 0.0  ;;  %v4020_v25 = vpop.f32.mrf.mxu2 }
 0x43c   : > { %v4306_v7 = vmax.f32 %v4020_v25, 0.0 }
 0x43e   : > { %v4039_v38 = vpop.f32.mrf.mxu3 }
 0x43f   : > { %v4307_v8 = vmax.f32 %v4039_v38, 0.0 }
 0x442   : > { %v3984_v37 = vpop.f32.mrf.mxu0  ;;  %v4003_v14 = vpop.f32.mrf.mxu1 }
 0x443   : > { %v4320_v32 = vmax.f32 %v3984_v37, 0.0  ;;  %v4321_v6 = vmax.f32 %v4003_v14, 0.0  ;;  %v4022_v55 = vpop.f32.mrf.mxu2 }
 0x444   : > { %v4322_v54 = vmax.f32 %v4022_v55, 0.0 }
 0x445   : > { %v4353_v61 = vpack.c.bf16 %v4320_v32, %v4304_v40  ;;  %v4354_v49 = vpack.c.bf16 %v4321_v6, %v4305_v1 }
 0x446   : > { %v4041_v26 = vpop.f32.mrf.mxu3  ;;  %v4355_v29 = vpack.c.bf16 %v4322_v54, %v4306_v7 }
 0x447   : > { %4378 = vmatpush.bf16.msra.mxu0 %v4353_v61  ;;  %4391 = vmatpush.bf16.msra.mxu1 %v4354_v49  ;;  %v4323_v51 = vmax.f32 %v4041_v26, 0.0 }
 0x448   : > { %4404 = vmatpush.bf16.msra.mxu2 %v4355_v29 }
 0x449   : > { %v4356_v41 = vpack.c.bf16 %v4323_v51, %v4307_v8 }
 0x44a   : > { %v4053_v22 = vpop.f32.mrf.mxu0  ;;  %v4072_v12 = vpop.f32.mrf.mxu1 }
 0x44b   : > { %4379 = vmatpush.bf16.msra.mxu0 %v4337_v42  ;;  %4392 = vmatpush.bf16.msra.mxu1 %v4338_v43  ;;  %v4091_v30 = vpop.f32.mrf.mxu2  ;;  %v4276_v53 = vmax.f32 %v4053_v22, 0.0  ;;  %v4277_v24 = vmax.f32 %v4072_v12, 0.0 }
 0x44c   : > { %4417 = vmatpush.bf16.msra.mxu3 %v4356_v41  ;;  %4405 = vmatpush.bf16.msra.mxu2 %v4339_v19  ;;  %v4278_v14 = vmax.f32 %v4091_v30, 0.0 }
 0x44e   : > { %v4110_v39 = vpop.f32.mrf.mxu3  ;;  %5398 = vmatmul.msk.bf16.vlgmr.msra.gmra.mxu0 %vm3171_vm0, %v8254_v9  ;;  %5399 = vmatmul.msk.bf16.vlgmr.msra.gmra.mxu1 %vm3171_vm0, %v8254_v9 }
 0x44f   : > { %5400 = vmatmul.msk.bf16.vlgmr.msra.gmra.mxu2 %vm3171_vm0, %v8254_v9  ;;  %v4279_v32 = vmax.f32 %v4110_v39, 0.0 }
 0x450   : > { %4418 = vmatpush.bf16.msra.mxu3 %v4340_v57 }
 0x452   : > { %v4055_v4 = vpop.f32.mrf.mxu0  ;;  %v4074_v16 = vpop.f32.mrf.mxu1 }
 0x453   : > { %v4093_v59 = vpop.f32.mrf.mxu2  ;;  %5401 = vmatmul.msk.bf16.vlgmr.msra.gmra.mxu3 %vm3171_vm0, %v8254_v9  ;;  %v4292_v50 = vmax.f32 %v4055_v4, 0.0  ;;  %v4293_v52 = vmax.f32 %v4074_v16, 0.0 }
 0x454   : > { %v4294_v1 = vmax.f32 %v4093_v59, 0.0 }
 0x455   : > { %v4341_v56 = vpack.c.bf16 %v4292_v50, %v4276_v53  ;;  %v4342_v47 = vpack.c.bf16 %v4293_v52, %v4277_v24 }
 0x456   : > { %v4112_v18 = vpop.f32.mrf.mxu3  ;;  %v4343_v6 = vpack.c.bf16 %v4294_v1, %v4278_v14 }
 0x457   : > { %v4295_v25 = vmax.f32 %v4112_v18, 0.0 }
 0x459   : > { %v4344_v13 = vpack.c.bf16 %v4295_v25, %v4279_v32 }
 0x45a   : > { %v4058_v23 = vpop.f32.mrf.mxu0  ;;  %v4077_v34 = vpop.f32.mrf.mxu1 }
 0x45b   : > { %v4308_v35 = vmax.f32 %v4058_v23, 0.0  ;;  %v4309_v20 = vmax.f32 %v4077_v34, 0.0  ;;  %v4096_v36 = vpop.f32.mrf.mxu2 }
 0x45c   : > { %v4310_v15 = vmax.f32 %v4096_v36, 0.0 }
 0x45e   : > { %v4115_v21 = vpop.f32.mrf.mxu3 }
 0x45f   : > { %v4311_v45 = vmax.f32 %v4115_v21, 0.0 }
 0x462   : > { %v4060_v44 = vpop.f32.mrf.mxu0  ;;  %v4079_v5 = vpop.f32.mrf.mxu1 }
 0x463   : > { %v4324_v3 = vmax.f32 %v4060_v44, 0.0  ;;  %v4325_v17 = vmax.f32 %v4079_v5, 0.0  ;;  %v4098_v27 = vpop.f32.mrf.mxu2 }
 0x464   : > { %v4326_v46 = vmax.f32 %v4098_v27, 0.0 }
 0x465   : > { %v4357_v10 = vpack.c.bf16 %v4324_v3, %v4308_v35  ;;  %v4358_v33 = vpack.c.bf16 %v4325_v17, %v4309_v20 }
 0x466   : > { %v4117_v31 = vpop.f32.mrf.mxu3  ;;  %v4359_v38 = vpack.c.bf16 %v4326_v46, %v4310_v15 }
 0x467   : > { %4430 = vmatpush.bf16.msrb.mxu0 %v4357_v10  ;;  %4443 = vmatpush.bf16.msrb.mxu1 %v4358_v33  ;;  %v4327_v60 = vmax.f32 %v4117_v31, 0.0 }
 0x468   : > { %4456 = vmatpush.bf16.msrb.mxu2 %v4359_v38 }
 0x469   : > { %v4360_v37 = vpack.c.bf16 %v4327_v60, %v4311_v45 }
 0x46a   : > { %v4129_v62 = vpop.f32.mrf.mxu0  ;;  %v4148_v40 = vpop.f32.mrf.mxu1 }
 0x46b   : > { %4431 = vmatpush.bf16.msrb.mxu0 %v4341_v56  ;;  %4444 = vmatpush.bf16.msrb.mxu1 %v4342_v47  ;;  %v4167_v48 = vpop.f32.mrf.mxu2  ;;  %v4280_v11 = vmax.f32 %v4129_v62, 0.0  ;;  %v4281_v29 = vmax.f32 %v4148_v40, 0.0 }
 0x46c   : > { %4469 = vmatpush.bf16.msrb.mxu3 %v4360_v37  ;;  %4457 = vmatpush.bf16.msrb.mxu2 %v4343_v6  ;;  %v4282_v5 = vmax.f32 %v4167_v48, 0.0 }
 0x46e   : > { %v4186_v58 = vpop.f32.mrf.mxu3  ;;  %5402 = vmatmul.msk.bf16.vlgmr.msrb.gmra.mxu0 %vm3171_vm0, %v8254_v9  ;;  %5403 = vmatmul.msk.bf16.vlgmr.msrb.gmra.mxu1 %vm3171_vm0, %v8254_v9 }
 0x46f   : > { %5404 = vmatmul.msk.bf16.vlgmr.msrb.gmra.mxu2 %vm3171_vm0, %v8254_v9  ;;  %v4283_v3 = vmax.f32 %v4186_v58, 0.0 }
 0x470   : > { %4470 = vmatpush.bf16.msrb.mxu3 %v4344_v13 }
 0x472   : > { %v4131_v0 = vpop.f32.mrf.mxu0  ;;  %v4150_v61 = vpop.f32.mrf.mxu1 }
 0x473   : > { %5405 = vmatmul.msk.bf16.vlgmr.msrb.gmra.mxu3 %vm3171_vm0, %v8254_v9  ;;  %v4169_v49 = vpop.f32.mrf.mxu2  ;;  %v4296_v41 = vmax.f32 %v4131_v0, 0.0  ;;  %v4297_v63 = vmax.f32 %v4150_v61, 0.0 }
 0x474   : > { %v4298_v20 = vmax.f32 %v4169_v49, 0.0 }
 0x475   : > { %v4345_v57 = vpack.c.bf16 %v4296_v41, %v4280_v11  ;;  %v4346_v30 = vpack.c.bf16 %v4297_v63, %v4281_v29 }
 0x476   : > { %v4188_v42 = vpop.f32.mrf.mxu3  ;;  %v4347_v17 = vpack.c.bf16 %v4298_v20, %v4282_v5 }
 0x477   : > { %v4299_v36 = vmax.f32 %v4188_v42, 0.0 }
 0x479   : > { %v4348_v53 = vpack.c.bf16 %v4299_v36, %v4283_v3 }
 0x47a   : > { %v4134_v43 = vpop.f32.mrf.mxu0  ;;  %v4153_v55 = vpop.f32.mrf.mxu1 }
 0x47b   : > { %v4312_v26 = vmax.f32 %v4134_v43, 0.0  ;;  %v4313_v7 = vmax.f32 %v4153_v55, 0.0  ;;  %v4172_v8 = vpop.f32.mrf.mxu2 }
 0x47c   : > { %v4314_v16 = vmax.f32 %v4172_v8, 0.0 }
 0x47e   : > { %v4191_v54 = vpop.f32.mrf.mxu3 }
 0x47f   : > { %v4315_v59 = vmax.f32 %v4191_v54, 0.0 }
 0x482   : > { %v4136_v51 = vpop.f32.mrf.mxu0  ;;  %v4155_v22 = vpop.f32.mrf.mxu1 }
 0x483   : > { %v4328_v12 = vmax.f32 %v4136_v51, 0.0  ;;  %v4329_v2 = vmax.f32 %v4155_v22, 0.0  ;;  %v4174_v39 = vpop.f32.mrf.mxu2 }
 0x484   : > { %v4330_v18 = vmax.f32 %v4174_v39, 0.0 }
 0x485   : > { %v4361_v28 = vpack.c.bf16 %v4328_v12, %v4312_v26  ;;  %v4362_v19 = vpack.c.bf16 %v4329_v2, %v4313_v7 }
 0x486   : > { %v4193_v4 = vpop.f32.mrf.mxu3  ;;  %v4363_v21 = vpack.c.bf16 %v4330_v18, %v4314_v16 }
 0x487   : > { %4482 = vmatpush.bf16.msra.mxu0 %v4361_v28  ;;  %4495 = vmatpush.bf16.msra.mxu1 %v4362_v19  ;;  %v4331_v23 = vmax.f32 %v4193_v4, 0.0 }
 0x488   : > { %4508 = vmatpush.bf16.msra.mxu2 %v4363_v21 }
 0x489   : > { %v4364_v44 = vpack.c.bf16 %v4331_v23, %v4315_v59 }
 0x48a   : > { %v4205_v34 = vpop.f32.mrf.mxu0  ;;  %v4224_v35 = vpop.f32.mrf.mxu1 }
 0x48b   : > { %4483 = vmatpush.bf16.msra.mxu0 %v4345_v57  ;;  %4496 = vmatpush.bf16.msra.mxu1 %v4346_v30  ;;  %v4243_v24 = vpop.f32.mrf.mxu2  ;;  %v4284_v25 = vmax.f32 %v4205_v34, 0.0  ;;  %v4285_v38 = vmax.f32 %v4224_v35, 0.0 }
 0x48c   : > { %4521 = vmatpush.bf16.msra.mxu3 %v4364_v44  ;;  %4509 = vmatpush.bf16.msra.mxu2 %v4347_v17  ;;  %v4286_v54 = vmax.f32 %v4243_v24, 0.0 }
 0x48e   : > { %5406 = vmatmul.msk.bf16.vlgmr.msra.gmra.mxu0 %vm3171_vm0, %v8254_v9  ;;  %5407 = vmatmul.msk.bf16.vlgmr.msra.gmra.mxu1 %vm3171_vm0, %v8254_v9  ;;  %v4262_v50 = vpop.f32.mrf.mxu3 }
 0x48f   : > { %5408 = vmatmul.msk.bf16.vlgmr.msra.gmra.mxu2 %vm3171_vm0, %v8254_v9  ;;  %v4287_v51 = vmax.f32 %v4262_v50, 0.0 }
 0x490   : > { %4522 = vmatpush.bf16.msra.mxu3 %v4348_v53 }
 0x492   : > { %v4207_v52 = vpop.f32.mrf.mxu0  ;;  %v4226_v10 = vpop.f32.mrf.mxu1 }
 0x493   : > { %5409 = vmatmul.msk.bf16.vlgmr.msra.gmra.mxu3 %vm3171_vm0, %v8254_v9  ;;  %v4245_v33 = vpop.f32.mrf.mxu2  ;;  %v4300_v37 = vmax.f32 %v4207_v52, 0.0  ;;  %v4301_v14 = vmax.f32 %v4226_v10, 0.0 }
 0x494   : > { %v4302_v55 = vmax.f32 %v4245_v33, 0.0 }
 0x495   : > { %v4349_v13 = vpack.c.bf16 %v4300_v37, %v4284_v25  ;;  %v4350_v48 = vpack.c.bf16 %v4301_v14, %v4285_v38 }
 0x496   : > { %v4264_v56 = vpop.f32.mrf.mxu3  ;;  %v4351_v22 = vpack.c.bf16 %v4302_v55, %v4286_v54 }
 0x497   : > { %v4303_v26 = vmax.f32 %v4264_v56, 0.0 }
 0x499   : > { %v4352_v12 = vpack.c.bf16 %v4303_v26, %v4287_v51 }
 0x49a   : > { %v4210_v47 = vpop.f32.mrf.mxu0  ;;  %v4229_v27 = vpop.f32.mrf.mxu1 }
 0x49b   : > { %v4316_v31 = vmax.f32 %v4210_v47, 0.0  ;;  %v4317_v15 = vmax.f32 %v4229_v27, 0.0  ;;  %v4248_v45 = vpop.f32.mrf.mxu2 }
 0x49c   : > { %v4318_v61 = vmax.f32 %v4248_v45, 0.0 }
 0x49e   : > { %v4267_v46 = vpop.f32.mrf.mxu3 }
 0x49f   : > { %v4319_v49 = vmax.f32 %v4267_v46, 0.0 }
 0x4a2   : > { %v4212_v60 = vpop.f32.mrf.mxu0  ;;  %v4231_v62 = vpop.f32.mrf.mxu1 }
 0x4a3   : > { %v4332_v40 = vmax.f32 %v4212_v60, 0.0  ;;  %v4333_v1 = vmax.f32 %v4231_v62, 0.0  ;;  %v4250_v58 = vpop.f32.mrf.mxu2 }
 0x4a4   : > { %v4334_v42 = vmax.f32 %v4250_v58, 0.0 }
 0x4a5   : > { %v4365_v32 = vpack.c.bf16 %v4332_v40, %v4316_v31  ;;  %v4366_v6 = vpack.c.bf16 %v4333_v1, %v4317_v15 }
 0x4a6   : > { %v4269_v0 = vpop.f32.mrf.mxu3  ;;  %v4367_v7 = vpack.c.bf16 %v4334_v42, %v4318_v61 }
 0x4a7   : > { %4534 = vmatpush.bf16.msrb.mxu0 %v4365_v32  ;;  %4547 = vmatpush.bf16.msrb.mxu1 %v4366_v6  ;;  %v4335_v43 = vmax.f32 %v4269_v0, 0.0 }
 0x4a8   : > { %4560 = vmatpush.bf16.msrb.mxu2 %v4367_v7 }
 0x4a9   : > { %v4368_v8 = vpack.c.bf16 %v4335_v43, %v4319_v49 }
 0x4ab   : > { %4535 = vmatpush.bf16.msrb.mxu0 %v4349_v13  ;;  %4548 = vmatpush.bf16.msrb.mxu1 %v4350_v48 }
 0x4ac   : > { %4573 = vmatpush.bf16.msrb.mxu3 %v4368_v8  ;;  %4561 = vmatpush.bf16.msrb.mxu2 %v4351_v22 }
 0x4ae   : > { %5410 = vmatmul.msk.bf16.vlgmr.msrb.gmra.mxu0 %vm3171_vm0, %v8254_v9  ;;  %5411 = vmatmul.msk.bf16.vlgmr.msrb.gmra.mxu1 %vm3171_vm0, %v8254_v9 }
 0x4af   : > { %5412 = vmatmul.msk.bf16.vlgmr.msrb.gmra.mxu2 %vm3171_vm0, %v8254_v9 }
 0x4b0   : > { %4574 = vmatpush.bf16.msrb.mxu3 %v4352_v12 }
 0x4b3   : > { %5413 = vmatmul.msk.bf16.vlgmr.msrb.gmra.mxu3 %vm3171_vm0, %v8254_v9 }
 0x4cb   : > { %v4381_v2 = vpop.f32.mrf.mxu0  ;;  %v4394_v11 = vpop.f32.mrf.mxu1 }
 0x4cc   : > { %v5415_v39 = vmul.f32 -10.0, %v4394_v11  ;;  %v5414_v9 = vmul.f32 -10.0, %v4381_v2 }
 0x4ce   : > { %v4630_v18 = vmul.f32 1.442695, %v5415_v39  ;;  %v4628_v44 = vmul.f32 1.442695, %v5414_v9 }
 0x4d0   : > { %5547 = vpow2.f32 %v4630_v18 }
 0x4d2   : > { %v4407_v29 = vpop.f32.mrf.mxu2 }
 0x4d3   : > { %v4383_v63 = vpop.f32.mrf.mxu0  ;;  %v4396_v28 = vpop.f32.mrf.mxu1  ;;  %v5416_v16 = vmul.f32 -10.0, %v4407_v29 }
 0x4d5   : > { %v4632_v35 = vmul.f32 1.442695, %v5416_v16 }
 0x4d6   : > { %v4420_v41 = vpop.f32.mrf.mxu3  ;;  %v5548_v17 = vpop.eup %5547 }
 0x4d7   : > { %v5417_v59 = vmul.f32 -10.0, %v4420_v41  ;;  %5549 = vpow2.f32 %v4632_v35  ;;  %v8288_v52 = vadd.f32 1.0, %v5548_v17 }
 0x4d9   : > { %v4634_v36 = vmul.f32 1.442695, %v5417_v59  ;;  %v4702_v2 = vand.u32 2147483648, %v8288_v52  ;;  %vm4696_vm0 = vweird.f32 %v8288_v52  ;;  %v4700_v16 = vand.u32 2147483647, %v8288_v52 }
 0x4da   : > { %v4409_v19 = vpop.f32.mrf.mxu2 }
 0x4db   : > { %5551 = vpow2.f32 %v4634_v36  ;;  %v4703_v59 = vor.u32 1.1754944e-38, %v4702_v2  ;;  %vm8368_vm1 = vcmp.eq.f32.partialorder %v4700_v16, 8.507059e+37 }
 0x4dc   : > { %5553 = vpow2.f32 %v4628_v44 }
 0x4dd   : > { %v5550_v24 = vpop.eup %5549  ;;  %5555 = vrcp.f32 %v8288_v52 }
 0x4de   : > { %v4422_v57 = vpop.f32.mrf.mxu3  ;;  %v8290_v47 = vadd.f32 1.0, %v5550_v24 }
 0x4e0   : > { %vm4711_vm3 = vweird.f32 %v8290_v47 }
 0x4e1   : > { %v5552_v50 = vpop.eup %5551 }
 0x4e2   : > { %v8292_v31 = vadd.f32 1.0, %v5552_v50  ;;  %v5554_v45 = vpop.eup %5553 }
 0x4e3   : > { %v8297_v62 = vadd.f32 1.0, %v5554_v45  ;;  %v8299_v25 = vpop.eup %5555 }
 0x4e4   : > { %v4692_v48 = vmul.f32 %v8299_v25, %v8288_v52  ;;  %vm4697_vm7 = vweird.f32 %v8299_v25  ;;  %vm4726_vm11 = vweird.f32 %v8292_v31  ;;  %v4730_v50 = vand.u32 2147483647, %v8292_v31 }
 0x4e5   : > { %v4685_v39 = vand.u32 2147483647, %v8297_v62  ;;  %vm8347_vm15 = vmor %vm4696_vm0, %vm4697_vm7  ;;  %v4732_v52 = vand.u32 2147483648, %v8292_v31  ;;  %vm4681_vm13 = vweird.f32 %v8297_v62 }
 0x4e6   : > { %v4693_v7 = vsub.f32 1.0, %v4692_v48  ;;  %vm8413_vm4 = vcmp.eq.f32.partialorder %v4730_v50, 8.507059e+37 }
 0x4e8   : > { %v4694_v28 = vmul.f32 %v8299_v25, %v4693_v7 }
 0x4eb   : > { %v4433_v30 = vpop.f32.mrf.mxu0  ;;  %v4446_v4 = vpop.f32.mrf.mxu1 }
 0x4ec   : > { %v5418_v53 = vmul.f32 -10.0, %v4433_v30  ;;  %v5419_v10 = vmul.f32 -10.0, %v4446_v4 }
 0x4ee   : > { %v4636_v33 = vmul.f32 1.442695, %v5418_v53  ;;  %v4638_v15 = vmul.f32 1.442695, %v5419_v10 }
 0x4f0   : > { %5557 = vpow2.f32 %v4636_v33 }
 0x4f1   : > { %5559 = vrcp.f32 %v8290_v47 }
 0x4f2   : > { %v4459_v23 = vpop.f32.mrf.mxu2  ;;  %5561 = vrcp.f32 %v8292_v31 }
 0x4f3   : > { %v4435_v20 = vpop.f32.mrf.mxu0  ;;  %v4448_v21 = vpop.f32.mrf.mxu1  ;;  %v5420_v56 = vmul.f32 -10.0, %v4459_v23  ;;  %5563 = vpow2.f32 %v4638_v15 }
 0x4f4   : > { %v4695_v20 = vadd.f32 %v8299_v25, %v4694_v28 }
 0x4f5   : > { %v4640_v46 = vmul.f32 1.442695, %v5420_v56 }
 0x4f6   : > { %v4472_v34 = vpop.f32.mrf.mxu3  ;;  %v5558_v38 = vpop.eup %5557 }
 0x4f7   : > { %v5421_v27 = vmul.f32 -10.0, %v4472_v34  ;;  %5565 = vpow2.f32 %v4640_v46  ;;  %v8301_v37 = vpop.eup %5559  ;;  %v8306_v6 = vadd.f32 1.0, %v5558_v38 }
 0x4f8   : > { %v8304_v14 = vpop.eup %5561  ;;  %v4707_v43 = vmul.f32 %v8301_v37, %v8290_v47  ;;  %vm4712_vm10 = vweird.f32 %v8301_v37 }
 0x4f9   : > { %v4642_v60 = vmul.f32 1.442695, %v5421_v27  ;;  %v5564_v32 = vpop.eup %5563  ;;  %v4722_v8 = vmul.f32 %v8304_v14, %v8292_v31  ;;  %vm4727_vm6 = vweird.f32 %v8304_v14  ;;  %v4699_v27 = vsel %vm8347_vm15, %v8299_v25, %v4695_v20  ;;  %vm8376_vm14 = vmor %vm4711_vm3, %vm4712_vm10 }
 0x4fa   : > { %v4461_v5 = vpop.f32.mrf.mxu2  ;;  %v8310_v49 = vadd.f32 1.0, %v5564_v32  ;;  %v4708_v29 = vsub.f32 1.0, %v4707_v43  ;;  %vm8386_vm9 = vmor %vm4726_vm11, %vm4727_vm6  ;;  %v4747_v31 = vand.u32 2147483648, %v8306_v6  ;;  %v8403_v43 = vsel %vm8368_vm1, %v4703_v59, %v4699_v27 }
 0x4fb   : > { %5567 = vpow2.f32 %v4642_v60  ;;  %v4723_v19 = vsub.f32 1.0, %v4722_v8  ;;  %v4715_v5 = vand.u32 2147483647, %v8290_v47  ;;  %vm4741_vm8 = vweird.f32 %v8306_v6 }
 0x4fc   : > { %5569 = vrcp.f32 %v8297_v62  ;;  %v4709_v18 = vmul.f32 %v8301_v37, %v4708_v29  ;;  %vm4756_vm7 = vweird.f32 %v8310_v49  ;;  %v4760_v28 = vand.u32 2147483647, %v8310_v49 }
 0x4fd   : > { %v5566_v13 = vpop.eup %5565  ;;  %5571 = vrcp.f32 %v8306_v6  ;;  %v4724_v36 = vmul.f32 %v8304_v14, %v4723_v19  ;;  %vm8409_vm2 = vcmp.eq.f32.partialorder %v4715_v5, 8.507059e+37  ;;  %v4762_v19 = vand.u32 2147483648, %v8310_v49 }
 0x4fe   : > { %v4474_v3 = vpop.f32.mrf.mxu3  ;;  %v8317_v55 = vadd.f32 1.0, %v5566_v13  ;;  %5573 = vrcp.f32 %v8310_v49  ;;  %v8363_v33 = vadd.f32 %v8301_v37, %v4709_v18 }
 0x4ff   : > { %v4717_v3 = vand.u32 2147483648, %v8290_v47  ;;  %v8381_v46 = vadd.f32 %v8304_v14, %v4724_v36  ;;  %v4763_v25 = vor.u32 1.1754944e-38, %v4762_v19 }
 0x500   : > { %5575 = vrcp.f32 %v8317_v55  ;;  %vm4771_vm3 = vweird.f32 %v8317_v55  ;;  %v4777_v44 = vand.u32 2147483648, %v8317_v55 }
 0x501   : > { %v5568_v58 = vpop.eup %5567  ;;  %v4718_v48 = vor.u32 1.1754944e-38, %v4717_v3 }
 0x502   : > { %v8312_v42 = vpop.eup %5569  ;;  %v8321_v54 = vadd.f32 1.0, %v5568_v58  ;;  %v4733_v58 = vor.u32 1.1754944e-38, %v4732_v52 }
 0x503   : > { %v4677_v12 = vmul.f32 %v8312_v42, %v8297_v62  ;;  %v8330_v30 = vpop.eup %5571  ;;  %vm4682_vm5 = vweird.f32 %v8312_v42 }
 0x504   : > { %5577 = vrcp.f32 %v8321_v54  ;;  %v8337_v35 = vpop.eup %5573  ;;  %v4737_v9 = vmul.f32 %v8330_v30, %v8306_v6  ;;  %vm4742_vm15 = vweird.f32 %v8330_v30  ;;  %vm4786_vm1 = vweird.f32 %v8321_v54 }
 0x505   : > { %v4678_v4 = vsub.f32 1.0, %v4677_v12  ;;  %v4752_v47 = vmul.f32 %v8337_v35, %v8310_v49  ;;  %vm4757_vm10 = vweird.f32 %v8337_v35  ;;  %vm8452_vm11 = vmor %vm4741_vm8, %vm4742_vm15 }
 0x506   : > { %v8343_v21 = vpop.eup %5575  ;;  %v4738_v60 = vsub.f32 1.0, %v4737_v9 }
 0x507   : > { %v4679_v10 = vmul.f32 %v8312_v42, %v4678_v4  ;;  %v4767_v38 = vmul.f32 %v8343_v21, %v8317_v55  ;;  %v4753_v2 = vsub.f32 1.0, %v4752_v47  ;;  %vm4772_vm6 = vweird.f32 %v8343_v21 }
 0x508   : > { %vm8482_vm8 = vmor %vm4771_vm3, %vm4772_vm6 }
 0x509   : > { %v4754_v18 = vmul.f32 %v8337_v35, %v4753_v2 }
 0x50a   : > { %v8355_v24 = vpop.eup %5577 }
 0x50b   : > { %v4485_v40 = vpop.f32.mrf.mxu0  ;;  %v4498_v1 = vpop.f32.mrf.mxu1  ;;  %v4782_v32 = vmul.f32 %v8355_v24, %v8321_v54 }
 0x50c   : > { %v5423_v26 = vmul.f32 -10.0, %v4498_v1  ;;  %v5422_v23 = vmul.f32 -10.0, %v4485_v40  ;;  %v4687_v1 = vand.u32 2147483648, %v8297_v62 }
 0x50d   : > { %v4783_v29 = vsub.f32 1.0, %v4782_v32 }
 0x50e   : > { %v4646_v41 = vmul.f32 1.442695, %v5423_v26  ;;  %v4644_v56 = vmul.f32 1.442695, %v5422_v23  ;;  %v4714_v26 = vsel %vm8376_vm14, %v8301_v37, %v8363_v33  ;;  %vm4787_vm14 = vweird.f32 %v8355_v24 }
 0x50f   : > { %vm8505_vm15 = vmor %vm4786_vm1, %vm4787_vm14  ;;  %vm4952_vm1 = vcmask 1044484  }
 0x510   : > { %5579 = vpow2.f32 %v4646_v41 }
 0x512   : > { %v4511_v51 = vpop.f32.mrf.mxu2 }
 0x513   : > { %v4487_v0 = vpop.f32.mrf.mxu0  ;;  %v4500_v61 = vpop.f32.mrf.mxu1  ;;  %v5424_v11 = vmul.f32 -10.0, %v4511_v51  ;;  %v4729_v51 = vsel %vm8386_vm9, %v8304_v14, %v8381_v46  ;;  %v4748_v14 = vor.u32 1.1754944e-38, %v4747_v31  ;;  %vm8466_vm9 = vmor %vm4756_vm7, %vm4757_vm10  ;;  %v8491_v46 = vsel %vm8409_vm2, %v4718_v48, %v4714_v26 }
 0x514   : > { %v4745_v0 = vand.u32 2147483647, %v8306_v6  ;;  %v8399_v61 = vadd.f32 %v8312_v42, %v4679_v10  ;;  %vm8497_vm7 = vcmp.eq.f32.partialorder %v4760_v28, 8.507059e+37  ;;  %v4933_v2 = vrot.slane %v8491_v46, 6 }
 0x515   : > { %v4648_v57 = vmul.f32 1.442695, %v5424_v11  ;;  %v4768_v11 = vsub.f32 1.0, %v4767_v38  ;;  %v4778_v38 = vor.u32 1.1754944e-38, %v4777_v44  ;;  %vm4948_vm10 = vcmask 1042434  }
 0x516   : > { %v4524_v22 = vpop.f32.mrf.mxu3  ;;  %v5580_v40 = vpop.eup %5579  ;;  %vm8429_vm0 = vcmp.eq.f32.partialorder %v4745_v0, 8.507059e+37 }
 0x517   : > { %v5425_v63 = vmul.f32 -10.0, %v4524_v22  ;;  %5581 = vpow2.f32 %v4648_v57  ;;  %v4739_v22 = vmul.f32 %v8330_v30, %v4738_v60  ;;  %v8423_v12 = vadd.f32 1.0, %v5580_v40 }
 0x518   : > { %v4775_v57 = vand.u32 2147483647, %v8317_v55  ;;  %v4769_v23 = vmul.f32 %v8343_v21, %v4768_v11 }
 0x519   : > { %v4650_v34 = vmul.f32 1.442695, %v5425_v63  ;;  %v4740_v4 = vadd.f32 %v8330_v30, %v4739_v22 }
 0x51a   : > { %v4513_v17 = vpop.f32.mrf.mxu2  ;;  %v4770_v27 = vadd.f32 %v8343_v21, %v4769_v23  ;;  %vm8511_vm2 = vcmp.eq.f32.partialorder %v4775_v57, 8.507059e+37 }
 0x51b   : > { %5583 = vpow2.f32 %v4650_v34  ;;  %v4784_v34 = vmul.f32 %v8355_v24, %v4783_v29  ;;  %v4790_v17 = vand.u32 2147483647, %v8321_v54  ;;  %v4744_v33 = vsel %vm8452_vm11, %v8330_v30, %v4740_v4 }
 0x51c   : > { %5585 = vpow2.f32 %v4644_v56  ;;  %v4755_v56 = vadd.f32 %v8337_v35, %v4754_v18  ;;  %v8495_v30 = vsel %vm8413_vm4, %v4733_v58, %v4729_v51  ;;  %vm8519_vm4 = vmor %vm4681_vm13, %vm4682_vm5  ;;  %v8525_v32 = vsel %vm8429_vm0, %v4748_v14, %v4744_v33 }
 0x51d   : > { %v5582_v13 = vpop.eup %5581  ;;  %5587 = vrcp.f32 %v8423_v12  ;;  %v4785_v15 = vadd.f32 %v8355_v24, %v4784_v34  ;;  %vm8527_vm3 = vcmp.eq.f32.partialorder %v4790_v17, 8.507059e+37  ;;  %v4774_v0 = vsel %vm8482_vm8, %v8343_v21, %v4770_v27 }
 0x51e   : > { %v4526_v53 = vpop.f32.mrf.mxu3  ;;  %v8427_v41 = vadd.f32 1.0, %v5582_v13  ;;  %v4759_v58 = vsel %vm8466_vm9, %v8337_v35, %v4755_v56  ;;  %vm8547_vm13 = vcmp.eq.f32.partialorder %v4685_v39, 8.507059e+37  ;;  %v4688_v35 = vor.u32 1.1754944e-38, %v4687_v1 }
 0x51f   : > { %v4792_v53 = vand.u32 2147483648, %v8321_v54  ;;  %v4789_v31 = vsel %vm8505_vm15, %v8355_v24, %v4785_v15  ;;  %v4684_v24 = vsel %vm8519_vm4, %v8312_v42, %v8399_v61  ;;  %v4934_v39 = vrot.slane %v8495_v30, 5 }
 0x520   : > { %5589 = vrcp.f32 %v8427_v41  ;;  %v4935_v29 = vrot.slane %v8525_v32, 4  ;;  %v4764_v62 = vsel %vm8497_vm7, %v4763_v25, %v4759_v58  ;;  %v4779_v1 = vsel %vm8511_vm2, %v4778_v38, %v4774_v0 }
 0x521   : > { %v5584_v37 = vpop.eup %5583  ;;  %v4793_v48 = vor.u32 1.1754944e-38, %v4792_v53  ;;  %v4822_v61 = vand.u32 2147483648, %v8423_v12  ;;  %vm4816_vm5 = vweird.f32 %v8423_v12  ;;  %v4689_v56 = vsel %vm8547_vm13, %v4688_v35, %v4684_v24 }
 0x522   : > { %v8442_v16 = vadd.f32 1.0, %v5584_v37  ;;  %v5586_v59 = vpop.eup %5585  ;;  %v4932_v37 = vrot.slane %v8403_v43, 7  ;;  %vm4946_vm0 = vcmask 1040384   ;;  %vm4950_vm11 = vcmask 1041408  }
 0x523   : > { %v8470_v50 = vadd.f32 1.0, %v5586_v59  ;;  %v8487_v45 = vpop.eup %5587  ;;  %v4794_v63 = vsel %vm8527_vm3, %v4793_v48, %v4789_v31  ;;  %v8585_v17 = vor.u32 1.1754944e-38, %v4822_v61  ;;  %v4949_v15 = vsel %vm4948_vm10, %v4933_v2, %v4934_v39 }
 0x524   : > { %5591 = vrcp.f32 %v8442_v16  ;;  %v4812_v26 = vmul.f32 %v8487_v45, %v8423_v12  ;;  %v4938_v9 = vrot.slane %v4794_v63, 1  ;;  %v4947_v49 = vsel %vm4946_vm0, %v4689_v56, %v4932_v37 }
 0x525   : > { %v4805_v44 = vand.u32 2147483647, %v8470_v50  ;;  %vm4801_vm14 = vweird.f32 %v8470_v50  ;;  %v4951_v55 = vsel %vm4950_vm11, %v4947_v49, %v4949_v15  ;;  %vm4954_vm9 = vcmask 1046534  }
 0x526   : > { %v8509_v40 = vpop.eup %5589  ;;  %v4813_v42 = vsub.f32 1.0, %v4812_v26  ;;  %vm4956_vm8 = vcmask 1045508   ;;  %vm4817_vm7 = vweird.f32 %v8487_v45  ;;  %vm4831_vm15 = vweird.f32 %v8427_v41 }
 0x527   : > { %v4827_v21 = vmul.f32 %v8509_v40, %v8427_v41  ;;  %vm4832_vm2 = vweird.f32 %v8509_v40  ;;  %v4835_v0 = vand.u32 2147483647, %v8427_v41  ;;  %v4837_v31 = vand.u32 2147483648, %v8427_v41  ;;  %vm8620_vm3 = vmor %vm4816_vm5, %vm4817_vm7 }
 0x528   : > { %vm8636_vm13 = vmor %vm4831_vm15, %vm4832_vm2  ;;  %v4850_v2 = vand.u32 2147483647, %v8442_v16  ;;  %vm4846_vm5 = vweird.f32 %v8442_v16 }
 0x529   : > { %v4828_v59 = vsub.f32 1.0, %v4827_v21  ;;  %vm8651_vm15 = vcmp.eq.f32.partialorder %v4835_v0, 8.507059e+37  ;;  %v4838_v63 = vor.u32 1.1754944e-38, %v4837_v31 }
 0x52a   : > { %v8543_v51 = vpop.eup %5591 }
 0x52b   : > { %v4537_v20 = vpop.f32.mrf.mxu0  ;;  %v4550_v36 = vpop.f32.mrf.mxu1  ;;  %v4842_v43 = vmul.f32 %v8543_v51, %v8442_v16  ;;  %vm4847_vm7 = vweird.f32 %v8543_v51 }
 0x52c   : > { %v5426_v5 = vmul.f32 -10.0, %v4537_v20  ;;  %v5427_v3 = vmul.f32 -10.0, %v4550_v36  ;;  %v4936_v20 = vrot.slane %v4764_v62, 3  ;;  %v4937_v36 = vrot.slane %v4779_v1, 2  ;;  %vm8664_vm2 = vmor %vm4846_vm5, %vm4847_vm7 }
 0x52d   : > { %v4843_v33 = vsub.f32 1.0, %v4842_v43 }
 0x52e   : > { %v4652_v52 = vmul.f32 1.442695, %v5426_v5  ;;  %v4654_v10 = vmul.f32 1.442695, %v5427_v3  ;;  %v4820_v5 = vand.u32 2147483647, %v8423_v12  ;;  %v4953_v25 = vsel %vm4952_vm1, %v4935_v29, %v4936_v20 }
 0x52f   : > { %v4955_v32 = vsel %vm4954_vm9, %v4937_v36, %v4938_v9  ;;  %v4844_v35 = vmul.f32 %v8543_v51, %v4843_v33  ;;  %v4852_v29 = vand.u32 2147483648, %v8442_v16 }
 0x530   : > { %5593 = vpow2.f32 %v4652_v52  ;;  %v4814_v52 = vmul.f32 %v8487_v45, %v4813_v42  ;;  %vm8591_vm6 = vcmp.eq.f32.partialorder %v4820_v5, 8.507059e+37  ;;  %v4957_v48 = vsel %vm4956_vm8, %v4953_v25, %v4955_v32 }
 0x531   : > { %5595 = vpow2.f32 %v4654_v10  ;;  %v4829_v10 = vmul.f32 %v8509_v40, %v4828_v59  ;;  %v4958_v26 = vsel %vm8805_vm12, %v4951_v55, %v4957_v48  ;;  %v4845_v42 = vadd.f32 %v8543_v51, %v4844_v35 }
 0x532   : > { %5597 = vrcp.f32 %v8470_v50  ;;  %v4563_v19 = vpop.f32.mrf.mxu2  ;;  %v4815_v58 = vadd.f32 %v8487_v45, %v4814_v52  ;;  %4968 = vst [vmem:[%s8628_s11] sm:$0xff] %v4958_v26  ;;  %v4853_v59 = vor.u32 1.1754944e-38, %v4852_v29 }
 0x533   : > { %v4539_v7 = vpop.f32.mrf.mxu0  ;;  %v4552_v8 = vpop.f32.mrf.mxu1  ;;  %v5428_v23 = vmul.f32 -10.0, %v4563_v19  ;;  %v4830_v22 = vadd.f32 %v8509_v40, %v4829_v10  ;;  %v4849_v36 = vsel %vm8664_vm2, %v8543_v51, %v4845_v42 }
 0x534   : > { %v4819_v41 = vsel %vm8620_vm3, %v8487_v45, %v4815_v58  ;;  %v4807_v45 = vand.u32 2147483648, %v8470_v50  ;;  %vm8668_vm3 = vcmp.eq.f32.partialorder %v4850_v2, 8.507059e+37 }
 0x535   : > { %v4656_v53 = vmul.f32 1.442695, %v5428_v23  ;;  %v4854_v49 = vsel %vm8668_vm3, %v4853_v59, %v4849_v36 }
 0x536   : > { %v5594_v11 = vpop.eup %5593  ;;  %v4576_v57 = vpop.f32.mrf.mxu3  ;;  %v4808_v33 = vor.u32 1.1754944e-38, %v4807_v45  ;;  %v4941_v0 = vrot.slane %v4854_v49, 5 }
 0x537   : > { %v5596_v14 = vpop.eup %5595  ;;  %v8572_v28 = vadd.f32 1.0, %v5594_v11  ;;  %v5429_v34 = vmul.f32 -10.0, %v4576_v57  ;;  %v8676_v57 = vsel %vm8591_vm6, %v8585_v17, %v4819_v41 }
 0x538   : > { %v8574_v4 = vpop.eup %5597  ;;  %v8576_v18 = vadd.f32 1.0, %v5596_v14  ;;  %v4834_v14 = vsel %vm8636_vm13, %v8509_v40, %v4830_v22 }
 0x539   : > { %5599 = vrcp.f32 %v8572_v28  ;;  %v4797_v3 = vmul.f32 %v8574_v4, %v8470_v50  ;;  %v4658_v6 = vmul.f32 1.442695, %v5429_v34  ;;  %vm4802_vm4 = vweird.f32 %v8574_v4 }
 0x53a   : > { %5601 = vrcp.f32 %v8576_v18  ;;  %v4565_v30 = vpop.f32.mrf.mxu2  ;;  %vm4861_vm13 = vweird.f32 %v8572_v28  ;;  %vm8684_vm5 = vmor %vm4801_vm14, %vm4802_vm4  ;;  %v8690_v34 = vsel %vm8651_vm15, %v4838_v63, %v4834_v14  ;;  %v4867_v20 = vand.u32 2147483648, %v8572_v28 }
 0x53b   : > { %5603 = vpow2.f32 %v4656_v53  ;;  %v4798_v38 = vsub.f32 1.0, %v4797_v3  ;;  %vm4876_vm6 = vweird.f32 %v8576_v18  ;;  %v4865_v5 = vand.u32 2147483647, %v8572_v28 }
 0x53c   : > { %5605 = vpow2.f32 %v4658_v6  ;;  %v4882_v3 = vand.u32 2147483648, %v8576_v18  ;;  %vm8703_vm14 = vcmp.eq.f32.partialorder %v4805_v44, 8.507059e+37  ;;  %v4880_v51 = vand.u32 2147483647, %v8576_v18 }
 0x53d   : > { %v4799_v37 = vmul.f32 %v8574_v4, %v4798_v38  ;;  %v4939_v50 = vrot.slane %v8676_v57, 7  ;;  %v4940_v27 = vrot.slane %v8690_v34, 6  ;;  %v4868_v15 = vor.u32 1.1754944e-38, %v4867_v20 }
 0x53e   : > { %v4578_v60 = vpop.f32.mrf.mxu3  ;;  %vm4881_vm2 = vcmp.eq.f32.partialorder %v4880_v51, 8.507059e+37 }
 0x53f   : > { %v8597_v46 = vpop.eup %5599  ;;  %v4800_v61 = vadd.f32 %v8574_v4, %v4799_v37 }
 0x540   : > { %v8602_v47 = vpop.eup %5601  ;;  %v4857_v54 = vmul.f32 %v8597_v46, %v8572_v28  ;;  %vm4862_vm12 = vweird.f32 %v8597_v46 }
 0x541   : > { %v4872_v13 = vmul.f32 %v8602_v47, %v8576_v18  ;;  %v5604_v7 = vpop.eup %5603  ;;  %vm4877_vm7 = vweird.f32 %v8602_v47  ;;  %vm8707_vm4 = vmor %vm4861_vm13, %vm4862_vm12  ;;  %v4804_v28 = vsel %vm8684_vm5, %v8574_v4, %v4800_v61  ;;  %vm4866_vm12 = vcmp.eq.f32.partialorder %v4865_v5, 8.507059e+37 }
 0x542   : > { %v4858_v21 = vsub.f32 1.0, %v4857_v54  ;;  %v5606_v24 = vpop.eup %5605  ;;  %v8641_v11 = vadd.f32 1.0, %v5604_v7  ;;  %vm8719_vm15 = vmor %vm4876_vm6, %vm4877_vm7  ;;  %v4883_v18 = vor.u32 1.1754944e-38, %v4882_v3  ;;  %v4809_v8 = vsel %vm8703_vm14, %v4808_v33, %v4804_v28 }
 0x543   : > { %v4873_v39 = vsub.f32 1.0, %v4872_v13  ;;  %v8646_v62 = vadd.f32 1.0, %v5606_v24  ;;  %v4959_v29 = vsel %vm4946_vm0, %v4809_v8, %v4939_v50  ;;  %vm8944_vm14 = vcmask 1043456  }
 0x544   : > { %5607 = vrcp.f32 %v8641_v11  ;;  %v4859_v16 = vmul.f32 %v8597_v46, %v4858_v21  ;;  %v4897_v25 = vand.u32 2147483648, %v8641_v11  ;;  %v4895_v32 = vand.u32 2147483647, %v8641_v11 }
 0x545   : > { %5609 = vrcp.f32 %v8646_v62  ;;  %v4874_v40 = vmul.f32 %v8602_v47, %v4873_v39  ;;  %v4912_v13 = vand.u32 2147483648, %v8646_v62  ;;  %v4910_v58 = vand.u32 2147483647, %v8646_v62 }
 0x546   : > { %v4860_v9 = vadd.f32 %v8597_v46, %v4859_v16  ;;  %vm4891_vm5 = vweird.f32 %v8641_v11  ;;  %vm4906_vm7 = vweird.f32 %v8646_v62 }
 0x547   : > { %v4875_v52 = vadd.f32 %v8602_v47, %v4874_v40  ;;  %v4913_v21 = vor.u32 1.1754944e-38, %v4912_v13 }
 0x548   : > { %v4864_v4 = vsel %vm8707_vm4, %v8597_v46, %v4860_v9  ;;  %vm4896_vm4 = vcmp.eq.f32.partialorder %v4895_v32, 8.507059e+37 }
 0x549   : > { %v4879_v55 = vsel %vm8719_vm15, %v8602_v47, %v4875_v52  ;;  %v4869_v48 = vsel %vm4866_vm12, %v4868_v15, %v4864_v4  ;;  %v4898_v47 = vor.u32 1.1754944e-38, %v4897_v25  ;;  %vm4911_vm12 = vcmp.eq.f32.partialorder %v4910_v58, 8.507059e+37 }
 0x54a   : > { %v5608_v17 = vpop.eup %5607  ;;  %v4884_v31 = vsel %vm4881_vm2, %v4883_v18, %v4879_v55  ;;  %v4942_v22 = vrot.slane %v4869_v48, 4 }
 0x54b   : > { %v5610_v10 = vpop.eup %5609  ;;  %v4887_v56 = vmul.f32 %v5608_v17, %v8641_v11  ;;  %vm4892_vm3 = vweird.f32 %v5608_v17  ;;  %v4943_v24 = vrot.slane %v4884_v31, 3 }
 0x54c   : > { %v4902_v30 = vmul.f32 %v5610_v10, %v8646_v62  ;;  %vm4907_vm13 = vweird.f32 %v5610_v10  ;;  %vm4893_vm6 = vmor %vm4891_vm5, %vm4892_vm3  ;;  %v4960_v62 = vsel %vm4948_vm10, %v4940_v27, %v4941_v0 }
 0x54d   : > { %v4888_v60 = vsub.f32 1.0, %v4887_v56  ;;  %vm4908_vm15 = vmor %vm4906_vm7, %vm4907_vm13  ;;  %v4962_v41 = vsel %vm4952_vm1, %v4942_v22, %v4943_v24  ;;  %v4961_v63 = vsel %vm4950_vm11, %v4959_v29, %v4960_v62 }
 0x54e   : > { %v4903_v38 = vsub.f32 1.0, %v4902_v30 }
 0x54f   : > { %v4889_v54 = vmul.f32 %v5608_v17, %v4888_v60 }
 0x550   : > { %v4904_v46 = vmul.f32 %v5610_v10, %v4903_v38 }
 0x551   : > { %v4890_v26 = vadd.f32 %v5608_v17, %v4889_v54 }
 0x552   : > { %v4905_v7 = vadd.f32 %v5610_v10, %v4904_v46 }
 0x553   : > { %v4894_v35 = vsel %vm4893_vm6, %v5608_v17, %v4890_v26 }
 0x554   : > { %v4899_v37 = vsel %vm4896_vm4, %v4898_v47, %v4894_v35  ;;  %v4909_v12 = vsel %vm4908_vm15, %v5610_v10, %v4905_v7 }
 0x555   : > { %v4944_v2 = vrot.slane %v4899_v37, 2  ;;  %v4914_v39 = vsel %vm4911_vm12, %v4913_v21, %v4909_v12 }
 0x556   : > { %v4945_v11 = vrot.slane %v4914_v39, 1 }
 0x558   : > { %v4963_v1 = vsel %vm4954_vm9, %v4944_v2, %v4945_v11 }
 0x559   : > { %v4964_v14 = vsel %vm4956_vm8, %v4962_v41, %v4963_v1 }
 0x55a   : > { %v4965_v42 = vsel %vm8944_vm14, %v4961_v63, %v4964_v14 }
 0x55b   : > { %4969 = vst [vmem:[%s8628_s11 + $0x8] sm:$0xff] %v4965_v42 }
 0x55c   : > { %5734 = shalt.err (!%p5731_p8)
}
 0x55d   : > { %5481 = dma.vmem_to_hbm [thread:$0]  (%p5905_p13), %s4984_s9, 256, %s4986_s20, %s4971_s22  }
 0x55e PF: > { %s8945_s29 = sld [smem:[#allocation13_spill]]  ;;  %p5501_p9 = scmp.ge.s32.totalorder %s5781_s30, 2 }
 0x560   : > { %p5495_p10 = pnand %p5501_p9, %p5913_p4 }
 0x562   : > { %p5496_p11 = pneg %p5495_p10 }
 0x564   : > { %s4997_s24 = sand.u32 1, %s8945_s29  }
 0x565   : > { %s4998_s10 = scalar_lea.sflag [#allocation4], %s4997_s24 }
 0x566   : > { %5764 = dma.done.wait (%p5496_p11), %s4998_s10, 256  }
 0x567   : > { %5766 = vsyncadd (%p5496_p11), %s4998_s10, 4294967040  ;;  %s8947_s30 = sld [smem:[#allocation15_spill]]  ;;  %s8950_s27 = smov %s5773_s28 }
 0x568   : > { %s8948_s11 = sld [smem:[#allocation14_spill]] }
 0x569   : > { %s8949_s29 = sld [smem:[#allocation16_spill]] }
 0x56d   : > { %p24_p0 = scmp.ge.s32.totalorder %s8947_s30, 6  }
 0x56e   : > { %s8951_s28 = smov %s8948_s11 }
 0x56f   :  { %26 = sbr.rel (!%p24_p0) target bundleno = 9 (0x9), region = 114 }
 0x574   :  { %5004 = vsyncpa [#allocation3], 1 }
 0x575   :  { %5006 = vsyncpa [#allocation3 + $0x1], 1 }
 0x576   :  { %5007 = vsyncpa [#allocation6], 1 }
 0x577   :  { %5009 = vsyncpa [#allocation6 + $0x1], 1 }
 0x578   :  { %5010 = vsyncpa [#allocation4], 1 }
 0x579   :  { %5012 = vsyncpa [#allocation4 + $0x1], 1 }

</bundles_post_ra>
